<compile_context>
chip_gen: v7x
topology: tpu7x:2x2x1
jax: 0.10.0
libtpu: 0.0.40
codegen_flags: <defaults>
</compile_context>

<pallas_src>
import math

import jax
import jax.numpy as jnp
from jax.experimental import pallas as pl

# ---------------- config (small, BERT-like) ----------------
VOCAB = 100
VOCAB_PAD = 128            # word-embedding table padded to a lane-aligned row count
HIDDEN = 128
NUM_LAYERS = 2
NUM_HEADS = 2
HEAD_DIM = HIDDEN // NUM_HEADS
INTERMEDIATE = 256
MAX_POS = 32
TYPE_VOCAB = 2             # in-kernel type-embedding lerp assumes exactly 2 token-type ids
SEQ = 16
BATCH = 2
LN_EPS = 1e-12

# rows of the packed per-layer "small" parameter block (shape (NUM_LAYERS, 8, HIDDEN))
_ROW_BO, _ROW_LN1_G, _ROW_LN1_B, _ROW_B2, _ROW_LN2_G, _ROW_LN2_B = 0, 1, 2, 3, 4, 5


# ---------------- in-kernel helpers ----------------
def _layernorm(x, gamma, beta):
    mean = jnp.mean(x, axis=-1, keepdims=True)
    var = jnp.mean((x - mean) ** 2, axis=-1, keepdims=True)
    return (x - mean) * jax.lax.rsqrt(var + LN_EPS) * gamma + beta


def _gelu(x):
    # exact (erf-based) gelu, matching torch.nn.functional.gelu default
    return 0.5 * x * (1.0 + jax.lax.erf(x * (1.0 / math.sqrt(2.0))))


# ---------------- fused forward kernel (embeddings + encoder + pooler) ----------------
def make_fused_kernel(mix: bool):
    def embed_ln(ids, tids, word, pos_slab, type0, type1, gamma, beta):
        # word gather as a one-hot MXU matmul (no hardware gather needed)
        bs = ids.shape[0]
        onehot = (ids == jax.lax.broadcasted_iota(jnp.int32, (bs, VOCAB_PAD), 1)
                  ).astype(jnp.float32)
        we = jnp.dot(onehot, word, preferred_element_type=jnp.float32)
        tf = tids.astype(jnp.float32)                       # (BS, 1), values in {0, 1}
        te = type0 + tf * (type1 - type0)                   # lerp over the 2 type rows
        return _layernorm(we + te + pos_slab, gamma, beta)

    def kernel(*refs):
        if mix:
            (ids_ref, tids_ref, ids2_ref, tids2_ref, l_ref, amask_ref,
             word_ref, pos_ref, type_ref, embln_ref,
             wqkv_ref, bqkv_ref, wo_ref, w1_ref, b1_ref, w2_ref, small_ref,
             pw_ref, pb_ref,
             allh_ref, pooled_ref, emb1_ref) = refs
        else:
            (ids_ref, tids_ref, amask_ref,
             word_ref, pos_ref, type_ref, embln_ref,
             wqkv_ref, bqkv_ref, wo_ref, w1_ref, b1_ref, w2_ref, small_ref,
             pw_ref, pb_ref,
             allh_ref, pooled_ref) = refs

        B, S = amask_ref.shape
        H = HIDDEN

        mask = (1.0 - amask_ref[...]) * -10000.0                         # (B, S) additive
        word = word_ref[...]
        pos_slab = jnp.concatenate([pos_ref[0:S, :]] * B, axis=0)        # (B*S, H)
        type0, type1 = type_ref[0:1, :], type_ref[1:2, :]
        emb_g, emb_b = embln_ref[0:1, :], embln_ref[1:2, :]

        e1 = embed_ln(ids_ref[...], tids_ref[...], word, pos_slab, type0, type1, emb_g, emb_b)
        if mix:
            emb1_ref[...] = e1            # stream 1's unmixed post-LN embedding output
            e2 = embed_ln(ids2_ref[...], tids2_ref[...], word, pos_slab,
                          type0, type1, emb_g, emb_b)
            lv = l_ref[...]               # (1, 1)
            x = lv * e1 + (1.0 - lv) * e2
        else:
            x = e1
        allh_ref[0] = x                   # all_hidden[0] == encoder input

        scale = 1.0 / math.sqrt(HEAD_DIM)
        # TODO(synk): head_mask multiplication not implemented (module run with head_mask=None)
        for layer in range(NUM_LAYERS):
            wqkv = wqkv_ref[layer]        # (H, 3H) bf16 fused QKV weight
            wo = wo_ref[layer]            # (H, H)  bf16
            sp = small_ref[layer]         # (8, H)  f32 packed small params

            qkv = jnp.dot(x.astype(jnp.bfloat16), wqkv,
                          preferred_element_type=jnp.float32) + bqkv_ref[layer]
            q = qkv[:, 0:H]               # 128-aligned lane slices, f32
            k = qkv[:, H:2 * H]
            v = qkv[:, 2 * H:3 * H]

            # Per-(batch, head) attention; head contexts re-merged into a single (B*S, H)
            # tile so the output projection is ONE dot against the full wo.
            ctx_rows = []
            for b in range(B):
                rows = slice(b * S, (b + 1) * S)
                mb = mask[b:b + 1, :]
                head_ctx = []
                for h in range(NUM_HEADS):
                    cols = slice(h * HEAD_DIM, (h + 1) * HEAD_DIM)
                    qh = q[rows, cols].astype(jnp.bfloat16)
                    kh = k[rows, cols].astype(jnp.bfloat16)
                    vh = v[rows, cols].astype(jnp.bfloat16)
                    scores = jax.lax.dot_general(
                        qh, kh, (((1,), (1,)), ((), ())),
                        preferred_element_type=jnp.float32) * scale + mb
                    p = jnp.exp(scores - jnp.max(scores, axis=-1, keepdims=True))
                    # approx reciprocal (EUP slot); tiny relative error vs exact division
                    p = p * pl.reciprocal(jnp.sum(p, axis=-1, keepdims=True), approx=True)
                    head_ctx.append(jnp.dot(p.astype(jnp.bfloat16), vh,
                                            preferred_element_type=jnp.float32))
                ctx_rows.append(jnp.concatenate(head_ctx, axis=1))        # (S, H)
            ctx = jnp.concatenate(ctx_rows, axis=0)                       # (B*S, H)

            attn = jnp.dot(ctx.astype(jnp.bfloat16), wo,
                           preferred_element_type=jnp.float32) + sp[_ROW_BO:_ROW_BO + 1]
            res1 = _layernorm(attn + x, sp[_ROW_LN1_G:_ROW_LN1_G + 1],
                              sp[_ROW_LN1_B:_ROW_LN1_B + 1])

            inter = _gelu(jnp.dot(res1.astype(jnp.bfloat16), w1_ref[layer],
                                  preferred_element_type=jnp.float32) + b1_ref[layer])
            ffn = jnp.dot(inter.astype(jnp.bfloat16), w2_ref[layer],
                          preferred_element_type=jnp.float32) + sp[_ROW_B2:_ROW_B2 + 1]
            x = _layernorm(ffn + res1, sp[_ROW_LN2_G:_ROW_LN2_G + 1],
                           sp[_ROW_LN2_B:_ROW_LN2_B + 1])
            allh_ref[layer + 1] = x

        # Pooler: token 0 of each sequence from the VMEM-resident final hidden slab.
        x0 = jnp.concatenate([x[b * S:b * S + 1, :] for b in range(B)], axis=0)   # (B, H)
        pooled_ref[...] = jnp.tanh(
            jnp.dot(x0.astype(jnp.bfloat16), pw_ref[...],
                    preferred_element_type=jnp.float32) + pb_ref[...])

    return kernel


def fused_forward(params, input_ids, token_type_ids, attention_mask,
                  input_ids2=None, token_type_ids2=None, l=None):
    """Whole forward in one pallas_call (no grid: everything is a full VMEM block)."""
    B, S = input_ids.shape
    L = NUM_LAYERS
    mix = input_ids2 is not None

    ids1 = input_ids.reshape(B * S, 1).astype(jnp.int32)
    tids1 = token_type_ids.reshape(B * S, 1).astype(jnp.int32)
    amask = attention_mask.astype(jnp.float32)

    args = [ids1, tids1]
    out_shape = [jax.ShapeDtypeStruct((L + 1, B * S, HIDDEN), jnp.float32),  # all_hidden
                 jax.ShapeDtypeStruct((B, HIDDEN), jnp.float32)]             # pooled
    if mix:
        args += [input_ids2.reshape(B * S, 1).astype(jnp.int32),
                 token_type_ids2.reshape(B * S, 1).astype(jnp.int32),
                 jnp.full((1, 1), l, jnp.float32)]
        out_shape.append(jax.ShapeDtypeStruct((B * S, HIDDEN), jnp.float32))  # emb1 (stream 1)
    args += [amask,
             params["word_emb"], params["pos_emb"], params["type_emb"], params["emb_ln"],
             params["wqkv"], params["bqkv"], params["wo"],
             params["w1"], params["b1"], params["w2"], params["small"],
             params["pooler_w"], params["pooler_b"]]

    outs = pl.pallas_call(make_fused_kernel(mix), out_shape=out_shape)(*args)
    all_h = outs[0].reshape(L + 1, B, S, HIDDEN)
    pooled = outs[1]
    if mix:
        return all_h, pooled, outs[2].reshape(B, S, HIDDEN)
    return all_h, pooled


# ---------------- top-level forward (mix routing) ----------------
def _unpack(all_h, pooled):
    sequence_output = all_h[NUM_LAYERS]
    embedding_output = all_h[0]
    all_hidden = tuple(all_h[i] for i in range(NUM_LAYERS + 1))
    return sequence_output, pooled, embedding_output, all_hidden


def bert_model4mix_forward(params, input_ids, attention_mask, token_type_ids,
                           input_ids2=None, attention_mask2=None, token_type_ids2=None,
                           l=None, mix_layer=1000):
    if attention_mask is None:
        if input_ids2 is not None:
            attention_mask2 = jnp.ones_like(input_ids2)
        attention_mask = jnp.ones_like(input_ids)
    if token_type_ids is None:
        token_type_ids = jnp.zeros_like(input_ids)
        if input_ids2 is not None:
            token_type_ids2 = jnp.zeros_like(input_ids2)

    if input_ids2 is not None and mix_layer == -1:
        # Mix the two streams' post-LN embeddings in-kernel (l*e1 + (1-l)*e2), run the encoder
        # on the mixed stream with stream 1's mask (matches the original). embedding_output is
        # stream 1's unmixed post-LN embedding; all_hidden[0] is the mixed tensor.
        all_h, pooled, emb1 = fused_forward(params, input_ids, token_type_ids, attention_mask,
                                            input_ids2, token_type_ids2, l)
        seq_out, pooled, _, all_hidden = _unpack(all_h, pooled)
        return seq_out, pooled, emb1, all_hidden

    # Single stream, or mix_layer != -1: in the original module the `elif i == mix_layer`
    # branch is shadowed by `if i <= mix_layer`, so stream 2 never influences any returned
    # output — its (dead) compute is dropped entirely.
    all_h, pooled = fused_forward(params, input_ids, token_type_ids, attention_mask)
    return _unpack(all_h, pooled)


# ---------------- deterministic parameter init ----------------
def init_params(key):
    keys = iter(jax.random.split(key, 16))

    def nrm(shape, dtype=jnp.float32):
        return (jax.random.normal(next(keys), shape, jnp.float32) * 0.02).astype(dtype)

    word = nrm((VOCAB, HIDDEN))
    word = jnp.pad(word, ((0, VOCAB_PAD - VOCAB), (0, 0)))   # lane-aligned one-hot gather

    emb_ln = jnp.concatenate([jnp.ones((1, HIDDEN), jnp.float32),
                              jnp.zeros((1, HIDDEN), jnp.float32)], axis=0)
    small = jnp.zeros((NUM_LAYERS, 8, HIDDEN), jnp.float32)
    small = small.at[:, _ROW_LN1_G, :].set(1.0)
    small = small.at[:, _ROW_LN2_G, :].set(1.0)

    return {
        "word_emb": word,                                         # f32 (exact gather)
        "pos_emb": nrm((MAX_POS, HIDDEN)),
        "type_emb": nrm((TYPE_VOCAB, HIDDEN)),
        "emb_ln": emb_ln,
        # matmul weights in bf16 (MXU-native on v5e/v6e/v7x); biases/LN params stay f32
        "wqkv": nrm((NUM_LAYERS, HIDDEN, 3 * HIDDEN), jnp.bfloat16),
        "bqkv": jnp.zeros((NUM_LAYERS, 1, 3 * HIDDEN), jnp.float32),
        "wo": nrm((NUM_LAYERS, HIDDEN, HIDDEN), jnp.bfloat16),
        "w1": nrm((NUM_LAYERS, HIDDEN, INTERMEDIATE), jnp.bfloat16),
        "b1": jnp.zeros((NUM_LAYERS, 1, INTERMEDIATE), jnp.float32),
        "w2": nrm((NUM_LAYERS, INTERMEDIATE, HIDDEN), jnp.bfloat16),
        "small": small,
        "pooler_w": nrm((HIDDEN, HIDDEN), jnp.bfloat16),
        "pooler_b": jnp.zeros((1, HIDDEN), jnp.float32),
    }


if __name__ == "__main__":
    key = jax.random.PRNGKey(0)
    pkey, ikey, ikey2 = jax.random.split(key, 3)
    params = init_params(pkey)

    input_ids = jax.random.randint(ikey, (BATCH, SEQ), 0, VOCAB, dtype=jnp.int32)
    attention_mask = jnp.ones((BATCH, SEQ), jnp.int32)
    token_type_ids = jnp.zeros((BATCH, SEQ), jnp.int32)

    # single-stream path (one fused launch)
    seq_out, pooled, emb_out, all_hidden = bert_model4mix_forward(
        params, input_ids, attention_mask, token_type_ids)
    jax.block_until_ready(seq_out)
    jax.block_until_ready(pooled)
    jax.block_until_ready(emb_out)
    jax.block_until_ready(all_hidden[-1])

    assert seq_out.shape == (BATCH, SEQ, HIDDEN)
    assert pooled.shape == (BATCH, HIDDEN)
    assert emb_out.shape == (BATCH, SEQ, HIDDEN)
    assert len(all_hidden) == NUM_LAYERS + 1
    assert all(h.shape == (BATCH, SEQ, HIDDEN) for h in all_hidden)
    assert bool(jnp.all(jnp.isfinite(seq_out))) and bool(jnp.all(jnp.isfinite(pooled)))

    # mix_layer == -1 path (embedding mixing fused into the same single launch)
    input_ids2 = jax.random.randint(ikey2, (BATCH, SEQ), 0, VOCAB, dtype=jnp.int32)
    seq_m, pooled_m, emb_m, hid_m = bert_model4mix_forward(
        params, input_ids, attention_mask, token_type_ids,
        input_ids2, attention_mask, token_type_ids, l=0.3, mix_layer=-1)
    jax.block_until_ready(seq_m)
    assert seq_m.shape == (BATCH, SEQ, HIDDEN)
    assert emb_m.shape == (BATCH, SEQ, HIDDEN)
    assert bool(jnp.all(jnp.isfinite(seq_m))) and bool(jnp.all(jnp.isfinite(pooled_m)))

    print("KERNEL_OK")
</pallas_src>

<mosaic_0001>
module attributes {stable_mosaic.version = 11 : i64} {
  func.func @kernel(%arg0: memref<32x1xi32, #tpu.memory_space<vmem>>, %arg1: memref<32x1xi32, #tpu.memory_space<vmem>>, %arg2: memref<2x16xf32, #tpu.memory_space<vmem>>, %arg3: memref<128x128xf32, #tpu.memory_space<vmem>>, %arg4: memref<32x128xf32, #tpu.memory_space<vmem>>, %arg5: memref<2x128xf32, #tpu.memory_space<vmem>>, %arg6: memref<2x128xf32, #tpu.memory_space<vmem>>, %arg7: memref<2x128x384xbf16, #tpu.memory_space<vmem>>, %arg8: memref<2x1x384xf32, #tpu.memory_space<vmem>>, %arg9: memref<2x128x128xbf16, #tpu.memory_space<vmem>>, %arg10: memref<2x128x256xbf16, #tpu.memory_space<vmem>>, %arg11: memref<2x1x256xf32, #tpu.memory_space<vmem>>, %arg12: memref<2x256x128xbf16, #tpu.memory_space<vmem>>, %arg13: memref<2x8x128xf32, #tpu.memory_space<vmem>>, %arg14: memref<128x128xbf16, #tpu.memory_space<vmem>>, %arg15: memref<1x128xf32, #tpu.memory_space<vmem>>, %arg16: memref<3x32x128xf32, #tpu.memory_space<vmem>>, %arg17: memref<2x128xf32, #tpu.memory_space<vmem>>) attributes {dimension_semantics = [], scalar_prefetch = 0 : i64, scratch_operands = 0 : i64, tpu.core_type = #tpu.core_type<tc>} {
    %c0 = arith.constant 0 : index
    %c0_0 = arith.constant 0 : index
    %0 = vector.load %arg2[%c0, %c0_0] : memref<2x16xf32, #tpu.memory_space<vmem>>, vector<2x16xf32>
    %cst = arith.constant 1.000000e+00 : f32
    %1 = vector.broadcast %cst : f32 to vector<2x16xf32>
    %2 = arith.subf %1, %0 : vector<2x16xf32>
    %cst_1 = arith.constant -1.000000e+04 : f32
    %3 = vector.broadcast %cst_1 : f32 to vector<2x16xf32>
    %4 = arith.mulf %2, %3 : vector<2x16xf32>
    %c0_2 = arith.constant 0 : index
    %c0_3 = arith.constant 0 : index
    %5 = vector.load %arg3[%c0_2, %c0_3] : memref<128x128xf32, #tpu.memory_space<vmem>>, vector<128x128xf32>
    %c0_4 = arith.constant 0 : index
    %c0_5 = arith.constant 0 : index
    %6 = vector.load %arg4[%c0_4, %c0_5] : memref<32x128xf32, #tpu.memory_space<vmem>>, vector<16x128xf32>
    %7 = tpu.concatenate %6, %6 in 0 : vector<16x128xf32>, vector<16x128xf32> -> vector<32x128xf32>
    %c0_6 = arith.constant 0 : index
    %c0_7 = arith.constant 0 : index
    %8 = vector.load %arg5[%c0_6, %c0_7] : memref<2x128xf32, #tpu.memory_space<vmem>>, vector<1x128xf32>
    %c1 = arith.constant 1 : index
    %c0_8 = arith.constant 0 : index
    %9 = vector.load %arg5[%c1, %c0_8] : memref<2x128xf32, #tpu.memory_space<vmem>>, vector<1x128xf32>
    %c0_9 = arith.constant 0 : index
    %c0_10 = arith.constant 0 : index
    %10 = vector.load %arg6[%c0_9, %c0_10] : memref<2x128xf32, #tpu.memory_space<vmem>>, vector<1x128xf32>
    %c1_11 = arith.constant 1 : index
    %c0_12 = arith.constant 0 : index
    %11 = vector.load %arg6[%c1_11, %c0_12] : memref<2x128xf32, #tpu.memory_space<vmem>>, vector<1x128xf32>
    %c0_13 = arith.constant 0 : index
    %c0_14 = arith.constant 0 : index
    %12 = vector.load %arg0[%c0_13, %c0_14] : memref<32x1xi32, #tpu.memory_space<vmem>>, vector<32x1xi32>
    %c0_15 = arith.constant 0 : index
    %c0_16 = arith.constant 0 : index
    %13 = vector.load %arg1[%c0_15, %c0_16] : memref<32x1xi32, #tpu.memory_space<vmem>>, vector<32x1xi32>
    %14 = tpu.iota {dimensions = array<i32: 1>} : vector<32x128xi32>
    %15 = vector.broadcast %12 : vector<32x1xi32> to vector<32x128xi32>
    %16 = arith.cmpi eq, %15, %14 : vector<32x128xi32>
    %17 = arith.extui %16 : vector<32x128xi1> to vector<32x128xi32>
    %18 = arith.sitofp %17 : vector<32x128xi32> to vector<32x128xf32>
    %cst_17 = arith.constant dense<0.000000e+00> : vector<32x128xf32>
    %19 = tpu.matmul %18, %5, %cst_17 {dimension_numbers = #tpu.dot_dimension_numbers<[1], [0], [0], [1], [0, 0, 1, 1], [], []>} : vector<32x128xf32>, vector<128x128xf32>, vector<32x128xf32> -> vector<32x128xf32>
    %20 = arith.sitofp %13 : vector<32x1xi32> to vector<32x1xf32>
    %21 = arith.subf %9, %8 : vector<1x128xf32>
    %22 = vector.broadcast %20 : vector<32x1xf32> to vector<32x128xf32>
    %23 = vector.broadcast %21 : vector<1x128xf32> to vector<32x128xf32>
    %24 = arith.mulf %22, %23 : vector<32x128xf32>
    %25 = vector.broadcast %8 : vector<1x128xf32> to vector<32x128xf32>
    %26 = arith.addf %25, %24 : vector<32x128xf32>
    %27 = arith.addf %19, %26 : vector<32x128xf32>
    %28 = arith.addf %27, %7 : vector<32x128xf32>
    %cst_18 = arith.constant dense<0.000000e+00> : vector<32xf32>
    %29 = vector.multi_reduction <add>, %28, %cst_18 [1] : vector<32x128xf32> to vector<32xf32>
    %30 = vector.shape_cast %29 : vector<32xf32> to vector<32x1xf32>
    %cst_19 = arith.constant 1.280000e+02 : f32
    %31 = vector.broadcast %cst_19 : f32 to vector<32x1xf32>
    %32 = arith.divf %30, %31 : vector<32x1xf32>
    %33 = vector.broadcast %32 : vector<32x1xf32> to vector<32x128xf32>
    %34 = arith.subf %28, %33 : vector<32x128xf32>
    %35 = arith.mulf %34, %34 : vector<32x128xf32>
    %cst_20 = arith.constant dense<0.000000e+00> : vector<32xf32>
    %36 = vector.multi_reduction <add>, %35, %cst_20 [1] : vector<32x128xf32> to vector<32xf32>
    %37 = vector.shape_cast %36 : vector<32xf32> to vector<32x1xf32>
    %cst_21 = arith.constant 1.280000e+02 : f32
    %38 = vector.broadcast %cst_21 : f32 to vector<32x1xf32>
    %39 = arith.divf %37, %38 : vector<32x1xf32>
    %40 = vector.broadcast %32 : vector<32x1xf32> to vector<32x128xf32>
    %41 = arith.subf %28, %40 : vector<32x128xf32>
    %cst_22 = arith.constant 9.99999996E-13 : f32
    %42 = vector.broadcast %cst_22 : f32 to vector<32x1xf32>
    %43 = arith.addf %39, %42 : vector<32x1xf32>
    %44 = math.rsqrt %43 : vector<32x1xf32>
    %45 = vector.broadcast %44 : vector<32x1xf32> to vector<32x128xf32>
    %46 = arith.mulf %41, %45 : vector<32x128xf32>
    %47 = vector.broadcast %10 : vector<1x128xf32> to vector<32x128xf32>
    %48 = arith.mulf %46, %47 : vector<32x128xf32>
    %49 = vector.broadcast %11 : vector<1x128xf32> to vector<32x128xf32>
    %50 = arith.addf %48, %49 : vector<32x128xf32>
    %c0_23 = arith.constant 0 : index
    %c0_24 = arith.constant 0 : index
    %c0_25 = arith.constant 0 : index
    %51 = vector.load %arg16[%c0_23, %c0_24, %c0_25] : memref<3x32x128xf32, #tpu.memory_space<vmem>>, vector<1x32x128xf32>
    %52 = vector.shape_cast %51 : vector<1x32x128xf32> to vector<32x128xf32>
    %53 = vector.shape_cast %50 : vector<32x128xf32> to vector<1x32x128xf32>
    tpu.vector_store %arg16[%c0_23, %c0_24, %c0_25], %53 {strides = array<i32>} : memref<3x32x128xf32, #tpu.memory_space<vmem>>, vector<1x32x128xf32>,
    %c0_26 = arith.constant 0 : index
    %c0_27 = arith.constant 0 : index
    %c0_28 = arith.constant 0 : index
    %54 = vector.load %arg7[%c0_26, %c0_27, %c0_28] : memref<2x128x384xbf16, #tpu.memory_space<vmem>>, vector<1x128x384xbf16>
    %55 = vector.shape_cast %54 : vector<1x128x384xbf16> to vector<128x384xbf16>
    %c0_29 = arith.constant 0 : index
    %c0_30 = arith.constant 0 : index
    %c0_31 = arith.constant 0 : index
    %56 = vector.load %arg9[%c0_29, %c0_30, %c0_31] : memref<2x128x128xbf16, #tpu.memory_space<vmem>>, vector<1x128x128xbf16>
    %57 = vector.shape_cast %56 : vector<1x128x128xbf16> to vector<128x128xbf16>
    %c0_32 = arith.constant 0 : index
    %c0_33 = arith.constant 0 : index
    %c0_34 = arith.constant 0 : index
    %58 = vector.load %arg13[%c0_32, %c0_33, %c0_34] : memref<2x8x128xf32, #tpu.memory_space<vmem>>, vector<1x8x128xf32>
    %59 = vector.shape_cast %58 : vector<1x8x128xf32> to vector<8x128xf32>
    %60 = arith.truncf %50 : vector<32x128xf32> to vector<32x128xbf16>
    %cst_35 = arith.constant dense<0.000000e+00> : vector<32x384xf32>
    %61 = tpu.matmul %60, %55, %cst_35 {dimension_numbers = #tpu.dot_dimension_numbers<[1], [0], [0], [1], [0, 0, 1, 1], [], []>} : vector<32x128xbf16>, vector<128x384xbf16>, vector<32x384xf32> -> vector<32x384xf32>
    %c0_36 = arith.constant 0 : index
    %c0_37 = arith.constant 0 : index
    %c0_38 = arith.constant 0 : index
    %62 = vector.load %arg8[%c0_36, %c0_37, %c0_38] : memref<2x1x384xf32, #tpu.memory_space<vmem>>, vector<1x1x384xf32>
    %63 = vector.shape_cast %62 : vector<1x1x384xf32> to vector<1x384xf32>
    %64 = vector.broadcast %63 : vector<1x384xf32> to vector<32x384xf32>
    %65 = arith.addf %61, %64 : vector<32x384xf32>
    %66 = vector.extract_strided_slice %65 {offsets = [0, 0], sizes = [32, 128], strides = [1, 1]} : vector<32x384xf32> to vector<32x128xf32>
    %67 = vector.extract_strided_slice %65 {offsets = [0, 128], sizes = [32, 128], strides = [1, 1]} : vector<32x384xf32> to vector<32x128xf32>
    %68 = vector.extract_strided_slice %65 {offsets = [0, 256], sizes = [32, 128], strides = [1, 1]} : vector<32x384xf32> to vector<32x128xf32>
    %69 = vector.extract_strided_slice %4 {offsets = [0, 0], sizes = [1, 16], strides = [1, 1]} : vector<2x16xf32> to vector<1x16xf32>
    %70 = vector.extract_strided_slice %66 {offsets = [0, 0], sizes = [16, 64], strides = [1, 1]} : vector<32x128xf32> to vector<16x64xf32>
    %71 = arith.truncf %70 : vector<16x64xf32> to vector<16x64xbf16>
    %72 = vector.extract_strided_slice %67 {offsets = [0, 0], sizes = [16, 64], strides = [1, 1]} : vector<32x128xf32> to vector<16x64xf32>
    %73 = arith.truncf %72 : vector<16x64xf32> to vector<16x64xbf16>
    %74 = vector.extract_strided_slice %68 {offsets = [0, 0], sizes = [16, 64], strides = [1, 1]} : vector<32x128xf32> to vector<16x64xf32>
    %75 = arith.truncf %74 : vector<16x64xf32> to vector<16x64xbf16>
    %cst_39 = arith.constant dense<0.000000e+00> : vector<16x16xf32>
    %76 = tpu.matmul %71, %73, %cst_39 {dimension_numbers = #tpu.dot_dimension_numbers<[1], [1], [0], [0], [0, 0, 1, 0], [], []>} : vector<16x64xbf16>, vector<16x64xbf16>, vector<16x16xf32> -> vector<16x16xf32>
    %cst_40 = arith.constant 1.250000e-01 : f32
    %77 = vector.broadcast %cst_40 : f32 to vector<16x16xf32>
    %78 = arith.mulf %76, %77 : vector<16x16xf32>
    %79 = vector.broadcast %69 : vector<1x16xf32> to vector<16x16xf32>
    %80 = arith.addf %78, %79 : vector<16x16xf32>
    %cst_41 = arith.constant dense<0xFF800000> : vector<16xf32>
    %81 = vector.multi_reduction <maximumf>, %80, %cst_41 [1] : vector<16x16xf32> to vector<16xf32>
    %82 = vector.shape_cast %81 : vector<16xf32> to vector<16x1xf32>
    %83 = vector.broadcast %82 : vector<16x1xf32> to vector<16x16xf32>
    %84 = arith.subf %80, %83 : vector<16x16xf32>
    %85 = math.exp %84 : vector<16x16xf32>
    %cst_42 = arith.constant dense<0.000000e+00> : vector<16xf32>
    %86 = vector.multi_reduction <add>, %85, %cst_42 [1] : vector<16x16xf32> to vector<16xf32>
    %87 = vector.shape_cast %86 : vector<16xf32> to vector<16x1xf32>
    %88 = tpu.reciprocal %87 {approx = true} : vector<16x1xf32> -> vector<16x1xf32>
    %89 = vector.broadcast %88 : vector<16x1xf32> to vector<16x16xf32>
    %90 = arith.mulf %85, %89 : vector<16x16xf32>
    %91 = arith.truncf %90 : vector<16x16xf32> to vector<16x16xbf16>
    %cst_43 = arith.constant dense<0.000000e+00> : vector<16x64xf32>
    %92 = tpu.matmul %91, %75, %cst_43 {dimension_numbers = #tpu.dot_dimension_numbers<[1], [0], [0], [1], [0, 0, 1, 1], [], []>} : vector<16x16xbf16>, vector<16x64xbf16>, vector<16x64xf32> -> vector<16x64xf32>
    %93 = vector.extract_strided_slice %66 {offsets = [0, 64], sizes = [16, 64], strides = [1, 1]} : vector<32x128xf32> to vector<16x64xf32>
    %94 = arith.truncf %93 : vector<16x64xf32> to vector<16x64xbf16>
    %95 = vector.extract_strided_slice %67 {offsets = [0, 64], sizes = [16, 64], strides = [1, 1]} : vector<32x128xf32> to vector<16x64xf32>
    %96 = arith.truncf %95 : vector<16x64xf32> to vector<16x64xbf16>
    %97 = vector.extract_strided_slice %68 {offsets = [0, 64], sizes = [16, 64], strides = [1, 1]} : vector<32x128xf32> to vector<16x64xf32>
    %98 = arith.truncf %97 : vector<16x64xf32> to vector<16x64xbf16>
    %cst_44 = arith.constant dense<0.000000e+00> : vector<16x16xf32>
    %99 = tpu.matmul %94, %96, %cst_44 {dimension_numbers = #tpu.dot_dimension_numbers<[1], [1], [0], [0], [0, 0, 1, 0], [], []>} : vector<16x64xbf16>, vector<16x64xbf16>, vector<16x16xf32> -> vector<16x16xf32>
    %cst_45 = arith.constant 1.250000e-01 : f32
    %100 = vector.broadcast %cst_45 : f32 to vector<16x16xf32>
    %101 = arith.mulf %99, %100 : vector<16x16xf32>
    %102 = vector.broadcast %69 : vector<1x16xf32> to vector<16x16xf32>
    %103 = arith.addf %101, %102 : vector<16x16xf32>
    %cst_46 = arith.constant dense<0xFF800000> : vector<16xf32>
    %104 = vector.multi_reduction <maximumf>, %103, %cst_46 [1] : vector<16x16xf32> to vector<16xf32>
    %105 = vector.shape_cast %104 : vector<16xf32> to vector<16x1xf32>
    %106 = vector.broadcast %105 : vector<16x1xf32> to vector<16x16xf32>
    %107 = arith.subf %103, %106 : vector<16x16xf32>
    %108 = math.exp %107 : vector<16x16xf32>
    %cst_47 = arith.constant dense<0.000000e+00> : vector<16xf32>
    %109 = vector.multi_reduction <add>, %108, %cst_47 [1] : vector<16x16xf32> to vector<16xf32>
    %110 = vector.shape_cast %109 : vector<16xf32> to vector<16x1xf32>
    %111 = tpu.reciprocal %110 {approx = true} : vector<16x1xf32> -> vector<16x1xf32>
    %112 = vector.broadcast %111 : vector<16x1xf32> to vector<16x16xf32>
    %113 = arith.mulf %108, %112 : vector<16x16xf32>
    %114 = arith.truncf %113 : vector<16x16xf32> to vector<16x16xbf16>
    %cst_48 = arith.constant dense<0.000000e+00> : vector<16x64xf32>
    %115 = tpu.matmul %114, %98, %cst_48 {dimension_numbers = #tpu.dot_dimension_numbers<[1], [0], [0], [1], [0, 0, 1, 1], [], []>} : vector<16x16xbf16>, vector<16x64xbf16>, vector<16x64xf32> -> vector<16x64xf32>
    %116 = tpu.concatenate %92, %115 in 1 : vector<16x64xf32>, vector<16x64xf32> -> vector<16x128xf32>
    %117 = vector.extract_strided_slice %4 {offsets = [1, 0], sizes = [1, 16], strides = [1, 1]} : vector<2x16xf32> to vector<1x16xf32>
    %118 = vector.extract_strided_slice %66 {offsets = [16, 0], sizes = [16, 64], strides = [1, 1]} : vector<32x128xf32> to vector<16x64xf32>
    %119 = arith.truncf %118 : vector<16x64xf32> to vector<16x64xbf16>
    %120 = vector.extract_strided_slice %67 {offsets = [16, 0], sizes = [16, 64], strides = [1, 1]} : vector<32x128xf32> to vector<16x64xf32>
    %121 = arith.truncf %120 : vector<16x64xf32> to vector<16x64xbf16>
    %122 = vector.extract_strided_slice %68 {offsets = [16, 0], sizes = [16, 64], strides = [1, 1]} : vector<32x128xf32> to vector<16x64xf32>
    %123 = arith.truncf %122 : vector<16x64xf32> to vector<16x64xbf16>
    %cst_49 = arith.constant dense<0.000000e+00> : vector<16x16xf32>
    %124 = tpu.matmul %119, %121, %cst_49 {dimension_numbers = #tpu.dot_dimension_numbers<[1], [1], [0], [0], [0, 0, 1, 0], [], []>} : vector<16x64xbf16>, vector<16x64xbf16>, vector<16x16xf32> -> vector<16x16xf32>
    %cst_50 = arith.constant 1.250000e-01 : f32
    %125 = vector.broadcast %cst_50 : f32 to vector<16x16xf32>
    %126 = arith.mulf %124, %125 : vector<16x16xf32>
    %127 = vector.broadcast %117 : vector<1x16xf32> to vector<16x16xf32>
    %128 = arith.addf %126, %127 : vector<16x16xf32>
    %cst_51 = arith.constant dense<0xFF800000> : vector<16xf32>
    %129 = vector.multi_reduction <maximumf>, %128, %cst_51 [1] : vector<16x16xf32> to vector<16xf32>
    %130 = vector.shape_cast %129 : vector<16xf32> to vector<16x1xf32>
    %131 = vector.broadcast %130 : vector<16x1xf32> to vector<16x16xf32>
    %132 = arith.subf %128, %131 : vector<16x16xf32>
    %133 = math.exp %132 : vector<16x16xf32>
    %cst_52 = arith.constant dense<0.000000e+00> : vector<16xf32>
    %134 = vector.multi_reduction <add>, %133, %cst_52 [1] : vector<16x16xf32> to vector<16xf32>
    %135 = vector.shape_cast %134 : vector<16xf32> to vector<16x1xf32>
    %136 = tpu.reciprocal %135 {approx = true} : vector<16x1xf32> -> vector<16x1xf32>
    %137 = vector.broadcast %136 : vector<16x1xf32> to vector<16x16xf32>
    %138 = arith.mulf %133, %137 : vector<16x16xf32>
    %139 = arith.truncf %138 : vector<16x16xf32> to vector<16x16xbf16>
    %cst_53 = arith.constant dense<0.000000e+00> : vector<16x64xf32>
    %140 = tpu.matmul %139, %123, %cst_53 {dimension_numbers = #tpu.dot_dimension_numbers<[1], [0], [0], [1], [0, 0, 1, 1], [], []>} : vector<16x16xbf16>, vector<16x64xbf16>, vector<16x64xf32> -> vector<16x64xf32>
    %141 = vector.extract_strided_slice %66 {offsets = [16, 64], sizes = [16, 64], strides = [1, 1]} : vector<32x128xf32> to vector<16x64xf32>
    %142 = arith.truncf %141 : vector<16x64xf32> to vector<16x64xbf16>
    %143 = vector.extract_strided_slice %67 {offsets = [16, 64], sizes = [16, 64], strides = [1, 1]} : vector<32x128xf32> to vector<16x64xf32>
    %144 = arith.truncf %143 : vector<16x64xf32> to vector<16x64xbf16>
    %145 = vector.extract_strided_slice %68 {offsets = [16, 64], sizes = [16, 64], strides = [1, 1]} : vector<32x128xf32> to vector<16x64xf32>
    %146 = arith.truncf %145 : vector<16x64xf32> to vector<16x64xbf16>
    %cst_54 = arith.constant dense<0.000000e+00> : vector<16x16xf32>
    %147 = tpu.matmul %142, %144, %cst_54 {dimension_numbers = #tpu.dot_dimension_numbers<[1], [1], [0], [0], [0, 0, 1, 0], [], []>} : vector<16x64xbf16>, vector<16x64xbf16>, vector<16x16xf32> -> vector<16x16xf32>
    %cst_55 = arith.constant 1.250000e-01 : f32
    %148 = vector.broadcast %cst_55 : f32 to vector<16x16xf32>
    %149 = arith.mulf %147, %148 : vector<16x16xf32>
    %150 = vector.broadcast %117 : vector<1x16xf32> to vector<16x16xf32>
    %151 = arith.addf %149, %150 : vector<16x16xf32>
    %cst_56 = arith.constant dense<0xFF800000> : vector<16xf32>
    %152 = vector.multi_reduction <maximumf>, %151, %cst_56 [1] : vector<16x16xf32> to vector<16xf32>
    %153 = vector.shape_cast %152 : vector<16xf32> to vector<16x1xf32>
    %154 = vector.broadcast %153 : vector<16x1xf32> to vector<16x16xf32>
    %155 = arith.subf %151, %154 : vector<16x16xf32>
    %156 = math.exp %155 : vector<16x16xf32>
    %cst_57 = arith.constant dense<0.000000e+00> : vector<16xf32>
    %157 = vector.multi_reduction <add>, %156, %cst_57 [1] : vector<16x16xf32> to vector<16xf32>
    %158 = vector.shape_cast %157 : vector<16xf32> to vector<16x1xf32>
    %159 = tpu.reciprocal %158 {approx = true} : vector<16x1xf32> -> vector<16x1xf32>
    %160 = vector.broadcast %159 : vector<16x1xf32> to vector<16x16xf32>
    %161 = arith.mulf %156, %160 : vector<16x16xf32>
    %162 = arith.truncf %161 : vector<16x16xf32> to vector<16x16xbf16>
    %cst_58 = arith.constant dense<0.000000e+00> : vector<16x64xf32>
    %163 = tpu.matmul %162, %146, %cst_58 {dimension_numbers = #tpu.dot_dimension_numbers<[1], [0], [0], [1], [0, 0, 1, 1], [], []>} : vector<16x16xbf16>, vector<16x64xbf16>, vector<16x64xf32> -> vector<16x64xf32>
    %164 = tpu.concatenate %140, %163 in 1 : vector<16x64xf32>, vector<16x64xf32> -> vector<16x128xf32>
    %165 = tpu.concatenate %116, %164 in 0 : vector<16x128xf32>, vector<16x128xf32> -> vector<32x128xf32>
    %166 = arith.truncf %165 : vector<32x128xf32> to vector<32x128xbf16>
    %cst_59 = arith.constant dense<0.000000e+00> : vector<32x128xf32>
    %167 = tpu.matmul %166, %57, %cst_59 {dimension_numbers = #tpu.dot_dimension_numbers<[1], [0], [0], [1], [0, 0, 1, 1], [], []>} : vector<32x128xbf16>, vector<128x128xbf16>, vector<32x128xf32> -> vector<32x128xf32>
    %168 = vector.extract_strided_slice %59 {offsets = [0, 0], sizes = [1, 128], strides = [1, 1]} : vector<8x128xf32> to vector<1x128xf32>
    %169 = vector.broadcast %168 : vector<1x128xf32> to vector<32x128xf32>
    %170 = arith.addf %167, %169 : vector<32x128xf32>
    %171 = arith.addf %170, %50 : vector<32x128xf32>
    %172 = vector.extract_strided_slice %59 {offsets = [1, 0], sizes = [1, 128], strides = [1, 1]} : vector<8x128xf32> to vector<1x128xf32>
    %173 = vector.extract_strided_slice %59 {offsets = [2, 0], sizes = [1, 128], strides = [1, 1]} : vector<8x128xf32> to vector<1x128xf32>
    %cst_60 = arith.constant dense<0.000000e+00> : vector<32xf32>
    %174 = vector.multi_reduction <add>, %171, %cst_60 [1] : vector<32x128xf32> to vector<32xf32>
    %175 = vector.shape_cast %174 : vector<32xf32> to vector<32x1xf32>
    %cst_61 = arith.constant 1.280000e+02 : f32
    %176 = vector.broadcast %cst_61 : f32 to vector<32x1xf32>
    %177 = arith.divf %175, %176 : vector<32x1xf32>
    %178 = vector.broadcast %177 : vector<32x1xf32> to vector<32x128xf32>
    %179 = arith.subf %171, %178 : vector<32x128xf32>
    %180 = arith.mulf %179, %179 : vector<32x128xf32>
    %cst_62 = arith.constant dense<0.000000e+00> : vector<32xf32>
    %181 = vector.multi_reduction <add>, %180, %cst_62 [1] : vector<32x128xf32> to vector<32xf32>
    %182 = vector.shape_cast %181 : vector<32xf32> to vector<32x1xf32>
    %cst_63 = arith.constant 1.280000e+02 : f32
    %183 = vector.broadcast %cst_63 : f32 to vector<32x1xf32>
    %184 = arith.divf %182, %183 : vector<32x1xf32>
    %185 = vector.broadcast %177 : vector<32x1xf32> to vector<32x128xf32>
    %186 = arith.subf %171, %185 : vector<32x128xf32>
    %cst_64 = arith.constant 9.99999996E-13 : f32
    %187 = vector.broadcast %cst_64 : f32 to vector<32x1xf32>
    %188 = arith.addf %184, %187 : vector<32x1xf32>
    %189 = math.rsqrt %188 : vector<32x1xf32>
    %190 = vector.broadcast %189 : vector<32x1xf32> to vector<32x128xf32>
    %191 = arith.mulf %186, %190 : vector<32x128xf32>
    %192 = vector.broadcast %172 : vector<1x128xf32> to vector<32x128xf32>
    %193 = arith.mulf %191, %192 : vector<32x128xf32>
    %194 = vector.broadcast %173 : vector<1x128xf32> to vector<32x128xf32>
    %195 = arith.addf %193, %194 : vector<32x128xf32>
    %196 = arith.truncf %195 : vector<32x128xf32> to vector<32x128xbf16>
    %c0_65 = arith.constant 0 : index
    %c0_66 = arith.constant 0 : index
    %c0_67 = arith.constant 0 : index
    %197 = vector.load %arg10[%c0_65, %c0_66, %c0_67] : memref<2x128x256xbf16, #tpu.memory_space<vmem>>, vector<1x128x256xbf16>
    %198 = vector.shape_cast %197 : vector<1x128x256xbf16> to vector<128x256xbf16>
    %cst_68 = arith.constant dense<0.000000e+00> : vector<32x256xf32>
    %199 = tpu.matmul %196, %198, %cst_68 {dimension_numbers = #tpu.dot_dimension_numbers<[1], [0], [0], [1], [0, 0, 1, 1], [], []>} : vector<32x128xbf16>, vector<128x256xbf16>, vector<32x256xf32> -> vector<32x256xf32>
    %c0_69 = arith.constant 0 : index
    %c0_70 = arith.constant 0 : index
    %c0_71 = arith.constant 0 : index
    %200 = vector.load %arg11[%c0_69, %c0_70, %c0_71] : memref<2x1x256xf32, #tpu.memory_space<vmem>>, vector<1x1x256xf32>
    %201 = vector.shape_cast %200 : vector<1x1x256xf32> to vector<1x256xf32>
    %202 = vector.broadcast %201 : vector<1x256xf32> to vector<32x256xf32>
    %203 = arith.addf %199, %202 : vector<32x256xf32>
    %cst_72 = arith.constant 5.000000e-01 : f32
    %204 = vector.broadcast %cst_72 : f32 to vector<32x256xf32>
    %205 = arith.mulf %204, %203 : vector<32x256xf32>
    %cst_73 = arith.constant 0.707106769 : f32
    %206 = vector.broadcast %cst_73 : f32 to vector<32x256xf32>
    %207 = arith.mulf %203, %206 : vector<32x256xf32>
    %208 = math.erf %207 : vector<32x256xf32>
    %cst_74 = arith.constant 1.000000e+00 : f32
    %209 = vector.broadcast %cst_74 : f32 to vector<32x256xf32>
    %210 = arith.addf %209, %208 : vector<32x256xf32>
    %211 = arith.mulf %205, %210 : vector<32x256xf32>
    %212 = arith.truncf %211 : vector<32x256xf32> to vector<32x256xbf16>
    %c0_75 = arith.constant 0 : index
    %c0_76 = arith.constant 0 : index
    %c0_77 = arith.constant 0 : index
    %213 = vector.load %arg12[%c0_75, %c0_76, %c0_77] : memref<2x256x128xbf16, #tpu.memory_space<vmem>>, vector<1x256x128xbf16>
    %214 = vector.shape_cast %213 : vector<1x256x128xbf16> to vector<256x128xbf16>
    %cst_78 = arith.constant dense<0.000000e+00> : vector<32x128xf32>
    %215 = tpu.matmul %212, %214, %cst_78 {dimension_numbers = #tpu.dot_dimension_numbers<[1], [0], [0], [1], [0, 0, 1, 1], [], []>} : vector<32x256xbf16>, vector<256x128xbf16>, vector<32x128xf32> -> vector<32x128xf32>
    %216 = vector.extract_strided_slice %59 {offsets = [3, 0], sizes = [1, 128], strides = [1, 1]} : vector<8x128xf32> to vector<1x128xf32>
    %217 = vector.broadcast %216 : vector<1x128xf32> to vector<32x128xf32>
    %218 = arith.addf %215, %217 : vector<32x128xf32>
    %219 = arith.addf %218, %195 : vector<32x128xf32>
    %220 = vector.extract_strided_slice %59 {offsets = [4, 0], sizes = [1, 128], strides = [1, 1]} : vector<8x128xf32> to vector<1x128xf32>
    %221 = vector.extract_strided_slice %59 {offsets = [5, 0], sizes = [1, 128], strides = [1, 1]} : vector<8x128xf32> to vector<1x128xf32>
    %cst_79 = arith.constant dense<0.000000e+00> : vector<32xf32>
    %222 = vector.multi_reduction <add>, %219, %cst_79 [1] : vector<32x128xf32> to vector<32xf32>
    %223 = vector.shape_cast %222 : vector<32xf32> to vector<32x1xf32>
    %cst_80 = arith.constant 1.280000e+02 : f32
    %224 = vector.broadcast %cst_80 : f32 to vector<32x1xf32>
    %225 = arith.divf %223, %224 : vector<32x1xf32>
    %226 = vector.broadcast %225 : vector<32x1xf32> to vector<32x128xf32>
    %227 = arith.subf %219, %226 : vector<32x128xf32>
    %228 = arith.mulf %227, %227 : vector<32x128xf32>
    %cst_81 = arith.constant dense<0.000000e+00> : vector<32xf32>
    %229 = vector.multi_reduction <add>, %228, %cst_81 [1] : vector<32x128xf32> to vector<32xf32>
    %230 = vector.shape_cast %229 : vector<32xf32> to vector<32x1xf32>
    %cst_82 = arith.constant 1.280000e+02 : f32
    %231 = vector.broadcast %cst_82 : f32 to vector<32x1xf32>
    %232 = arith.divf %230, %231 : vector<32x1xf32>
    %233 = vector.broadcast %225 : vector<32x1xf32> to vector<32x128xf32>
    %234 = arith.subf %219, %233 : vector<32x128xf32>
    %cst_83 = arith.constant 9.99999996E-13 : f32
    %235 = vector.broadcast %cst_83 : f32 to vector<32x1xf32>
    %236 = arith.addf %232, %235 : vector<32x1xf32>
    %237 = math.rsqrt %236 : vector<32x1xf32>
    %238 = vector.broadcast %237 : vector<32x1xf32> to vector<32x128xf32>
    %239 = arith.mulf %234, %238 : vector<32x128xf32>
    %240 = vector.broadcast %220 : vector<1x128xf32> to vector<32x128xf32>
    %241 = arith.mulf %239, %240 : vector<32x128xf32>
    %242 = vector.broadcast %221 : vector<1x128xf32> to vector<32x128xf32>
    %243 = arith.addf %241, %242 : vector<32x128xf32>
    %c1_84 = arith.constant 1 : index
    %c0_85 = arith.constant 0 : index
    %c0_86 = arith.constant 0 : index
    %244 = vector.load %arg16[%c1_84, %c0_85, %c0_86] : memref<3x32x128xf32, #tpu.memory_space<vmem>>, vector<1x32x128xf32>
    %245 = vector.shape_cast %244 : vector<1x32x128xf32> to vector<32x128xf32>
    %246 = vector.shape_cast %243 : vector<32x128xf32> to vector<1x32x128xf32>
    tpu.vector_store %arg16[%c1_84, %c0_85, %c0_86], %246 {strides = array<i32>} : memref<3x32x128xf32, #tpu.memory_space<vmem>>, vector<1x32x128xf32>,
    %c1_87 = arith.constant 1 : index
    %c0_88 = arith.constant 0 : index
    %c0_89 = arith.constant 0 : index
    %247 = vector.load %arg7[%c1_87, %c0_88, %c0_89] : memref<2x128x384xbf16, #tpu.memory_space<vmem>>, vector<1x128x384xbf16>
    %248 = vector.shape_cast %247 : vector<1x128x384xbf16> to vector<128x384xbf16>
    %c1_90 = arith.constant 1 : index
    %c0_91 = arith.constant 0 : index
    %c0_92 = arith.constant 0 : index
    %249 = vector.load %arg9[%c1_90, %c0_91, %c0_92] : memref<2x128x128xbf16, #tpu.memory_space<vmem>>, vector<1x128x128xbf16>
    %250 = vector.shape_cast %249 : vector<1x128x128xbf16> to vector<128x128xbf16>
    %c1_93 = arith.constant 1 : index
    %c0_94 = arith.constant 0 : index
    %c0_95 = arith.constant 0 : index
    %251 = vector.load %arg13[%c1_93, %c0_94, %c0_95] : memref<2x8x128xf32, #tpu.memory_space<vmem>>, vector<1x8x128xf32>
    %252 = vector.shape_cast %251 : vector<1x8x128xf32> to vector<8x128xf32>
    %253 = arith.truncf %243 : vector<32x128xf32> to vector<32x128xbf16>
    %cst_96 = arith.constant dense<0.000000e+00> : vector<32x384xf32>
    %254 = tpu.matmul %253, %248, %cst_96 {dimension_numbers = #tpu.dot_dimension_numbers<[1], [0], [0], [1], [0, 0, 1, 1], [], []>} : vector<32x128xbf16>, vector<128x384xbf16>, vector<32x384xf32> -> vector<32x384xf32>
    %c1_97 = arith.constant 1 : index
    %c0_98 = arith.constant 0 : index
    %c0_99 = arith.constant 0 : index
    %255 = vector.load %arg8[%c1_97, %c0_98, %c0_99] : memref<2x1x384xf32, #tpu.memory_space<vmem>>, vector<1x1x384xf32>
    %256 = vector.shape_cast %255 : vector<1x1x384xf32> to vector<1x384xf32>
    %257 = vector.broadcast %256 : vector<1x384xf32> to vector<32x384xf32>
    %258 = arith.addf %254, %257 : vector<32x384xf32>
    %259 = vector.extract_strided_slice %258 {offsets = [0, 0], sizes = [32, 128], strides = [1, 1]} : vector<32x384xf32> to vector<32x128xf32>
    %260 = vector.extract_strided_slice %258 {offsets = [0, 128], sizes = [32, 128], strides = [1, 1]} : vector<32x384xf32> to vector<32x128xf32>
    %261 = vector.extract_strided_slice %258 {offsets = [0, 256], sizes = [32, 128], strides = [1, 1]} : vector<32x384xf32> to vector<32x128xf32>
    %262 = vector.extract_strided_slice %4 {offsets = [0, 0], sizes = [1, 16], strides = [1, 1]} : vector<2x16xf32> to vector<1x16xf32>
    %263 = vector.extract_strided_slice %259 {offsets = [0, 0], sizes = [16, 64], strides = [1, 1]} : vector<32x128xf32> to vector<16x64xf32>
    %264 = arith.truncf %263 : vector<16x64xf32> to vector<16x64xbf16>
    %265 = vector.extract_strided_slice %260 {offsets = [0, 0], sizes = [16, 64], strides = [1, 1]} : vector<32x128xf32> to vector<16x64xf32>
    %266 = arith.truncf %265 : vector<16x64xf32> to vector<16x64xbf16>
    %267 = vector.extract_strided_slice %261 {offsets = [0, 0], sizes = [16, 64], strides = [1, 1]} : vector<32x128xf32> to vector<16x64xf32>
    %268 = arith.truncf %267 : vector<16x64xf32> to vector<16x64xbf16>
    %cst_100 = arith.constant dense<0.000000e+00> : vector<16x16xf32>
    %269 = tpu.matmul %264, %266, %cst_100 {dimension_numbers = #tpu.dot_dimension_numbers<[1], [1], [0], [0], [0, 0, 1, 0], [], []>} : vector<16x64xbf16>, vector<16x64xbf16>, vector<16x16xf32> -> vector<16x16xf32>
    %cst_101 = arith.constant 1.250000e-01 : f32
    %270 = vector.broadcast %cst_101 : f32 to vector<16x16xf32>
    %271 = arith.mulf %269, %270 : vector<16x16xf32>
    %272 = vector.broadcast %262 : vector<1x16xf32> to vector<16x16xf32>
    %273 = arith.addf %271, %272 : vector<16x16xf32>
    %cst_102 = arith.constant dense<0xFF800000> : vector<16xf32>
    %274 = vector.multi_reduction <maximumf>, %273, %cst_102 [1] : vector<16x16xf32> to vector<16xf32>
    %275 = vector.shape_cast %274 : vector<16xf32> to vector<16x1xf32>
    %276 = vector.broadcast %275 : vector<16x1xf32> to vector<16x16xf32>
    %277 = arith.subf %273, %276 : vector<16x16xf32>
    %278 = math.exp %277 : vector<16x16xf32>
    %cst_103 = arith.constant dense<0.000000e+00> : vector<16xf32>
    %279 = vector.multi_reduction <add>, %278, %cst_103 [1] : vector<16x16xf32> to vector<16xf32>
    %280 = vector.shape_cast %279 : vector<16xf32> to vector<16x1xf32>
    %281 = tpu.reciprocal %280 {approx = true} : vector<16x1xf32> -> vector<16x1xf32>
    %282 = vector.broadcast %281 : vector<16x1xf32> to vector<16x16xf32>
    %283 = arith.mulf %278, %282 : vector<16x16xf32>
    %284 = arith.truncf %283 : vector<16x16xf32> to vector<16x16xbf16>
    %cst_104 = arith.constant dense<0.000000e+00> : vector<16x64xf32>
    %285 = tpu.matmul %284, %268, %cst_104 {dimension_numbers = #tpu.dot_dimension_numbers<[1], [0], [0], [1], [0, 0, 1, 1], [], []>} : vector<16x16xbf16>, vector<16x64xbf16>, vector<16x64xf32> -> vector<16x64xf32>
    %286 = vector.extract_strided_slice %259 {offsets = [0, 64], sizes = [16, 64], strides = [1, 1]} : vector<32x128xf32> to vector<16x64xf32>
    %287 = arith.truncf %286 : vector<16x64xf32> to vector<16x64xbf16>
    %288 = vector.extract_strided_slice %260 {offsets = [0, 64], sizes = [16, 64], strides = [1, 1]} : vector<32x128xf32> to vector<16x64xf32>
    %289 = arith.truncf %288 : vector<16x64xf32> to vector<16x64xbf16>
    %290 = vector.extract_strided_slice %261 {offsets = [0, 64], sizes = [16, 64], strides = [1, 1]} : vector<32x128xf32> to vector<16x64xf32>
    %291 = arith.truncf %290 : vector<16x64xf32> to vector<16x64xbf16>
    %cst_105 = arith.constant dense<0.000000e+00> : vector<16x16xf32>
    %292 = tpu.matmul %287, %289, %cst_105 {dimension_numbers = #tpu.dot_dimension_numbers<[1], [1], [0], [0], [0, 0, 1, 0], [], []>} : vector<16x64xbf16>, vector<16x64xbf16>, vector<16x16xf32> -> vector<16x16xf32>
    %cst_106 = arith.constant 1.250000e-01 : f32
    %293 = vector.broadcast %cst_106 : f32 to vector<16x16xf32>
    %294 = arith.mulf %292, %293 : vector<16x16xf32>
    %295 = vector.broadcast %262 : vector<1x16xf32> to vector<16x16xf32>
    %296 = arith.addf %294, %295 : vector<16x16xf32>
    %cst_107 = arith.constant dense<0xFF800000> : vector<16xf32>
    %297 = vector.multi_reduction <maximumf>, %296, %cst_107 [1] : vector<16x16xf32> to vector<16xf32>
    %298 = vector.shape_cast %297 : vector<16xf32> to vector<16x1xf32>
    %299 = vector.broadcast %298 : vector<16x1xf32> to vector<16x16xf32>
    %300 = arith.subf %296, %299 : vector<16x16xf32>
    %301 = math.exp %300 : vector<16x16xf32>
    %cst_108 = arith.constant dense<0.000000e+00> : vector<16xf32>
    %302 = vector.multi_reduction <add>, %301, %cst_108 [1] : vector<16x16xf32> to vector<16xf32>
    %303 = vector.shape_cast %302 : vector<16xf32> to vector<16x1xf32>
    %304 = tpu.reciprocal %303 {approx = true} : vector<16x1xf32> -> vector<16x1xf32>
    %305 = vector.broadcast %304 : vector<16x1xf32> to vector<16x16xf32>
    %306 = arith.mulf %301, %305 : vector<16x16xf32>
    %307 = arith.truncf %306 : vector<16x16xf32> to vector<16x16xbf16>
    %cst_109 = arith.constant dense<0.000000e+00> : vector<16x64xf32>
    %308 = tpu.matmul %307, %291, %cst_109 {dimension_numbers = #tpu.dot_dimension_numbers<[1], [0], [0], [1], [0, 0, 1, 1], [], []>} : vector<16x16xbf16>, vector<16x64xbf16>, vector<16x64xf32> -> vector<16x64xf32>
    %309 = tpu.concatenate %285, %308 in 1 : vector<16x64xf32>, vector<16x64xf32> -> vector<16x128xf32>
    %310 = vector.extract_strided_slice %4 {offsets = [1, 0], sizes = [1, 16], strides = [1, 1]} : vector<2x16xf32> to vector<1x16xf32>
    %311 = vector.extract_strided_slice %259 {offsets = [16, 0], sizes = [16, 64], strides = [1, 1]} : vector<32x128xf32> to vector<16x64xf32>
    %312 = arith.truncf %311 : vector<16x64xf32> to vector<16x64xbf16>
    %313 = vector.extract_strided_slice %260 {offsets = [16, 0], sizes = [16, 64], strides = [1, 1]} : vector<32x128xf32> to vector<16x64xf32>
    %314 = arith.truncf %313 : vector<16x64xf32> to vector<16x64xbf16>
    %315 = vector.extract_strided_slice %261 {offsets = [16, 0], sizes = [16, 64], strides = [1, 1]} : vector<32x128xf32> to vector<16x64xf32>
    %316 = arith.truncf %315 : vector<16x64xf32> to vector<16x64xbf16>
    %cst_110 = arith.constant dense<0.000000e+00> : vector<16x16xf32>
    %317 = tpu.matmul %312, %314, %cst_110 {dimension_numbers = #tpu.dot_dimension_numbers<[1], [1], [0], [0], [0, 0, 1, 0], [], []>} : vector<16x64xbf16>, vector<16x64xbf16>, vector<16x16xf32> -> vector<16x16xf32>
    %cst_111 = arith.constant 1.250000e-01 : f32
    %318 = vector.broadcast %cst_111 : f32 to vector<16x16xf32>
    %319 = arith.mulf %317, %318 : vector<16x16xf32>
    %320 = vector.broadcast %310 : vector<1x16xf32> to vector<16x16xf32>
    %321 = arith.addf %319, %320 : vector<16x16xf32>
    %cst_112 = arith.constant dense<0xFF800000> : vector<16xf32>
    %322 = vector.multi_reduction <maximumf>, %321, %cst_112 [1] : vector<16x16xf32> to vector<16xf32>
    %323 = vector.shape_cast %322 : vector<16xf32> to vector<16x1xf32>
    %324 = vector.broadcast %323 : vector<16x1xf32> to vector<16x16xf32>
    %325 = arith.subf %321, %324 : vector<16x16xf32>
    %326 = math.exp %325 : vector<16x16xf32>
    %cst_113 = arith.constant dense<0.000000e+00> : vector<16xf32>
    %327 = vector.multi_reduction <add>, %326, %cst_113 [1] : vector<16x16xf32> to vector<16xf32>
    %328 = vector.shape_cast %327 : vector<16xf32> to vector<16x1xf32>
    %329 = tpu.reciprocal %328 {approx = true} : vector<16x1xf32> -> vector<16x1xf32>
    %330 = vector.broadcast %329 : vector<16x1xf32> to vector<16x16xf32>
    %331 = arith.mulf %326, %330 : vector<16x16xf32>
    %332 = arith.truncf %331 : vector<16x16xf32> to vector<16x16xbf16>
    %cst_114 = arith.constant dense<0.000000e+00> : vector<16x64xf32>
    %333 = tpu.matmul %332, %316, %cst_114 {dimension_numbers = #tpu.dot_dimension_numbers<[1], [0], [0], [1], [0, 0, 1, 1], [], []>} : vector<16x16xbf16>, vector<16x64xbf16>, vector<16x64xf32> -> vector<16x64xf32>
    %334 = vector.extract_strided_slice %259 {offsets = [16, 64], sizes = [16, 64], strides = [1, 1]} : vector<32x128xf32> to vector<16x64xf32>
    %335 = arith.truncf %334 : vector<16x64xf32> to vector<16x64xbf16>
    %336 = vector.extract_strided_slice %260 {offsets = [16, 64], sizes = [16, 64], strides = [1, 1]} : vector<32x128xf32> to vector<16x64xf32>
    %337 = arith.truncf %336 : vector<16x64xf32> to vector<16x64xbf16>
    %338 = vector.extract_strided_slice %261 {offsets = [16, 64], sizes = [16, 64], strides = [1, 1]} : vector<32x128xf32> to vector<16x64xf32>
    %339 = arith.truncf %338 : vector<16x64xf32> to vector<16x64xbf16>
    %cst_115 = arith.constant dense<0.000000e+00> : vector<16x16xf32>
    %340 = tpu.matmul %335, %337, %cst_115 {dimension_numbers = #tpu.dot_dimension_numbers<[1], [1], [0], [0], [0, 0, 1, 0], [], []>} : vector<16x64xbf16>, vector<16x64xbf16>, vector<16x16xf32> -> vector<16x16xf32>
    %cst_116 = arith.constant 1.250000e-01 : f32
    %341 = vector.broadcast %cst_116 : f32 to vector<16x16xf32>
    %342 = arith.mulf %340, %341 : vector<16x16xf32>
    %343 = vector.broadcast %310 : vector<1x16xf32> to vector<16x16xf32>
    %344 = arith.addf %342, %343 : vector<16x16xf32>
    %cst_117 = arith.constant dense<0xFF800000> : vector<16xf32>
    %345 = vector.multi_reduction <maximumf>, %344, %cst_117 [1] : vector<16x16xf32> to vector<16xf32>
    %346 = vector.shape_cast %345 : vector<16xf32> to vector<16x1xf32>
    %347 = vector.broadcast %346 : vector<16x1xf32> to vector<16x16xf32>
    %348 = arith.subf %344, %347 : vector<16x16xf32>
    %349 = math.exp %348 : vector<16x16xf32>
    %cst_118 = arith.constant dense<0.000000e+00> : vector<16xf32>
    %350 = vector.multi_reduction <add>, %349, %cst_118 [1] : vector<16x16xf32> to vector<16xf32>
    %351 = vector.shape_cast %350 : vector<16xf32> to vector<16x1xf32>
    %352 = tpu.reciprocal %351 {approx = true} : vector<16x1xf32> -> vector<16x1xf32>
    %353 = vector.broadcast %352 : vector<16x1xf32> to vector<16x16xf32>
    %354 = arith.mulf %349, %353 : vector<16x16xf32>
    %355 = arith.truncf %354 : vector<16x16xf32> to vector<16x16xbf16>
    %cst_119 = arith.constant dense<0.000000e+00> : vector<16x64xf32>
    %356 = tpu.matmul %355, %339, %cst_119 {dimension_numbers = #tpu.dot_dimension_numbers<[1], [0], [0], [1], [0, 0, 1, 1], [], []>} : vector<16x16xbf16>, vector<16x64xbf16>, vector<16x64xf32> -> vector<16x64xf32>
    %357 = tpu.concatenate %333, %356 in 1 : vector<16x64xf32>, vector<16x64xf32> -> vector<16x128xf32>
    %358 = tpu.concatenate %309, %357 in 0 : vector<16x128xf32>, vector<16x128xf32> -> vector<32x128xf32>
    %359 = arith.truncf %358 : vector<32x128xf32> to vector<32x128xbf16>
    %cst_120 = arith.constant dense<0.000000e+00> : vector<32x128xf32>
    %360 = tpu.matmul %359, %250, %cst_120 {dimension_numbers = #tpu.dot_dimension_numbers<[1], [0], [0], [1], [0, 0, 1, 1], [], []>} : vector<32x128xbf16>, vector<128x128xbf16>, vector<32x128xf32> -> vector<32x128xf32>
    %361 = vector.extract_strided_slice %252 {offsets = [0, 0], sizes = [1, 128], strides = [1, 1]} : vector<8x128xf32> to vector<1x128xf32>
    %362 = vector.broadcast %361 : vector<1x128xf32> to vector<32x128xf32>
    %363 = arith.addf %360, %362 : vector<32x128xf32>
    %364 = arith.addf %363, %243 : vector<32x128xf32>
    %365 = vector.extract_strided_slice %252 {offsets = [1, 0], sizes = [1, 128], strides = [1, 1]} : vector<8x128xf32> to vector<1x128xf32>
    %366 = vector.extract_strided_slice %252 {offsets = [2, 0], sizes = [1, 128], strides = [1, 1]} : vector<8x128xf32> to vector<1x128xf32>
    %cst_121 = arith.constant dense<0.000000e+00> : vector<32xf32>
    %367 = vector.multi_reduction <add>, %364, %cst_121 [1] : vector<32x128xf32> to vector<32xf32>
    %368 = vector.shape_cast %367 : vector<32xf32> to vector<32x1xf32>
    %cst_122 = arith.constant 1.280000e+02 : f32
    %369 = vector.broadcast %cst_122 : f32 to vector<32x1xf32>
    %370 = arith.divf %368, %369 : vector<32x1xf32>
    %371 = vector.broadcast %370 : vector<32x1xf32> to vector<32x128xf32>
    %372 = arith.subf %364, %371 : vector<32x128xf32>
    %373 = arith.mulf %372, %372 : vector<32x128xf32>
    %cst_123 = arith.constant dense<0.000000e+00> : vector<32xf32>
    %374 = vector.multi_reduction <add>, %373, %cst_123 [1] : vector<32x128xf32> to vector<32xf32>
    %375 = vector.shape_cast %374 : vector<32xf32> to vector<32x1xf32>
    %cst_124 = arith.constant 1.280000e+02 : f32
    %376 = vector.broadcast %cst_124 : f32 to vector<32x1xf32>
    %377 = arith.divf %375, %376 : vector<32x1xf32>
    %378 = vector.broadcast %370 : vector<32x1xf32> to vector<32x128xf32>
    %379 = arith.subf %364, %378 : vector<32x128xf32>
    %cst_125 = arith.constant 9.99999996E-13 : f32
    %380 = vector.broadcast %cst_125 : f32 to vector<32x1xf32>
    %381 = arith.addf %377, %380 : vector<32x1xf32>
    %382 = math.rsqrt %381 : vector<32x1xf32>
    %383 = vector.broadcast %382 : vector<32x1xf32> to vector<32x128xf32>
    %384 = arith.mulf %379, %383 : vector<32x128xf32>
    %385 = vector.broadcast %365 : vector<1x128xf32> to vector<32x128xf32>
    %386 = arith.mulf %384, %385 : vector<32x128xf32>
    %387 = vector.broadcast %366 : vector<1x128xf32> to vector<32x128xf32>
    %388 = arith.addf %386, %387 : vector<32x128xf32>
    %389 = arith.truncf %388 : vector<32x128xf32> to vector<32x128xbf16>
    %c1_126 = arith.constant 1 : index
    %c0_127 = arith.constant 0 : index
    %c0_128 = arith.constant 0 : index
    %390 = vector.load %arg10[%c1_126, %c0_127, %c0_128] : memref<2x128x256xbf16, #tpu.memory_space<vmem>>, vector<1x128x256xbf16>
    %391 = vector.shape_cast %390 : vector<1x128x256xbf16> to vector<128x256xbf16>
    %cst_129 = arith.constant dense<0.000000e+00> : vector<32x256xf32>
    %392 = tpu.matmul %389, %391, %cst_129 {dimension_numbers = #tpu.dot_dimension_numbers<[1], [0], [0], [1], [0, 0, 1, 1], [], []>} : vector<32x128xbf16>, vector<128x256xbf16>, vector<32x256xf32> -> vector<32x256xf32>
    %c1_130 = arith.constant 1 : index
    %c0_131 = arith.constant 0 : index
    %c0_132 = arith.constant 0 : index
    %393 = vector.load %arg11[%c1_130, %c0_131, %c0_132] : memref<2x1x256xf32, #tpu.memory_space<vmem>>, vector<1x1x256xf32>
    %394 = vector.shape_cast %393 : vector<1x1x256xf32> to vector<1x256xf32>
    %395 = vector.broadcast %394 : vector<1x256xf32> to vector<32x256xf32>
    %396 = arith.addf %392, %395 : vector<32x256xf32>
    %cst_133 = arith.constant 5.000000e-01 : f32
    %397 = vector.broadcast %cst_133 : f32 to vector<32x256xf32>
    %398 = arith.mulf %397, %396 : vector<32x256xf32>
    %cst_134 = arith.constant 0.707106769 : f32
    %399 = vector.broadcast %cst_134 : f32 to vector<32x256xf32>
    %400 = arith.mulf %396, %399 : vector<32x256xf32>
    %401 = math.erf %400 : vector<32x256xf32>
    %cst_135 = arith.constant 1.000000e+00 : f32
    %402 = vector.broadcast %cst_135 : f32 to vector<32x256xf32>
    %403 = arith.addf %402, %401 : vector<32x256xf32>
    %404 = arith.mulf %398, %403 : vector<32x256xf32>
    %405 = arith.truncf %404 : vector<32x256xf32> to vector<32x256xbf16>
    %c1_136 = arith.constant 1 : index
    %c0_137 = arith.constant 0 : index
    %c0_138 = arith.constant 0 : index
    %406 = vector.load %arg12[%c1_136, %c0_137, %c0_138] : memref<2x256x128xbf16, #tpu.memory_space<vmem>>, vector<1x256x128xbf16>
    %407 = vector.shape_cast %406 : vector<1x256x128xbf16> to vector<256x128xbf16>
    %cst_139 = arith.constant dense<0.000000e+00> : vector<32x128xf32>
    %408 = tpu.matmul %405, %407, %cst_139 {dimension_numbers = #tpu.dot_dimension_numbers<[1], [0], [0], [1], [0, 0, 1, 1], [], []>} : vector<32x256xbf16>, vector<256x128xbf16>, vector<32x128xf32> -> vector<32x128xf32>
    %409 = vector.extract_strided_slice %252 {offsets = [3, 0], sizes = [1, 128], strides = [1, 1]} : vector<8x128xf32> to vector<1x128xf32>
    %410 = vector.broadcast %409 : vector<1x128xf32> to vector<32x128xf32>
    %411 = arith.addf %408, %410 : vector<32x128xf32>
    %412 = arith.addf %411, %388 : vector<32x128xf32>
    %413 = vector.extract_strided_slice %252 {offsets = [4, 0], sizes = [1, 128], strides = [1, 1]} : vector<8x128xf32> to vector<1x128xf32>
    %414 = vector.extract_strided_slice %252 {offsets = [5, 0], sizes = [1, 128], strides = [1, 1]} : vector<8x128xf32> to vector<1x128xf32>
    %cst_140 = arith.constant dense<0.000000e+00> : vector<32xf32>
    %415 = vector.multi_reduction <add>, %412, %cst_140 [1] : vector<32x128xf32> to vector<32xf32>
    %416 = vector.shape_cast %415 : vector<32xf32> to vector<32x1xf32>
    %cst_141 = arith.constant 1.280000e+02 : f32
    %417 = vector.broadcast %cst_141 : f32 to vector<32x1xf32>
    %418 = arith.divf %416, %417 : vector<32x1xf32>
    %419 = vector.broadcast %418 : vector<32x1xf32> to vector<32x128xf32>
    %420 = arith.subf %412, %419 : vector<32x128xf32>
    %421 = arith.mulf %420, %420 : vector<32x128xf32>
    %cst_142 = arith.constant dense<0.000000e+00> : vector<32xf32>
    %422 = vector.multi_reduction <add>, %421, %cst_142 [1] : vector<32x128xf32> to vector<32xf32>
    %423 = vector.shape_cast %422 : vector<32xf32> to vector<32x1xf32>
    %cst_143 = arith.constant 1.280000e+02 : f32
    %424 = vector.broadcast %cst_143 : f32 to vector<32x1xf32>
    %425 = arith.divf %423, %424 : vector<32x1xf32>
    %426 = vector.broadcast %418 : vector<32x1xf32> to vector<32x128xf32>
    %427 = arith.subf %412, %426 : vector<32x128xf32>
    %cst_144 = arith.constant 9.99999996E-13 : f32
    %428 = vector.broadcast %cst_144 : f32 to vector<32x1xf32>
    %429 = arith.addf %425, %428 : vector<32x1xf32>
    %430 = math.rsqrt %429 : vector<32x1xf32>
    %431 = vector.broadcast %430 : vector<32x1xf32> to vector<32x128xf32>
    %432 = arith.mulf %427, %431 : vector<32x128xf32>
    %433 = vector.broadcast %413 : vector<1x128xf32> to vector<32x128xf32>
    %434 = arith.mulf %432, %433 : vector<32x128xf32>
    %435 = vector.broadcast %414 : vector<1x128xf32> to vector<32x128xf32>
    %436 = arith.addf %434, %435 : vector<32x128xf32>
    %c2 = arith.constant 2 : index
    %c0_145 = arith.constant 0 : index
    %c0_146 = arith.constant 0 : index
    %437 = vector.load %arg16[%c2, %c0_145, %c0_146] : memref<3x32x128xf32, #tpu.memory_space<vmem>>, vector<1x32x128xf32>
    %438 = vector.shape_cast %437 : vector<1x32x128xf32> to vector<32x128xf32>
    %439 = vector.shape_cast %436 : vector<32x128xf32> to vector<1x32x128xf32>
    tpu.vector_store %arg16[%c2, %c0_145, %c0_146], %439 {strides = array<i32>} : memref<3x32x128xf32, #tpu.memory_space<vmem>>, vector<1x32x128xf32>,
    %440 = vector.extract_strided_slice %436 {offsets = [0, 0], sizes = [1, 128], strides = [1, 1]} : vector<32x128xf32> to vector<1x128xf32>
    %441 = vector.extract_strided_slice %436 {offsets = [16, 0], sizes = [1, 128], strides = [1, 1]} : vector<32x128xf32> to vector<1x128xf32>
    %442 = tpu.concatenate %440, %441 in 0 : vector<1x128xf32>, vector<1x128xf32> -> vector<2x128xf32>
    %443 = arith.truncf %442 : vector<2x128xf32> to vector<2x128xbf16>
    %c0_147 = arith.constant 0 : index
    %c0_148 = arith.constant 0 : index
    %444 = vector.load %arg14[%c0_147, %c0_148] : memref<128x128xbf16, #tpu.memory_space<vmem>>, vector<128x128xbf16>
    %cst_149 = arith.constant dense<0.000000e+00> : vector<2x128xf32>
    %445 = tpu.matmul %443, %444, %cst_149 {dimension_numbers = #tpu.dot_dimension_numbers<[1], [0], [0], [1], [0, 0, 1, 1], [], []>} : vector<2x128xbf16>, vector<128x128xbf16>, vector<2x128xf32> -> vector<2x128xf32>
    %c0_150 = arith.constant 0 : index
    %c0_151 = arith.constant 0 : index
    %446 = vector.load %arg15[%c0_150, %c0_151] : memref<1x128xf32, #tpu.memory_space<vmem>>, vector<1x128xf32>
    %447 = vector.broadcast %446 : vector<1x128xf32> to vector<2x128xf32>
    %448 = arith.addf %445, %447 : vector<2x128xf32>
    %449 = math.tanh %448 : vector<2x128xf32>
    %c0_152 = arith.constant 0 : index
    %c0_153 = arith.constant 0 : index
    %450 = vector.load %arg17[%c0_152, %c0_153] : memref<2x128xf32, #tpu.memory_space<vmem>>, vector<2x128xf32>
    tpu.vector_store %arg17[%c0_152, %c0_153], %449 {strides = array<i32>} : memref<2x128xf32, #tpu.memory_space<vmem>>, vector<2x128xf32>,
    return
  }
}

</mosaic_0001>

<bundles_post_ra>
// kernel: tpu_custom_call.1
= control target key start
LH: loop header
LB: loop body
LE: loop exit
PB: predicated region body
PF: predicated region fallthrough
CT: control target
= control target key end

     0   :  { %s5411_s0 = inlined_call_operand.vmem [shape: s32[32,1], index: 0, kind: input, shape index: {}]   ;;  %s5412_s1 = inlined_call_operand.vmem [shape: s32[32,1], index: 1, kind: input, shape index: {}]   ;;  %s5413_s2 = inlined_call_operand.hbm [shape: f32[2,16], index: 2, kind: input, shape index: {}]   ;;  %s5414_s3 = inlined_call_operand.hbm [shape: f32[128,128], index: 3, kind: input, shape index: {}]   ;;  %s5415_s4 = inlined_call_operand.vmem [shape: f32[32,128], index: 4, kind: input, shape index: {}]   ;;  %s5416_s5 = inlined_call_operand.hbm [shape: f32[2,128], index: 5, kind: input, shape index: {}]   ;;  %s5417_s6 = inlined_call_operand.hbm [shape: f32[2,128], index: 6, kind: input, shape index: {}]   ;;  %s5418_s7 = inlined_call_operand.hbm [shape: bf16[2,128,384], index: 7, kind: input, shape index: {}]   ;;  %s5419_s8 = inlined_call_operand.vmem [shape: f32[2,1,384], index: 8, kind: input, shape index: {}]   ;;  %s5420_s9 = inlined_call_operand.hbm [shape: bf16[2,128,128], index: 9, kind: input, shape index: {}]   ;;  %s5421_s10 = inlined_call_operand.hbm [shape: bf16[2,128,256], index: 10, kind: input, shape index: {}]   ;;  %s5422_s11 = inlined_call_operand.hbm [shape: f32[2,1,256], index: 11, kind: input, shape index: {}]   ;;  %s5423_s12 = inlined_call_operand.hbm [shape: bf16[2,256,128], index: 12, kind: input, shape index: {}]   ;;  %s5424_s13 = inlined_call_operand.vmem [shape: f32[2,8,128], index: 13, kind: input, shape index: {}]   ;;  %s5425_s14 = inlined_call_operand.vmem [shape: bf16[128,128], index: 14, kind: input, shape index: {}]   ;;  %s5426_s15 = inlined_call_operand.vmem [shape: f32[1,128], index: 15, kind: input, shape index: {}]   ;;  %s5427_s16 = inlined_call_operand.hbm [shape: f32[3,32,128], index: 16, kind: output, shape index: {0}]   ;;  %s5428_s17 = inlined_call_operand.hbm [shape: f32[2,128], index: 17, kind: output, shape index: {1}]  }
   0x1   :  { %5434 = sst [smem:[#allocation27_spill]] %s5411_s0 }
   0x2   :  { %5435 = sst [smem:[#allocation28_spill]] %s5412_s1 }
   0x3   :  { %5436 = sst [smem:[#allocation29_spill]] %s5428_s17 }
   0x4   :  { %23 = vsyncpa [#allocation3], 0 }
   0x5   :  { %24 = vsyncpa [#allocation6], 0 }
   0x6   :  { %25 = vsyncpa [#allocation9], 0 }
   0x7   :  { %26 = vsyncpa [#allocation12], 0 }
   0x8   :  { %27 = vsyncpa [#allocation15], 0 }
   0x9   :  { %28 = vsyncpa [#allocation4], 0 }
   0xa   :  { %29 = vsyncpa [#allocation19], 0  ;;  %s4674_s24 = smov [#allocation5]   ;;  %s4418_s28 = scalar_lea.hbm %s5414_s3, 2048 }
   0xb   :  { %s49_s25 = sshll.u32 %s4674_s24, 4  ;;  %p4419_p0 = scmp.ne.s32.totalorder %s5414_s3, %s4418_s28  ;;  %s50_s25 = int_to_ptr.vmem [resolvable:$true] %s49_s25 }
   0xc   :  { %p4422_p1 = scmp.lt.u32.totalorder %s4418_s28, %s5414_s3 }
   0xe   :  { %p4424_p2 = pnand %p4422_p1, %p4419_p0 }
  0x10   :  { %4427 = shalt.err (!%p4424_p2)
}
  0x11   :  { %s4428_s19 = scalar_lea.vmem %s50_s25, 2048  ;;  %p4433_p4 = scmp.lt.s32.totalorder %s50_s25, %s50_s25 }
  0x12   :  { %p4429_p3 = scmp.ne.s32.totalorder %s50_s25, %s4428_s19  ;;  %p4434_p5 = scmp.lt.s32.totalorder %s4428_s19, %s4428_s19 }
  0x14   :  { %p4435_p6 = por %p4434_p5, %p4433_p4 }
  0x16   :  { %p4436_p7 = pnand %p4435_p6, %p4429_p3 }
  0x18   :  { %4439 = shalt.err (!%p4436_p7)
}
  0x19   :  { %s4675_s1 = smov 128   ;;  %s4676_s20 = smov 8  }
  0x1a   :  { %55 = dma.hbm_to_vmem [thread:$0]  %s5414_s3, 2048, %s50_s25, [#allocation6], %s4675_s1, %s4675_s1, %s4676_s20  }
  0x1b   :  { %s4677_s23 = smov [#allocation8]   ;;  %s4678_s26 = smov [#allocation11]  }
  0x1c   :  { %s74_s24 = sshll.u32 %s4677_s23, 4  ;;  %s97_s27 = sshll.u32 %s4678_s26, 4  ;;  %s75_s24 = int_to_ptr.vmem [resolvable:$true] %s74_s24  ;;  %s98_s27 = int_to_ptr.vmem [resolvable:$true] %s97_s27 }
  0x1d   :  { %s4440_s0 = scalar_lea.hbm %s5417_s6, 32 }
  0x1e   :  { %p4441_p8 = scmp.ne.s32.totalorder %s5417_s6, %s4440_s0  ;;  %p4444_p9 = scmp.lt.u32.totalorder %s4440_s0, %s5417_s6 }
  0x20   :  { %p4446_p10 = pnand %p4444_p9, %p4441_p8 }
  0x22   :  { %4449 = shalt.err (!%p4446_p10)
}
  0x23   :  { %s4450_s3 = scalar_lea.vmem %s75_s24, 32  ;;  %p4455_p12 = scmp.lt.s32.totalorder %s75_s24, %s75_s24 }
  0x24   :  { %p4451_p11 = scmp.ne.s32.totalorder %s75_s24, %s4450_s3  ;;  %p4456_p13 = scmp.lt.s32.totalorder %s4450_s3, %s4450_s3 }
  0x26   :  { %p4457_p0 = por %p4456_p13, %p4455_p12 }
  0x28   :  { %p4458_p1 = pnand %p4457_p0, %p4451_p11 }
  0x2a   :  { %4461 = shalt.err (!%p4458_p1)
}
  0x2b   :  { %77 = dma.hbm_to_vmem [thread:$0]  %s5417_s6, 32, %s75_s24, [#allocation9]  }
  0x2c   :  { %s4462_s26 = scalar_lea.hbm %s5420_s9, 2048 }
  0x2d   :  { %p4463_p2 = scmp.ne.s32.totalorder %s5420_s9, %s4462_s26  ;;  %p4466_p3 = scmp.lt.u32.totalorder %s4462_s26, %s5420_s9 }
  0x2f   :  { %p4468_p4 = pnand %p4466_p3, %p4463_p2 }
  0x31   :  { %4471 = shalt.err (!%p4468_p4)
}
  0x32   :  { %s4472_s30 = scalar_lea.vmem %s98_s27, 2048  ;;  %p4477_p6 = scmp.lt.s32.totalorder %s98_s27, %s98_s27 }
  0x33   :  { %p4473_p5 = scmp.ne.s32.totalorder %s98_s27, %s4472_s30  ;;  %p4478_p7 = scmp.lt.s32.totalorder %s4472_s30, %s4472_s30 }
  0x35   :  { %p4479_p8 = por %p4478_p7, %p4477_p6 }
  0x37   :  { %p4480_p9 = pnand %p4479_p8, %p4473_p5 }
  0x39   :  { %4483 = shalt.err (!%p4480_p9)
}
  0x3a   :  { %s5432_s6 = smov 64   ;;  %s4680_s24 = smov 4  }
  0x3b   :  { %103 = dma.hbm_to_vmem [thread:$0]  %s5420_s9, 2048, %s98_s27, [#allocation12], %s5432_s6, %s5432_s6, %s4680_s24  }
  0x3c   :  { %s4681_s3 = smov [#allocation14]   ;;  %s4484_s23 = scalar_lea.hbm %s5422_s11, 64 }
  0x3d   :  { %s121_s25 = sshll.u32 %s4681_s3, 4  ;;  %p4485_p10 = scmp.ne.s32.totalorder %s5422_s11, %s4484_s23  ;;  %s122_s25 = int_to_ptr.vmem [resolvable:$true] %s121_s25 }
  0x3e   :  { %p4488_p11 = scmp.lt.u32.totalorder %s4484_s23, %s5422_s11 }
  0x40   :  { %p4490_p12 = pnand %p4488_p11, %p4485_p10 }
  0x42   :  { %4493 = shalt.err (!%p4490_p12)
}
  0x43   :  { %s4494_s0 = scalar_lea.vmem %s122_s25, 64  ;;  %p4499_p0 = scmp.lt.s32.totalorder %s122_s25, %s122_s25 }
  0x44   :  { %p4495_p13 = scmp.ne.s32.totalorder %s122_s25, %s4494_s0  ;;  %p4500_p1 = scmp.lt.s32.totalorder %s4494_s0, %s4494_s0 }
  0x46   :  { %p4501_p2 = por %p4500_p1, %p4499_p0 }
  0x48   :  { %p4502_p3 = pnand %p4501_p2, %p4495_p13 }
  0x4a   :  { %4505 = shalt.err (!%p4502_p3)
}
  0x4b   :  { %s4682_s9 = smov 32   ;;  %s4683_s27 = smov 2  }
  0x4c   :  { %127 = dma.hbm_to_vmem [thread:$0]  %s5422_s11, 64, %s122_s25, [#allocation15], %s4682_s9, %s4682_s9, %s4683_s27  }
  0x4d   :  { %s4684_s19 = smov [#allocation2]   ;;  %s4685_s21 = smov [#allocation7]  }
  0x4e   :  { %s40_s3 = sshll.u32 %s4684_s19, 4  ;;  %s64_s22 = sshll.u32 %s4685_s21, 4  ;;  %s41_s3 = int_to_ptr.vmem [resolvable:$true] %s40_s3  ;;  %s65_s22 = int_to_ptr.vmem [resolvable:$true] %s64_s22 }
  0x4f   :  { %s4506_s17 = scalar_lea.hbm %s5413_s2, 32 }
  0x50   :  { %p4507_p4 = scmp.ne.s32.totalorder %s5413_s2, %s4506_s17  ;;  %p4510_p5 = scmp.lt.u32.totalorder %s4506_s17, %s5413_s2 }
  0x52   :  { %p4512_p6 = pnand %p4510_p5, %p4507_p4 }
  0x54   :  { %4515 = shalt.err (!%p4512_p6)
}
  0x55   :  { %s4516_s11 = scalar_lea.vmem %s41_s3, 32  ;;  %p4521_p8 = scmp.lt.s32.totalorder %s41_s3, %s41_s3 }
  0x56   :  { %p4517_p7 = scmp.ne.s32.totalorder %s41_s3, %s4516_s11  ;;  %p4522_p9 = scmp.lt.s32.totalorder %s4516_s11, %s4516_s11 }
  0x58   :  { %p4523_p10 = por %p4522_p9, %p4521_p8 }
  0x5a   :  { %p4524_p11 = pnand %p4523_p10, %p4517_p7 }
  0x5c   :  { %4527 = shalt.err (!%p4524_p11)
}
  0x5d   :  { %43 = dma.hbm_to_vmem [thread:$0]  %s5413_s2, 32, %s41_s3, [#allocation3]  }
  0x5e   :  { %s4528_s18 = scalar_lea.hbm %s5416_s5, 32 }
  0x5f   :  { %p4529_p12 = scmp.ne.s32.totalorder %s5416_s5, %s4528_s18  ;;  %p4532_p13 = scmp.lt.u32.totalorder %s4528_s18, %s5416_s5 }
  0x61   :  { %p4534_p0 = pnand %p4532_p13, %p4529_p12 }
  0x63   :  { %4537 = shalt.err (!%p4534_p0)
}
  0x64   :  { %s4538_s26 = scalar_lea.vmem %s65_s22, 32  ;;  %p4543_p2 = scmp.lt.s32.totalorder %s65_s22, %s65_s22 }
  0x65   :  { %p4539_p1 = scmp.ne.s32.totalorder %s65_s22, %s4538_s26  ;;  %p4544_p3 = scmp.lt.s32.totalorder %s4538_s26, %s4538_s26 }
  0x67   :  { %p4545_p4 = por %p4544_p3, %p4543_p2 }
  0x69   :  { %p4546_p5 = pnand %p4545_p4, %p4539_p1 }
  0x6b   :  { %4549 = shalt.err (!%p4546_p5)
}
  0x6c   :  { %67 = dma.hbm_to_vmem [thread:$0]  %s5416_s5, 32, %s65_s22, [#allocation6]  }
  0x6d   :  { %s4686_s17 = smov [#allocation10]   ;;  %s4550_s11 = scalar_lea.hbm %s5418_s7, 6144 }
  0x6e   :  { %s83_s28 = sshll.u32 %s4686_s17, 4  ;;  %p4551_p6 = scmp.ne.s32.totalorder %s5418_s7, %s4550_s11  ;;  %s84_s28 = int_to_ptr.vmem [resolvable:$true] %s83_s28 }
  0x6f   :  { %p4554_p7 = scmp.lt.u32.totalorder %s4550_s11, %s5418_s7 }
  0x71   :  { %p4556_p8 = pnand %p4554_p7, %p4551_p6 }
  0x73   :  { %4559 = shalt.err (!%p4556_p8)
}
  0x74   :  { %s4560_s18 = scalar_lea.vmem %s84_s28, 6144  ;;  %p4565_p10 = scmp.lt.s32.totalorder %s84_s28, %s84_s28 }
  0x75   :  { %p4561_p9 = scmp.ne.s32.totalorder %s84_s28, %s4560_s18  ;;  %p4566_p11 = scmp.lt.s32.totalorder %s4560_s18, %s4560_s18 }
  0x77   :  { %p4567_p12 = por %p4566_p11, %p4565_p10 }
  0x79   :  { %p4568_p13 = pnand %p4567_p12, %p4561_p9 }
  0x7b   :  { %4571 = shalt.err (!%p4568_p13)
}
  0x7c   :  { %s4687_s5 = smov 192   ;;  %s4688_s22 = smov 12  }
  0x7d   :  { %89 = dma.hbm_to_vmem [thread:$0]  %s5418_s7, 6144, %s84_s28, [#allocation9], %s4687_s5, %s4687_s5, %s4688_s22  }
  0x7e   :  { %s4689_s21 = smov [#allocation13]   ;;  %s4690_s26 = smov [#allocation16]  }
  0x7f   :  { %s109_s23 = sshll.u32 %s4689_s21, 4  ;;  %s133_s2 = sshll.u32 %s4690_s26, 4  ;;  %s110_s23 = int_to_ptr.vmem [resolvable:$true] %s109_s23  ;;  %s134_s2 = int_to_ptr.vmem [resolvable:$true] %s133_s2 }
  0x80   :  { %s4572_s29 = scalar_lea.hbm %s5421_s10, 4096 }
  0x81   :  { %p4573_p0 = scmp.ne.s32.totalorder %s5421_s10, %s4572_s29  ;;  %p4576_p1 = scmp.lt.u32.totalorder %s4572_s29, %s5421_s10 }
  0x83   :  { %p4578_p2 = pnand %p4576_p1, %p4573_p0 }
  0x85   :  { %4581 = shalt.err (!%p4578_p2)
}
  0x86   :  { %s4582_s7 = scalar_lea.vmem %s110_s23, 4096  ;;  %p4587_p4 = scmp.lt.s32.totalorder %s110_s23, %s110_s23 }
  0x87   :  { %p4583_p3 = scmp.ne.s32.totalorder %s110_s23, %s4582_s7  ;;  %p4588_p5 = scmp.lt.s32.totalorder %s4582_s7, %s4582_s7 }
  0x89   :  { %p4589_p6 = por %p4588_p5, %p4587_p4 }
  0x8b   :  { %p4590_p7 = pnand %p4589_p6, %p4583_p3 }
  0x8d   :  { %4593 = shalt.err (!%p4590_p7)
}
  0x8e   :  { %115 = dma.hbm_to_vmem [thread:$0]  %s5421_s10, 4096, %s110_s23, [#allocation12], %s4675_s1, %s4675_s1, %s4676_s20  }
  0x8f   :  { %s4594_s5 = scalar_lea.hbm %s5423_s12, 4096 }
  0x90   :  { %p4595_p8 = scmp.ne.s32.totalorder %s5423_s12, %s4594_s5  ;;  %p4598_p9 = scmp.lt.u32.totalorder %s4594_s5, %s5423_s12 }
  0x92   :  { %p4600_p10 = pnand %p4598_p9, %p4595_p8 }
  0x94   :  { %4603 = shalt.err (!%p4600_p10)
}
  0x95   :  { %s4604_s26 = scalar_lea.vmem %s134_s2, 4096  ;;  %p4609_p12 = scmp.lt.s32.totalorder %s134_s2, %s134_s2 }
  0x96   :  { %p4605_p11 = scmp.ne.s32.totalorder %s134_s2, %s4604_s26  ;;  %p4610_p13 = scmp.lt.s32.totalorder %s4604_s26, %s4604_s26 }
  0x98   :  { %p4611_p0 = por %p4610_p13, %p4609_p12 }
  0x9a   :  { %p4612_p1 = pnand %p4611_p0, %p4605_p11 }
  0x9c   :  { %4615 = shalt.err (!%p4612_p1)
}
  0x9d   :  { %s5437_s10 = smov 64  }
  0x9e   :  { %139 = dma.hbm_to_vmem [thread:$0]  %s5423_s12, 4096, %s134_s2, [#allocation15], %s5437_s10, %s5437_s10, %s4680_s24  }
  0x9f   :  { %4660 = dma.done.wait [#allocation3], 32  }
  0xa0   :  { %4661 = vsyncadd [#allocation3], 4294967264 }
  0xa1   :  { %4662 = dma.done.wait [#allocation6], 2080  }
  0xa2   :  { %4663 = vsyncadd [#allocation6], 4294965216 }
  0xa3   :  { %4664 = dma.done.wait [#allocation9], 6176  }
  0xa4   :  { %4665 = vsyncadd [#allocation9], 4294961120 }
  0xa5   :  { %4666 = dma.done.wait [#allocation12], 6144  }
  0xa6   :  { %4667 = vsyncadd [#allocation12], 4294961152 }
  0xa7   :  { %4668 = dma.done.wait [#allocation15], 4160  }
  0xa8   :  { %4669 = vsyncadd [#allocation15], 4294963136  ;;  %v4691_v0 = vmov 0   ;;  %s5438_s12 = sld [smem:[#allocation27_spill]]  ;;  %v177_v2 = vld [vmem:[#allocation5] sm:$0xff]  ;;  %v178_v3 = vld [vmem:[#allocation5 + $0x8] sm:$0xff]  ;;  %v207_v33 = vlaneseq }
  0xa9   :  { %4090 = vset.pattern.permute.xlu0 %v4691_v0  ;;  %4091 = vset.pattern.permute.xlu1 %v4691_v0  ;;  %v179_v4 = vld [vmem:[#allocation5 + $0x10] sm:$0xff]  ;;  %v4035_v6 = vpack.c.bf16 %v178_v3, %v177_v2  ;;  %v180_v7 = vld [vmem:[#allocation5 + $0x18] sm:$0xff]  ;;  %v181_v9 = vld [vmem:[#allocation5 + $0x20] sm:$0xff]  ;;  %s5439_s7 = sld [smem:[#allocation28_spill]]  ;;  %v4692_v36 = vmov 1.0   ;;  %vm729_vm4 = vcmask 523264  }
  0xaa   :  { %656 = vmatprep.mubr.bf16.mxu1 %v4691_v0  ;;  %v4039_v8 = vpack.c.bf16 %v180_v7, %v179_v4  ;;  %v182_v10 = vld [vmem:[#allocation5 + $0x28] sm:$0xff]  ;;  %v183_v12 = vld [vmem:[#allocation5 + $0x30] sm:$0xff]  ;;  %v184_v14 = vld [vmem:[#allocation5 + $0x38] sm:$0xff]  ;;  %v208_v34 = vand.u32 127, %v207_v33  ;;  %v4928_v42 = vshrl.u32 %v207_v33, 7  ;;  %vm4694_vm5 = vmmov 0  }
  0xab   :  { %4036 = vmatprep.subr.bf16.mxu0 %v4035_v6  ;;  %v4043_v13 = vpack.c.bf16 %v182_v10, %v181_v9  ;;  %v185_v15 = vld [vmem:[#allocation5 + $0x40] sm:$0xff]  ;;  %v4047_v16 = vpack.c.bf16 %v184_v14, %v183_v12  ;;  %v186_v17 = vld [vmem:[#allocation5 + $0x48] sm:$0xff]  ;;  %v187_v21 = vld [vmem:[#allocation5 + $0x50] sm:$0xff]  ;;  %vm785_vm6 = vcmask 130048   ;;  %vm3328_vm7 = vcmask 1040384  }
  0xac   :  { %4038 = vmatpush3.bf16.msra.mxu0 %v4035_v6  ;;  %v188_v22 = vld [vmem:[#allocation5 + $0x58] sm:$0xff]  ;;  %v4051_v24 = vpack.c.bf16 %v186_v17, %v185_v15  ;;  %v189_v26 = vld [vmem:[#allocation5 + $0x60] sm:$0xff]  ;;  %v190_v27 = vld [vmem:[#allocation5 + $0x68] sm:$0xff]  ;;  %v4931_v45 = vsub.s32 0, %v4928_v42 }
  0xad   :  { %4040 = vmatprep.subr.bf16.mxu0 %v4039_v8  ;;  %v4055_v28 = vpack.c.bf16 %v188_v22, %v187_v21  ;;  %v191_v29 = vld [vmem:[#allocation5 + $0x70] sm:$0xff]  ;;  %v192_v30 = vld [vmem:[#allocation5 + $0x78] sm:$0xff]  ;;  %v4059_v31 = vpack.c.bf16 %v190_v27, %v189_v26  ;;  %v195_v43 = vld [vmem:[#allocation7] sm:$0x1] }
  0xae   :  { %v199_v1 = vld [vmem:[%s5438_s12] sm:$0xff]  ;;  %v200_v5 = vld [vmem:[%s5438_s12 + $0x8] sm:$0xff]  ;;  %v201_v11 = vld [vmem:[%s5438_s12 + $0x10] sm:$0xff]  ;;  %v4063_v32 = vpack.c.bf16 %v192_v30, %v191_v29  ;;  %v4938_v49 = vrot.slane %v195_v43, %v4931_v45 }
  0xaf   :  { %210 = vperm.xlu0 %4090, %v199_v1   ;;  %v203_v18 = vld [vmem:[%s5439_s7] sm:$0xff]  ;;  %v204_v19 = vld [vmem:[%s5439_s7 + $0x8] sm:$0xff]  ;;  %v202_v25 = vld [vmem:[%s5438_s12 + $0x18] sm:$0xff] }
  0xb0   :  { %4042 = vmatpush3.bf16.msra.mxu0 %v4039_v8  ;;  %v233_v20 = vcvt.s32.f32 %v203_v18  ;;  %v234_v23 = vcvt.s32.f32 %v204_v19  ;;  %v196_v44 = vld [vmem:[#allocation7 + $0x1] sm:$0x1]  ;;  %v193_v57 = vld [vmem:[%s5415_s4] sm:$0xff]  ;;  %v205_v61 = vld [vmem:[%s5439_s7 + $0x10] sm:$0xff] }
  0xb1   :  { %4044 = vmatprep.subr.bf16.mxu0 %v4043_v13  ;;  %v237_v46 = vsub.f32 %v196_v44, %v195_v43  ;;  %v4946_v54 = vld [vmem:[%s5415_s4 + $0x8] sm:$0xff]  ;;  %v235_v62 = vcvt.s32.f32 %v205_v61  ;;  %v4112_v2 = vld [vmem:[#allocation10 + $0x4] ss:$12 sps:$4 sm:$0xff]  }
  0xb2   :  { %240 = vperm.xlu1 %4091, %v233_v20   ;;  %v4114_v3 = vld [vmem:[#allocation10] ss:$12 sps:$4 sm:$0xff]   ;;  %v4115_v4 = vld [vmem:[#allocation10 + $0x1c] ss:$12 sps:$4 sm:$0xff]   ;;  %624 = vmatprep.subr.bf16.mxu1 %v4112_v2  ;;  %v4117_v18 = vld [vmem:[#allocation10 + $0x18] ss:$12 sps:$4 sm:$0xff]  }
  0xb3   :  { %213 = vperm.xlu0 %4090, %v200_v5   ;;  %v4934_v47 = vrot.slane %v237_v46, %v4931_v45  ;;  %625 = vmatpush1.bf16.msra.mxu1 %v4114_v3  ;;  %v4118_v19 = vld [vmem:[#allocation10 + $0x34] ss:$12 sps:$4 sm:$0xff]   ;;  %v4120_v20 = vld [vmem:[#allocation10 + $0x30] ss:$12 sps:$4 sm:$0xff]   ;;  %v4121_v22 = vld [vmem:[#allocation10 + $0x4c] ss:$12 sps:$4 sm:$0xff]  }
  0xb4   :  { %4046 = vmatpush3.bf16.msra.mxu0 %v4043_v13  ;;  %626 = vmatprep.subr.bf16.mxu1 %v4115_v4  ;;  %v206_v21 = vld [vmem:[%s5439_s7 + $0x18] sm:$0xff]  ;;  %v4130_v29 = vld [vmem:[#allocation10 + $0x94] ss:$12 sps:$4 sm:$0xff]  }
  0xb5   :  { %4048 = vmatprep.subr.bf16.mxu0 %v4047_v16  ;;  %v4126_v26 = vld [vmem:[#allocation10 + $0x60] ss:$12 sps:$4 sm:$0xff]   ;;  %v4127_v27 = vld [vmem:[#allocation10 + $0x7c] ss:$12 sps:$4 sm:$0xff]  }
  0xb6   :  { %245 = vperm.xlu1 %4091, %v234_v23   ;;  %v4123_v23 = vld [vmem:[#allocation10 + $0x48] ss:$12 sps:$4 sm:$0xff]   ;;  %v4132_v30 = vld [vmem:[#allocation10 + $0x90] ss:$12 sps:$4 sm:$0xff]  }
  0xb7   :  { %216 = vperm.xlu0 %4090, %v201_v11   ;;  %627 = vmatpush1.bf16.msra.mxu1 %v4117_v18  ;;  %v4991_v18 = vsub.s32 1, %v4928_v42 }
  0xb8   :  { %4050 = vmatpush3.bf16.msra.mxu0 %v4047_v16  ;;  %628 = vmatprep.subr.bf16.mxu1 %v4118_v19  ;;  %v479_v19 = vld [vmem:[%s5419_s8] sm:$0x7] }
  0xb9   :  { %4052 = vmatprep.subr.bf16.mxu0 %v4051_v24 }
  0xba   :  { %219 = vperm.xlu1 %4091, %v202_v25   ;;  %v4124_v25 = vld [vmem:[#allocation10 + $0x64] ss:$12 sps:$4 sm:$0xff]  }
  0xbb   :  { %629 = vmatpush1.bf16.msra.mxu1 %v4120_v20  ;;  %v484_v20 = vrot.slane %v479_v19, %v4931_v45 }
  0xbc   :  { %4054 = vmatpush3.bf16.msra.mxu0 %v4051_v24  ;;  %630 = vmatprep.subr.bf16.mxu1 %v4121_v22  ;;  %v236_v24 = vcvt.s32.f32 %v206_v21  ;;  %v488_v22 = vrot.slane %v479_v19, %v4991_v18 }
  0xbd   :  { %4056 = vmatprep.subr.bf16.mxu0 %v4055_v28 }
  0xbf   :  { %631 = vmatpush1.bf16.msra.mxu1 %v4123_v23 }
  0xc0   :  { %4058 = vmatpush3.bf16.msra.mxu0 %v4055_v28  ;;  %632 = vmatprep.subr.bf16.mxu1 %v4124_v25  ;;  %v4129_v28 = vld [vmem:[#allocation10 + $0x78] ss:$12 sps:$4 sm:$0xff]  }
  0xc1   :  { %4060 = vmatprep.subr.bf16.mxu0 %v4059_v31 }
  0xc3   :  { %633 = vmatpush1.bf16.msra.mxu1 %v4126_v26 }
  0xc4   :  { %4062 = vmatpush3.bf16.msra.mxu0 %v4059_v31  ;;  %634 = vmatprep.subr.bf16.mxu1 %v4127_v27  ;;  %v4133_v31 = vld [vmem:[#allocation10 + $0xac] ss:$12 sps:$4 sm:$0xff]  }
  0xc5   :  { %4064 = vmatprep.subr.bf16.mxu0 %v4063_v32 }
  0xc7   :  { %635 = vmatpush1.bf16.msra.mxu1 %v4129_v28 }
  0xc8   :  { %4066 = vmatpush3.bf16.msra.mxu0 %v4063_v32  ;;  %636 = vmatprep.subr.bf16.mxu1 %v4130_v29  ;;  %v4135_v32 = vld [vmem:[#allocation10 + $0xa8] ss:$12 sps:$4 sm:$0xff]  }
  0xcb   :  { %637 = vmatpush1.bf16.msra.mxu1 %v4132_v30 }
  0xcc   :  { %638 = vmatprep.subr.bf16.mxu1 %v4133_v31 }
  0xcf   :  { %639 = vmatpush1.bf16.msra.mxu1 %v4135_v32 }
 0x12e   :  { %v211_v35 = vpop.permute.xlu0 %210 }
 0x12f   :  { %vm221_vm0 = vcmp.eq.s32.totalorder %v211_v35, %v208_v34 }
 0x130   :  { %3833 = vmatprep.mubr.msk.f32.mxu0 %vm221_vm0, %v4692_v36 }
 0x131   :  { %v241_v39 = vpop.permute.xlu1 %240 }
 0x132   :  { %v214_v37 = vpop.permute.xlu0 %213  ;;  %v262_v50 = vmul.f32 %v4934_v47, %v241_v39 }
 0x133   :  { %vm222_vm1 = vcmp.eq.s32.totalorder %v214_v37, %v208_v34 }
 0x134   :  { %3834 = vmatmul.mubr.msk.f32.vlgmr.msra.gmra.mrb[0].mxu0 %vm222_vm1, %v4692_v36  ;;  %v270_v52 = vadd.f32 %v4938_v49, %v262_v50 }
 0x135   :  { %v246_v40 = vpop.permute.xlu1 %245 }
 0x136   :  { %v217_v38 = vpop.permute.xlu0 %216  ;;  %v263_v48 = vmul.f32 %v4934_v47, %v246_v40 }
 0x137   :  { %vm223_vm2 = vcmp.eq.s32.totalorder %v217_v38, %v208_v34 }
 0x138   :  { %3836 = vmatprep.mubr.msk.f32.mxu0 %vm223_vm2, %v4692_v36  ;;  %v271_v51 = vadd.f32 %v4938_v49, %v263_v48 }
 0x139   :  { %v220_v41 = vpop.permute.xlu1 %219 }
 0x13a   :  { %vm224_vm3 = vcmp.eq.s32.totalorder %v220_v41, %v208_v34 }
 0x13b   :  { %3837 = vmatmul.mubr.msk.f32.gmra.mrb[2].mxu0 %vm224_vm3, %v4692_v36 }
 0x207   :  { %v3835_v53 = vpop.f32.mrb[0].mxu0 }
 0x208   :  { %v346_v55 = vadd.f32 %v3835_v53, %v271_v51  ;;  %v340_v56 = vpop.f32.mrb[1].mxu0  ;;  %v4964_v51 = vld [vmem:[#allocation8] ss:$0 sm:$0xff] }
 0x209   :  { %v341_v58 = vadd.f32 %v340_v56, %v270_v52 }
 0x20a   :  { %v360_v59 = vadd.f32 %v346_v55, %v4946_v54  ;;  %v4967_v55 = vld [vmem:[#allocation8 + $0x1] ss:$0 sm:$0xff] }
 0x20b   :  { %v359_v60 = vadd.f32 %v341_v58, %v193_v57 }
 0x20c   :  { %365 = vadd.xlane.f32.xlu1 %v360_v59 }
 0x20d   :  { %363 = vadd.xlane.f32.xlu0 %v359_v60 }
 0x20e   :  { %v4955_v63 = vpop.f32.mrb[2].mxu0 }
 0x20f   :  { %v350_v1 = vpop.f32.mrb[3].mxu0 }
 0x21d   :  { %250 = vperm.xlu1 %4091, %v235_v62   ;;  %v4136_v62 = vld [vmem:[#allocation10 + $0x8] ss:$12 sps:$4 sm:$0xff]  }
 0x21e   :  { %3839 = vmatprep.subr.bf16.mxu0 %v4136_v62 }
 0x21f   :  { %3840 = vmatpush3.bf16.msra.mxu0 %v4136_v62 }
 0x299   :  { %v366_v5 = vpop.xlane.xlu1 %365 }
 0x29a   :  { %v364_v6 = vpop.xlane.xlu0 %363  ;;  %v373_v7 = vmul.f32 0.0078125, %v366_v5 }
 0x29b   :  { %v372_v8 = vmul.f32 0.0078125, %v364_v6 }
 0x29c   :  { %v377_v12 = vsub.f32 %v360_v59, %v373_v7 }
 0x29d   :  { %v376_v9 = vsub.f32 %v359_v60, %v372_v8  ;;  %v251_v10 = vpop.permute.xlu1 %250 }
 0x29e   :  { %v264_v11 = vmul.f32 %v4934_v47, %v251_v10  ;;  %v381_v16 = vmul.f32 %v377_v12, %v377_v12 }
 0x29f   :  { %v380_v13 = vmul.f32 %v376_v9, %v376_v9 }
 0x2a0   :  { %v272_v14 = vadd.f32 %v4938_v49, %v264_v11 }
 0x2a1   :  { %384 = vadd.xlane.f32.xlu0 %v380_v13  ;;  %v4139_v13 = vld [vmem:[#allocation10 + $0x50] ss:$12 sps:$4 sm:$0xff]  }
 0x2a2   :  { %v351_v15 = vadd.f32 %v350_v1, %v272_v14  ;;  %v4138_v1 = vld [vmem:[#allocation10 + $0x38] ss:$12 sps:$4 sm:$0xff]   ;;  %v4140_v14 = vld [vmem:[#allocation10 + $0x68] ss:$12 sps:$4 sm:$0xff]  }
 0x2a4   :  { %v361_v17 = vadd.f32 %v351_v15, %v193_v57  ;;  %v4141_v15 = vld [vmem:[#allocation10 + $0x80] ss:$12 sps:$4 sm:$0xff]  }
 0x2a5   :  { %386 = vadd.xlane.f32.xlu0 %v381_v16  ;;  %v4142_v16 = vld [vmem:[#allocation10 + $0x98] ss:$12 sps:$4 sm:$0xff]  }
 0x2a6   :  { %367 = vadd.xlane.f32.xlu1 %v361_v17 }
 0x2bb   :  { %255 = vperm.xlu0 %4090, %v236_v24  }
 0x32e   :  { %v385_v33 = vpop.xlane.xlu0 %384 }
 0x32f   :  { %v392_v34 = vmul.f32 0.0078125, %v385_v33 }
 0x331   :  { %v396_v35 = vadd.f32 1e-12, %v392_v34 }
 0x332   :  { %v387_v36 = vpop.xlane.xlu0 %386 }
 0x333   :  { %4280 = vrsqrt.f32 %v396_v35  ;;  %v393_v37 = vmul.f32 0.0078125, %v387_v36  ;;  %v368_v38 = vpop.xlane.xlu1 %367 }
 0x334   :  { %v374_v39 = vmul.f32 0.0078125, %v368_v38 }
 0x335   :  { %v397_v40 = vadd.f32 1e-12, %v393_v37 }
 0x336   :  { %v378_v41 = vsub.f32 %v361_v17, %v374_v39  ;;  %v4143_v17 = vld [vmem:[#allocation10 + $0xb0] ss:$12 sps:$4 sm:$0xff]  }
 0x337   :  { %4282 = vrsqrt.f32 %v397_v40 }
 0x338   :  { %v382_v43 = vmul.f32 %v378_v41, %v378_v41 }
 0x33a   :  { %388 = vadd.xlane.f32.xlu1 %v382_v43  ;;  %v256_v44 = vpop.permute.xlu0 %255  ;;  %v174_v43 = vld [vmem:[#allocation2] sm:$0x3] }
 0x33b   :  { %v265_v46 = vmul.f32 %v4934_v47, %v256_v44 }
 0x33d   :  { %v4281_v48 = vpop.eup %4280  ;;  %v273_v50 = vadd.f32 %v4938_v49, %v265_v46  ;;  %v175_v46 = vsub.f32 1.0, %v174_v43 }
 0x33e   :  { %v404_v52 = vmul.f32 %v4281_v48, %v376_v9 }
 0x33f   :  { %v356_v53 = vadd.f32 %v4955_v63, %v273_v50  ;;  %v4137_v63 = vld [vmem:[#allocation10 + $0x20] ss:$12 sps:$4 sm:$0xff]   ;;  %v5024_v62 = vmul.f32 -10000.0, %v175_v46 }
 0x340   :  { %v412_v56 = vmul.f32 %v4964_v51, %v404_v52  ;;  %3841 = vmatprep.subr.bf16.mxu0 %v4137_v63 }
 0x341   :  { %v4283_v57 = vpop.eup %4282  ;;  %v362_v58 = vadd.f32 %v356_v53, %v4946_v54  ;;  %v4693_v54 = vmov 0.0   ;;  %3842 = vmatpush3.bf16.msra.mxu0 %v4137_v63 }
 0x342   :  { %v405_v59 = vmul.f32 %v4283_v57, %v377_v12  ;;  %v4972_v60 = vadd.f32 %v4967_v55, %v412_v56  ;;  %3859 = vmatprep.subr.bf16.mxu1 %v4693_v54  ;;  %3843 = vmatprep.subr.bf16.mxu0 %v4138_v1 }
 0x343   :  { %369 = vadd.xlane.f32.xlu0 %v362_v58 }
 0x344   :  { %v413_v47 = vmul.f32 %v4964_v51, %v405_v59  ;;  %424 = vst [vmem:[#allocation17] sm:$0xff] %v4972_v60 }
 0x345   :  { %3844 = vmatpush3.bf16.msra.mxu0 %v4138_v1 }
 0x346   :  { %v4977_v49 = vadd.f32 %v4967_v55, %v413_v47  ;;  %3845 = vmatprep.subr.bf16.mxu0 %v4139_v13 }
 0x348   :  { %425 = vst [vmem:[#allocation17 + $0x8] sm:$0xff] %v4977_v49  ;;  %v477_v61 = vpack.c.bf16 %v4977_v49, %v4972_v60 }
 0x349   :  { %3846 = vmatpush3.bf16.msra.mxu0 %v4139_v13 }
 0x34a   :  { %657 = vmatmul.mubr.bf16.vlgmr.msra.gmra.mrb[0].mxu1 %v477_v61  ;;  %3855 = vmatprep.mubr.bf16.mxu0 %v477_v61 }
 0x34b   :  { %666 = vmatprep.mubr.bf16.mxu1 %v4691_v0  ;;  %3847 = vmatprep.subr.bf16.mxu0 %v4140_v14 }
 0x34d   :  { %3848 = vmatpush3.bf16.msra.mxu0 %v4140_v14 }
 0x34e   :  { %3849 = vmatprep.subr.bf16.mxu0 %v4141_v15 }
 0x351   :  { %3850 = vmatpush3.bf16.msra.mxu0 %v4141_v15 }
 0x352   :  { %3851 = vmatprep.subr.bf16.mxu0 %v4142_v16 }
 0x355   :  { %3852 = vmatpush3.bf16.msra.mxu0 %v4142_v16 }
 0x356   :  { %3853 = vmatprep.subr.bf16.mxu0 %v4143_v17 }
 0x359   :  { %3854 = vmatpush3.bf16.msra.mxu0 %v4143_v17 }
 0x35a   :  { %3877 = vmatprep.subr.bf16.mxu0 %v4693_v54 }
 0x3c7   :  { %v389_v2 = vpop.xlane.xlu1 %388 }
 0x3c8   :  { %v394_v3 = vmul.f32 0.0078125, %v389_v2 }
 0x3ca   :  { %v398_v4 = vadd.f32 1e-12, %v394_v3 }
 0x3cc   :  { %4284 = vrsqrt.f32 %v398_v4 }
 0x3d0   :  { %v370_v5 = vpop.xlane.xlu0 %369 }
 0x3d1   :  { %v375_v6 = vmul.f32 0.0078125, %v370_v5 }
 0x3d3   :  { %v379_v7 = vsub.f32 %v362_v58, %v375_v6 }
 0x3d5   :  { %v383_v8 = vmul.f32 %v379_v7, %v379_v7 }
 0x3d6   :  { %v4285_v9 = vpop.eup %4284 }
 0x3d7   :  { %390 = vadd.xlane.f32.xlu0 %v383_v8  ;;  %v406_v10 = vmul.f32 %v4285_v9, %v378_v41  ;;  %v5021_v41 = vsub.s32 2, %v4928_v42  ;;  %v5032_v8 = vrot.slane %v5024_v62, %v4931_v45 }
 0x3d9   :  { %v414_v11 = vmul.f32 %v4964_v51, %v406_v10  ;;  %v492_v44 = vrot.slane %v479_v19, %v5021_v41 }
 0x3db   :  { %v4986_v12 = vadd.f32 %v4967_v55, %v414_v11 }
 0x3dd   :  { %426 = vst [vmem:[#allocation17 + $0x10] sm:$0xff] %v4986_v12 }
 0x41d   :  { %v658_v21 = vpop.f32.mrb[0].mxu1 }
 0x41e   :  { %v660_v23 = vpop.f32.mrb[1].mxu1  ;;  %v659_v25 = vadd.f32 %v658_v21, %v484_v20 }
 0x41f   :  { %v662_v24 = vpop.f32.mrb[2].mxu1  ;;  %v661_v28 = vadd.f32 %v660_v23, %v488_v22 }
 0x420   :  { %v663_v26 = vadd.f32 %v662_v24, %v484_v20  ;;  %v664_v27 = vpop.f32.mrb[3].mxu1 }
 0x421   :  { %v665_v29 = vadd.f32 %v664_v27, %v488_v22 }
 0x422   :  { %v4998_v30 = vpack.c.bf16 %v663_v26, %v659_v25 }
 0x423   :  { %v5000_v31 = vpack.c.bf16 %v665_v29, %v661_v28 }
 0x425   :  { %v734_v32 = vsel %vm729_vm4, %v5000_v31, 0 }
 0x426   :  { %3860 = vmatpush3.bf16.xpose.msra.mxu1 %v734_v32 }
 0x427   :  { %3865 = vmatprep.subr.bf16.mxu1 %v4693_v54 }
 0x464   :  { %v391_v33 = vpop.xlane.xlu0 %390 }
 0x465   :  { %v395_v34 = vmul.f32 0.0078125, %v391_v33 }
 0x467   :  { %v399_v35 = vadd.f32 1e-12, %v395_v34 }
 0x469   :  { %4286 = vrsqrt.f32 %v399_v35 }
 0x473   :  { %v4287_v36 = vpop.eup %4286 }
 0x474   :  { %v407_v37 = vmul.f32 %v4287_v36, %v379_v7 }
 0x476   :  { %v415_v38 = vmul.f32 %v4964_v51, %v407_v37 }
 0x478   :  { %v5007_v39 = vadd.f32 %v4967_v55, %v415_v38 }
 0x47a   :  { %427 = vst [vmem:[#allocation17 + $0x18] sm:$0xff] %v5007_v39  ;;  %v478_v40 = vpack.c.bf16 %v5007_v39, %v4986_v12 }
 0x47c   :  { %667 = vmatmul.mubr.bf16.gmra.mrb[4].mxu1 %v478_v40  ;;  %3856 = vmatmul.mubr.bf16.vlgmr.msra.gmra.mrb[4].mxu0 %v478_v40 }
 0x47d   :  { %3861 = vmatprep.mubr.msk.bf16.mxu1 %vm4694_vm5, %v4693_v54  ;;  %3879 = vmatprep.mubr.msk.bf16.mxu0 %vm4694_vm5, %v4693_v54 }
 0x484   :  { %3862 = vmatmul.mubr.msk.bf16.vlgmr.msra.gmra.mrb[8].mxu1 %vm729_vm4, %v4998_v30 }
 0x485   :  { %3867 = vmatprep.mubr.msk.bf16.mxu1 %vm4694_vm5, %v4693_v54 }
 0x54f   :  { %v668_v48 = vpop.f32.mrb[4].mxu1  ;;  %v3857_v50 = vpop.f32.mrb[4].mxu0 }
 0x550   :  { %v720_v51 = vadd.f32 %v3857_v50, %v492_v44  ;;  %v670_v52 = vpop.f32.mrb[5].mxu1  ;;  %v711_v53 = vpop.f32.mrb[5].mxu0  ;;  %v669_v57 = vadd.f32 %v668_v48, %v484_v20 }
 0x551   :  { %v672_v55 = vpop.f32.mrb[6].mxu1  ;;  %v3858_v56 = vpop.f32.mrb[6].mxu0  ;;  %v671_v63 = vadd.f32 %v670_v52, %v488_v22  ;;  %v712_v1 = vadd.f32 %v711_v53, %v492_v44 }
 0x552   :  { %v673_v58 = vadd.f32 %v672_v55, %v484_v20  ;;  %v723_v59 = vadd.f32 %v3858_v56, %v492_v44  ;;  %v674_v47 = vpop.f32.mrb[7].mxu1  ;;  %v714_v61 = vpop.f32.mrb[7].mxu0 }
 0x553   :  { %v675_v2 = vadd.f32 %v674_v47, %v488_v22  ;;  %v715_v3 = vadd.f32 %v714_v61, %v492_v44 }
 0x554   :  { %v991_v4 = vpack.c.bf16 %v673_v58, %v669_v57  ;;  %v5026_v5 = vpack.c.bf16 %v723_v59, %v720_v51 }
 0x555   :  { %v5028_v6 = vpack.c.bf16 %v715_v3, %v712_v1  ;;  %v992_v7 = vpack.c.bf16 %v675_v2, %v671_v63 }
 0x557   :  { %v770_v9 = vpop.f32.mrb[8].mxu1  ;;  %3866 = vmatpush3.bf16.msra.mxu1 %v5028_v6 }
 0x558   :  { %v777_v10 = vmul.f32 0.125, %v770_v9  ;;  %v3863_v11 = vpop.f32.mrb[9].mxu1  ;;  %3871 = vmatprep.subr.bf16.mxu1 %v4693_v54 }
 0x559   :  { %v773_v13 = vpop.f32.mrb[10].mxu1 }
 0x55a   :  { %v778_v14 = vmul.f32 0.125, %v773_v13  ;;  %v3864_v15 = vpop.f32.mrb[11].mxu1  ;;  %v783_v16 = vadd.f32 %v5032_v8, %v777_v10 }
 0x55c   :  { %v786_v17 = vsel %vm785_vm6, %v783_v16, -inf  ;;  %v784_v19 = vadd.f32 %v5032_v8, %v778_v14 }
 0x55d   :  { %787 = vmax.xlane.f32.xlu1 %v786_v17 }
 0x55e   :  { %v789_v20 = vsel %vm785_vm6, %v784_v19, -inf }
 0x55f   :  { %790 = vmax.xlane.f32.xlu0 %v789_v20 }
 0x5ea   :  { %v788_v21 = vpop.xlane.xlu1 %787 }
 0x5eb   :  { %v792_v22 = vsub.f32 %v783_v16, %v788_v21 }
 0x5ec   :  { %v791_v23 = vpop.xlane.xlu0 %790 }
 0x5ed   :  { %v794_v24 = vmul.f32 1.442695, %v792_v22  ;;  %v793_v25 = vsub.f32 %v784_v19, %v791_v23 }
 0x5ef   :  { %4288 = vpow2.f32 %v794_v24  ;;  %v796_v26 = vmul.f32 1.442695, %v793_v25 }
 0x5f1   :  { %4290 = vpow2.f32 %v796_v26 }
 0x5f9   :  { %v4289_v27 = vpop.eup %4288 }
 0x5fa   :  { %v798_v28 = vsel %vm785_vm6, %v4289_v27, 0.0 }
 0x5fb   :  { %v4291_v29 = vpop.eup %4290  ;;  %799 = vadd.xlane.f32.xlu1 %v798_v28 }
 0x5fc   :  { %v801_v32 = vsel %vm785_vm6, %v4291_v29, 0.0 }
 0x5fd   :  { %802 = vadd.xlane.f32.xlu0 %v801_v32 }
 0x60c   :  { %857 = vrot.lane.b32.xlu1 %v5000_v31, %s5437_s10  ;;  %v998_v31 = vsel %vm729_vm4, %v992_v7, 0 }
 0x610   :  { %1120 = vrot.lane.b32.xlu1 %v992_v7, %s5437_s10 }
 0x613   :  { %854 = vrot.lane.b32.xlu0 %v4998_v30, %s5437_s10 }
 0x614   :  { %1117 = vrot.lane.b32.xlu1 %v991_v4, %s5437_s10 }
 0x688   :  { %v800_v33 = vpop.xlane.xlu1 %799 }
 0x689   :  { %4292 = vrcp.f32 %v800_v33 }
 0x68a   :  { %v803_v34 = vpop.xlane.xlu0 %802 }
 0x68b   :  { %4294 = vrcp.f32 %v803_v34 }
 0x68c   :  { %v858_v40 = vpop.permute.xlu1 %857 }
 0x68d   :  { %v863_v44 = vsel %vm729_vm4, %v858_v40, 0 }
 0x68e   :  { %v855_v30 = vpop.permute.xlu0 %854 }
 0x690   :  { %v1121_v46 = vpop.permute.xlu1 %1120 }
 0x691   :  { %v1126_v48 = vsel %vm729_vm4, %v1121_v46, 0 }
 0x693   :  { %v4293_v35 = vpop.eup %4292 }
 0x694   :  { %v806_v37 = vmul.f32 %v4293_v35, %v4289_v27  ;;  %v1118_v50 = vpop.permute.xlu1 %1117 }
 0x695   :  { %v4295_v36 = vpop.eup %4294 }
 0x696   :  { %v807_v38 = vmul.f32 %v4295_v36, %v4291_v29 }
 0x698   :  { %v808_v43 = vpack.c.bf16 %v807_v38, %v806_v37 }
 0x69a   :  { %3868 = vmatmul.mubr.msk.bf16.vlgmr.msra.gmra.mrb[12].mxu1 %vm785_vm6, %v808_v43 }
 0x69b   :  { %3872 = vmatpush3.bf16.xpose.msra.mxu1 %v863_v44  ;;  %3873 = vmatprep.mubr.msk.bf16.mxu1 %vm4694_vm5, %v4693_v54 }
 0x69c   :  { %3883 = vmatprep.subr.bf16.mxu1 %v4693_v54 }
 0x6a2   :  { %3874 = vmatmul.mubr.msk.bf16.vlgmr.msra.gmra.mrb[16].mxu1 %vm729_vm4, %v855_v30 }
 0x6a3   :  { %3884 = vmatpush3.bf16.xpose.msra.mxu1 %v998_v31  ;;  %3885 = vmatprep.mubr.msk.bf16.mxu1 %vm4694_vm5, %v4693_v54 }
 0x6a4   :  { %3895 = vmatprep.subr.bf16.mxu1 %v4693_v54 }
 0x6aa   :  { %3886 = vmatmul.mubr.msk.bf16.vlgmr.msra.gmra.mrb[20].mxu1 %vm729_vm4, %v991_v4  ;;  %v5073_v4 = vrot.slane %v5024_v62, %v4991_v18 }
 0x6ab   :  { %3896 = vmatpush3.bf16.xpose.msra.mxu1 %v1126_v48  ;;  %3897 = vmatprep.mubr.msk.bf16.mxu1 %vm4694_vm5, %v4693_v54 }
 0x6b2   :  { %3898 = vmatmul.mubr.msk.bf16.vlgmr.msra.gmra.mrb[24].mxu1 %vm729_vm4, %v1118_v50 }
 0x76d   :  { %v5063_v51 = vpop.f32.mrb[12].mxu1 }
 0x76e   :  { %v3869_v52 = vpop.f32.mrb[13].mxu1 }
 0x76f   :  { %v5065_v53 = vpop.f32.mrb[14].mxu1 }
 0x770   :  { %v3870_v55 = vpop.f32.mrb[15].mxu1 }
 0x775   :  { %v899_v56 = vpop.f32.mrb[16].mxu1 }
 0x776   :  { %v906_v57 = vmul.f32 0.125, %v899_v56  ;;  %v3875_v58 = vpop.f32.mrb[17].mxu1 }
 0x777   :  { %v902_v59 = vpop.f32.mrb[18].mxu1 }
 0x778   :  { %v907_v47 = vmul.f32 0.125, %v902_v59  ;;  %v3876_v61 = vpop.f32.mrb[19].mxu1  ;;  %v908_v63 = vadd.f32 %v906_v57, %v5032_v8 }
 0x77a   :  { %v910_v1 = vsel %vm785_vm6, %v908_v63, -inf  ;;  %v909_v2 = vadd.f32 %v907_v47, %v5032_v8 }
 0x77b   :  { %911 = vmax.xlane.f32.xlu0 %v910_v1 }
 0x77c   :  { %v913_v3 = vsel %vm785_vm6, %v909_v2, -inf }
 0x77d   :  { %914 = vmax.xlane.f32.xlu1 %v913_v3  ;;  %v1034_v7 = vpop.f32.mrb[20].mxu1 }
 0x77e   :  { %v1041_v9 = vmul.f32 0.125, %v1034_v7  ;;  %v3887_v10 = vpop.f32.mrb[21].mxu1 }
 0x77f   :  { %v1037_v11 = vpop.f32.mrb[22].mxu1 }
 0x780   :  { %v1042_v13 = vmul.f32 0.125, %v1037_v11  ;;  %v3888_v14 = vpop.f32.mrb[23].mxu1  ;;  %v1047_v15 = vadd.f32 %v5073_v4, %v1041_v9 }
 0x782   :  { %v1049_v16 = vsel %vm785_vm6, %v1047_v15, -inf  ;;  %v1048_v17 = vadd.f32 %v5073_v4, %v1042_v13 }
 0x783   :  { %1050 = vmax.xlane.f32.xlu0 %v1049_v16 }
 0x784   :  { %v1052_v62 = vsel %vm785_vm6, %v1048_v17, -inf }
 0x785   :  { %v1162_v19 = vpop.f32.mrb[24].mxu1 }
 0x786   :  { %v1169_v20 = vmul.f32 0.125, %v1162_v19  ;;  %v3899_v21 = vpop.f32.mrb[25].mxu1 }
 0x787   :  { %1053 = vmax.xlane.f32.xlu0 %v1052_v62  ;;  %v1165_v22 = vpop.f32.mrb[26].mxu1 }
 0x788   :  { %v1170_v23 = vmul.f32 0.125, %v1165_v22  ;;  %v3900_v24 = vpop.f32.mrb[27].mxu1  ;;  %v1171_v25 = vadd.f32 %v1169_v20, %v5073_v4 }
 0x78a   :  { %v1173_v26 = vsel %vm785_vm6, %v1171_v25, -inf  ;;  %v1172_v27 = vadd.f32 %v1170_v23, %v5073_v4 }
 0x78b   :  { %1174 = vmax.xlane.f32.xlu1 %v1173_v26 }
 0x78c   :  { %v1176_v28 = vsel %vm785_vm6, %v1172_v27, -inf }
 0x78d   :  { %1177 = vmax.xlane.f32.xlu0 %v1176_v28 }
 0x808   :  { %v912_v29 = vpop.xlane.xlu0 %911 }
 0x809   :  { %v916_v32 = vsub.f32 %v908_v63, %v912_v29 }
 0x80a   :  { %v915_v33 = vpop.xlane.xlu1 %914 }
 0x80b   :  { %v918_v34 = vmul.f32 1.442695, %v916_v32  ;;  %v917_v35 = vsub.f32 %v909_v2, %v915_v33 }
 0x80d   :  { %4296 = vpow2.f32 %v918_v34  ;;  %v920_v36 = vmul.f32 1.442695, %v917_v35  ;;  %v4144_v34 = vld [vmem:[#allocation11] sm:$0xff]   ;;  %v4145_v35 = vld [vmem:[#allocation11 + $0x8] sm:$0xff]  }
 0x80e   :  { %3907 = vmatprep.subr.bf16.mxu1 %v4144_v34 }
 0x80f   :  { %4298 = vpow2.f32 %v920_v36  ;;  %3908 = vmatpush3.bf16.msra.mxu1 %v4144_v34  ;;  %v4146_v36 = vld [vmem:[#allocation11 + $0x10] sm:$0xff]  }
 0x810   :  { %v1051_v37 = vpop.xlane.xlu0 %1050  ;;  %3909 = vmatprep.subr.bf16.mxu1 %v4145_v35 }
 0x811   :  { %v1055_v38 = vsub.f32 %v1047_v15, %v1051_v37  ;;  %v4147_v37 = vld [vmem:[#allocation11 + $0x18] sm:$0xff]  }
 0x813   :  { %v1057_v40 = vmul.f32 1.442695, %v1055_v38  ;;  %3910 = vmatpush3.bf16.msra.mxu1 %v4145_v35  ;;  %v4148_v38 = vld [vmem:[#allocation11 + $0x20] sm:$0xff]  }
 0x814   :  { %v1054_v43 = vpop.xlane.xlu0 %1053  ;;  %3911 = vmatprep.subr.bf16.mxu1 %v4146_v36 }
 0x815   :  { %4300 = vpow2.f32 %v1057_v40  ;;  %v1056_v44 = vsub.f32 %v1048_v17, %v1054_v43  ;;  %v4149_v40 = vld [vmem:[#allocation11 + $0x28] sm:$0xff]  }
 0x817   :  { %v4297_v30 = vpop.eup %4296  ;;  %v1059_v31 = vmul.f32 1.442695, %v1056_v44  ;;  %3912 = vmatpush3.bf16.msra.mxu1 %v4146_v36  ;;  %v4150_v44 = vld [vmem:[#allocation11 + $0x30] sm:$0xff]  }
 0x818   :  { %v1175_v46 = vpop.xlane.xlu1 %1174  ;;  %v922_v48 = vsel %vm785_vm6, %v4297_v30, 0.0  ;;  %3913 = vmatprep.subr.bf16.mxu1 %v4147_v37 }
 0x819   :  { %v4299_v50 = vpop.eup %4298  ;;  %4302 = vpow2.f32 %v1059_v31  ;;  %v1179_v52 = vsub.f32 %v1171_v25, %v1175_v46  ;;  %923 = vadd.xlane.f32.xlu1 %v922_v48 }
 0x81a   :  { %v1178_v55 = vpop.xlane.xlu0 %1177  ;;  %v925_v56 = vsel %vm785_vm6, %v4299_v50, 0.0 }
 0x81b   :  { %v1181_v57 = vmul.f32 1.442695, %v1179_v52  ;;  %v1180_v58 = vsub.f32 %v1172_v27, %v1178_v55  ;;  %926 = vadd.xlane.f32.xlu0 %v925_v56  ;;  %3914 = vmatpush3.bf16.msra.mxu1 %v4147_v37  ;;  %v4151_v52 = vld [vmem:[#allocation11 + $0x38] sm:$0xff]  }
 0x81c   :  { %3915 = vmatprep.subr.bf16.mxu1 %v4148_v38 }
 0x81d   :  { %4304 = vpow2.f32 %v1181_v57  ;;  %v1183_v59 = vmul.f32 1.442695, %v1180_v58 }
 0x81f   :  { %v4301_v47 = vpop.eup %4300  ;;  %4306 = vpow2.f32 %v1183_v59  ;;  %3916 = vmatpush3.bf16.msra.mxu1 %v4148_v38 }
 0x820   :  { %v1061_v61 = vsel %vm785_vm6, %v4301_v47, 0.0  ;;  %3917 = vmatprep.subr.bf16.mxu1 %v4149_v40 }
 0x821   :  { %1062 = vadd.xlane.f32.xlu1 %v1061_v61 }
 0x823   :  { %v4303_v63 = vpop.eup %4302  ;;  %3918 = vmatpush3.bf16.msra.mxu1 %v4149_v40 }
 0x824   :  { %v1064_v1 = vsel %vm785_vm6, %v4303_v63, 0.0  ;;  %3919 = vmatprep.subr.bf16.mxu1 %v4150_v44 }
 0x825   :  { %1065 = vadd.xlane.f32.xlu0 %v1064_v1 }
 0x827   :  { %v4305_v2 = vpop.eup %4304  ;;  %3920 = vmatpush3.bf16.msra.mxu1 %v4150_v44 }
 0x828   :  { %v1185_v3 = vsel %vm785_vm6, %v4305_v2, 0.0  ;;  %3921 = vmatprep.subr.bf16.mxu1 %v4151_v52 }
 0x829   :  { %v4307_v7 = vpop.eup %4306  ;;  %1186 = vadd.xlane.f32.xlu1 %v1185_v3 }
 0x82a   :  { %v1188_v9 = vsel %vm785_vm6, %v4307_v7, 0.0 }
 0x82b   :  { %1189 = vadd.xlane.f32.xlu0 %v1188_v9  ;;  %3922 = vmatpush3.bf16.msra.mxu1 %v4151_v52  ;;  %v4166_v52 = vld [vmem:[#allocation13 + $0x44] ss:$8 sps:$4 sm:$0xff]  }
 0x83a   :  { %934 = vrot.lane.b32.xlu1 %v5028_v6, %s5437_s10 }
 0x841   :  { %1197 = vrot.lane.b32.xlu0 %v5026_v5, %s5437_s10 }
 0x8a6   :  { %v924_v11 = vpop.xlane.xlu1 %923 }
 0x8a8   :  { %v927_v10 = vpop.xlane.xlu0 %926 }
 0x8a9   :  { %4308 = vrcp.f32 %v927_v10 }
 0x8aa   :  { %4310 = vrcp.f32 %v924_v11 }
 0x8ae   :  { %v1063_v13 = vpop.xlane.xlu1 %1062 }
 0x8b2   :  { %v1066_v14 = vpop.xlane.xlu0 %1065 }
 0x8b3   :  { %4312 = vrcp.f32 %v1066_v14  ;;  %v4309_v15 = vpop.eup %4308 }
 0x8b4   :  { %4314 = vrcp.f32 %v1063_v13  ;;  %v4311_v17 = vpop.eup %4310  ;;  %v931_v19 = vmul.f32 %v4309_v15, %v4299_v50 }
 0x8b5   :  { %v930_v21 = vmul.f32 %v4311_v17, %v4297_v30 }
 0x8b6   :  { %v1187_v16 = vpop.xlane.xlu1 %1186 }
 0x8b7   :  { %v932_v6 = vpack.c.bf16 %v931_v19, %v930_v21  ;;  %v5115_v19 = vld [vmem:[%s5424_s13] sm:$0xff] }
 0x8b8   :  { %v1190_v20 = vpop.xlane.xlu0 %1189 }
 0x8b9   :  { %4316 = vrcp.f32 %v1190_v20 }
 0x8ba   :  { %v935_v62 = vpop.permute.xlu1 %934  ;;  %4318 = vrcp.f32 %v1187_v16 }
 0x8bb   :  { %3878 = vmatpush3.bf16.msra.mxu0 %v935_v62 }
 0x8bc   :  { %3889 = vmatprep.subr.bf16.mxu0 %v4693_v54  ;;  %v1198_v28 = vpop.permute.xlu0 %1197 }
 0x8bd   :  { %v4313_v22 = vpop.eup %4312 }
 0x8be   :  { %3880 = vmatmul.mubr.msk.bf16.vlgmr.msra.gmra.mrb[8].mxu0 %vm785_vm6, %v932_v6  ;;  %v4315_v23 = vpop.eup %4314  ;;  %v1070_v24 = vmul.f32 %v4313_v22, %v4303_v63 }
 0x8bf   :  { %3890 = vmatpush3.bf16.msra.mxu0 %v5026_v5  ;;  %3891 = vmatprep.mubr.msk.bf16.mxu0 %vm4694_vm5, %v4693_v54  ;;  %v1069_v25 = vmul.f32 %v4315_v23, %v4301_v47 }
 0x8c0   :  { %3901 = vmatprep.subr.bf16.mxu0 %v4693_v54 }
 0x8c1   :  { %v1071_v26 = vpack.c.bf16 %v1070_v24, %v1069_v25 }
 0x8c3   :  { %v4317_v27 = vpop.eup %4316 }
 0x8c4   :  { %v4319_v29 = vpop.eup %4318  ;;  %v1194_v32 = vmul.f32 %v4317_v27, %v4307_v7 }
 0x8c5   :  { %v1193_v33 = vmul.f32 %v4319_v29, %v4305_v2  ;;  %v4154_v29 = vld [vmem:[#allocation13 + $0x4] ss:$8 sps:$4 sm:$0xff]  }
 0x8c6   :  { %3892 = vmatmul.mubr.msk.bf16.vlgmr.msra.gmra.mrb[12].mxu0 %vm785_vm6, %v1071_v26 }
 0x8c7   :  { %3902 = vmatpush3.bf16.msra.mxu0 %v1198_v28  ;;  %3903 = vmatprep.mubr.msk.bf16.mxu0 %vm4694_vm5, %v4693_v54  ;;  %v1195_v5 = vpack.c.bf16 %v1194_v32, %v1193_v33  ;;  %v4152_v28 = vld [vmem:[#allocation13] ss:$8 sps:$4 sm:$0xff]   ;;  %v4157_v32 = vld [vmem:[#allocation13 + $0x14] ss:$8 sps:$4 sm:$0xff]   ;;  %v4155_v33 = vld [vmem:[#allocation13 + $0x10] ss:$8 sps:$4 sm:$0xff]  }
 0x8c8   :  { %1531 = vmatprep.subr.bf16.mxu0 %v4154_v29  ;;  %v4182_v29 = vld [vmem:[#allocation16 + $0x58] sm:$0xff]  }
 0x8ce   :  { %3904 = vmatmul.mubr.msk.bf16.vlgmr.msra.gmra.mrb[16].mxu0 %vm785_vm6, %v1195_v5 }
 0x8cf   :  { %1563 = vmatprep.mubr.bf16.mxu0 %v4691_v0  ;;  %1532 = vmatpush1.bf16.msra.mxu0 %v4152_v28  ;;  %v4181_v28 = vld [vmem:[#allocation16 + $0x10] sm:$0xff]  }
 0x8d0   :  { %1533 = vmatprep.subr.bf16.mxu0 %v4157_v32  ;;  %v4183_v32 = vld [vmem:[#allocation16 + $0x18] sm:$0xff]  }
 0x8d3   :  { %1534 = vmatpush1.bf16.msra.mxu0 %v4155_v33  ;;  %v4184_v33 = vld [vmem:[#allocation16 + $0x60] sm:$0xff]  }
 0x991   :  { %v974_v43 = vpop.f32.mrb[8].mxu0 }
 0x992   :  { %v3881_v30 = vpop.f32.mrb[9].mxu0 }
 0x993   :  { %v977_v31 = vpop.f32.mrb[10].mxu0 }
 0x994   :  { %v4092_v46 = vpack.i.bf16 %v977_v31, %v974_v43  ;;  %v3882_v48 = vpop.f32.mrb[11].mxu0  ;;  %v4160_v31 = vld [vmem:[#allocation13 + $0x24] ss:$8 sps:$4 sm:$0xff]  }
 0x995   :  { %1535 = vmatprep.subr.bf16.mxu0 %v4160_v31  ;;  %v4163_v48 = vld [vmem:[#allocation13 + $0x34] ss:$8 sps:$4 sm:$0xff]  }
 0x996   :  { %4093 = vrot.lane.b32.xlu1 %v4092_v46, %s5437_s10  ;;  %v4158_v46 = vld [vmem:[#allocation13 + $0x20] ss:$8 sps:$4 sm:$0xff]  }
 0x997   :  { %1536 = vmatpush1.bf16.msra.mxu0 %v4158_v46 }
 0x998   :  { %1537 = vmatprep.subr.bf16.mxu0 %v4163_v48 }
 0x999   :  { %v1109_v50 = vpop.f32.mrb[12].mxu0 }
 0x99a   :  { %v3893_v55 = vpop.f32.mrb[13].mxu0 }
 0x99b   :  { %v1112_v56 = vpop.f32.mrb[14].mxu0  ;;  %v4164_v55 = vld [vmem:[#allocation13 + $0x40] ss:$8 sps:$4 sm:$0xff]  }
 0x99c   :  { %v3894_v57 = vpop.f32.mrb[15].mxu0 }
 0x99d   :  { %v4167_v57 = vld [vmem:[#allocation13 + $0x50] ss:$8 sps:$4 sm:$0xff]  }
 0x9a1   :  { %v1237_v58 = vpop.f32.mrb[16].mxu0 }
 0x9a2   :  { %v3905_v59 = vpop.f32.mrb[17].mxu0 }
 0x9a3   :  { %v1240_v47 = vpop.f32.mrb[18].mxu0  ;;  %v4170_v59 = vld [vmem:[#allocation13 + $0x60] ss:$8 sps:$4 sm:$0xff]  }
 0x9a4   :  { %v4097_v61 = vpack.i.bf16 %v1240_v47, %v1237_v58  ;;  %v3906_v63 = vpop.f32.mrb[19].mxu0  ;;  %v4172_v58 = vld [vmem:[#allocation13 + $0x64] ss:$8 sps:$4 sm:$0xff]   ;;  %v4173_v47 = vld [vmem:[#allocation13 + $0x70] ss:$8 sps:$4 sm:$0xff]  }
 0x9a6   :  { %4098 = vrot.lane.b32.xlu1 %v4097_v61, %s5437_s10 }
 0xa08   :  { %v4094_v1 = vpop.permute.xlu1 %4093 }
 0xa09   :  { %v4096_v2 = vunpack.i.h.bf16 %v4094_v1  ;;  %v4095_v3 = vunpack.i.l.bf16 %v4094_v1 }
 0xa0b   :  { %v989_v7 = vsel %vm729_vm4, %v5063_v51, %v4095_v3  ;;  %v990_v9 = vsel %vm729_vm4, %v5065_v53, %v4096_v2  ;;  %v1259_v51 = vrot.slane %v5115_v19, %v4931_v45 }
 0xa0c   :  { %v1254_v10 = vpack.c.bf16 %v990_v9, %v989_v7 }
 0xa0e   :  { %3923 = vmatprep.mubr.bf16.mxu1 %v1254_v10 }
 0xa18   :  { %v4099_v11 = vpop.permute.xlu1 %4098 }
 0xa19   :  { %v4101_v13 = vunpack.i.h.bf16 %v4099_v11  ;;  %v4100_v14 = vunpack.i.l.bf16 %v4099_v11 }
 0xa1b   :  { %v1253_v15 = vsel %vm729_vm4, %v1112_v56, %v4101_v13  ;;  %v1252_v16 = vsel %vm729_vm4, %v1109_v50, %v4100_v14  ;;  %v4161_v50 = vld [vmem:[#allocation13 + $0x30] ss:$8 sps:$4 sm:$0xff]   ;;  %v4169_v56 = vld [vmem:[#allocation13 + $0x54] ss:$8 sps:$4 sm:$0xff]  }
 0xa1c   :  { %v1255_v17 = vpack.c.bf16 %v1253_v15, %v1252_v16  ;;  %1538 = vmatpush1.bf16.msra.mxu0 %v4161_v50  ;;  %v1408_v16 = vrot.slane %v5115_v19, %v4991_v18 }
 0xa1d   :  { %1539 = vmatprep.subr.bf16.mxu0 %v4166_v52 }
 0xa1e   :  { %3924 = vmatmul.mubr.bf16.vlgmr.msra.gmra.mrb[28].mxu1 %v1255_v17 }
 0xa20   :  { %1540 = vmatpush1.bf16.msra.mxu0 %v4164_v55 }
 0xa21   :  { %1541 = vmatprep.subr.bf16.mxu0 %v4169_v56 }
 0xa24   :  { %1542 = vmatpush1.bf16.msra.mxu0 %v4167_v57 }
 0xa25   :  { %1543 = vmatprep.subr.bf16.mxu0 %v4172_v58 }
 0xa28   :  { %1544 = vmatpush1.bf16.msra.mxu0 %v4170_v59 }
 0xaf1   :  { %v3925_v53 = vpop.f32.mrb[28].mxu1 }
 0xaf2   :  { %v1342_v20 = vpop.f32.mrb[29].mxu1  ;;  %v1351_v25 = vadd.f32 %v3925_v53, %v1259_v51 }
 0xaf3   :  { %v1343_v21 = vadd.f32 %v1342_v20, %v1259_v51  ;;  %v3926_v62 = vpop.f32.mrb[30].mxu1  ;;  %v1416_v20 = vrot.slane %v5115_v19, %v5021_v41 }
 0xaf4   :  { %v1354_v6 = vadd.f32 %v3926_v62, %v1259_v51  ;;  %v1345_v22 = vpop.f32.mrb[31].mxu1  ;;  %v1359_v27 = vadd.f32 %v1351_v25, %v4986_v12  ;;  %v4178_v25 = vld [vmem:[#allocation16 + $0x48] sm:$0xff]  }
 0xaf5   :  { %v1346_v23 = vadd.f32 %v1345_v22, %v1259_v51  ;;  %v1357_v24 = vadd.f32 %v1343_v21, %v4972_v60 }
 0xaf6   :  { %v1360_v30 = vadd.f32 %v1354_v6, %v5007_v39  ;;  %v4175_v39 = vld [vmem:[#allocation13 + $0x74] ss:$8 sps:$4 sm:$0xff]  }
 0xaf7   :  { %1361 = vadd.xlane.f32.xlu0 %v1357_v24  ;;  %v1358_v26 = vadd.f32 %v1346_v23, %v4977_v49  ;;  %1545 = vmatprep.subr.bf16.mxu0 %v4175_v39  ;;  %v4176_v23 = vld [vmem:[#allocation16 + $0x40] sm:$0xff]   ;;  %v1439_v39 = vld [vmem:[#allocation14] sm:$0x3] }
 0xaf8   :  { %1546 = vmatpush1.bf16.msra.mxu0 %v4173_v47  ;;  %3700 = vmatprep.subr.bf16.mxu1 %v4176_v23  ;;  %v1444_v47 = vrot.slane %v1439_v39, %v4931_v45 }
 0xaf9   :  { %1363 = vadd.xlane.f32.xlu1 %v1358_v26 }
 0xafd   :  { %1365 = vadd.xlane.f32.xlu1 %v1359_v27 }
 0xb84   :  { %v1362_v5 = vpop.xlane.xlu0 %1361 }
 0xb85   :  { %v1369_v34 = vmul.f32 0.0078125, %v1362_v5  ;;  %v4185_v5 = vld [vmem:[#allocation16 + $0x20] sm:$0xff]  }
 0xb86   :  { %v1364_v35 = vpop.xlane.xlu1 %1363 }
 0xb87   :  { %v1373_v60 = vsub.f32 %v1357_v24, %v1369_v34  ;;  %v1370_v36 = vmul.f32 0.0078125, %v1364_v35  ;;  %v4177_v24 = vld [vmem:[#allocation16] sm:$0xff]   ;;  %v4186_v34 = vld [vmem:[#allocation16 + $0x68] sm:$0xff]  }
 0xb88   :  { %3701 = vmatpush3.bf16.msra.mxu1 %v4177_v24  ;;  %v4187_v35 = vld [vmem:[#allocation16 + $0x28] sm:$0xff]  }
 0xb89   :  { %v1374_v37 = vsub.f32 %v1358_v26, %v1370_v36  ;;  %v1377_v38 = vmul.f32 %v1373_v60, %v1373_v60  ;;  %v4179_v26 = vld [vmem:[#allocation16 + $0x8] sm:$0xff]   ;;  %3702 = vmatprep.subr.bf16.mxu1 %v4178_v25  ;;  %v4189_v36 = vld [vmem:[#allocation16 + $0x30] sm:$0xff]  }
 0xb8a   :  { %v1366_v49 = vpop.xlane.xlu1 %1365 }
 0xb8b   :  { %v1371_v40 = vmul.f32 0.0078125, %v1366_v49  ;;  %1381 = vadd.xlane.f32.xlu0 %v1377_v38  ;;  %v1378_v43 = vmul.f32 %v1374_v37, %v1374_v37  ;;  %v4191_v38 = vld [vmem:[#allocation16 + $0x38] sm:$0xff]  }
 0xb8c   :  { %3703 = vmatpush3.bf16.msra.mxu1 %v4179_v26 }
 0xb8d   :  { %v5122_v12 = vsub.f32 %v1359_v27, %v1371_v40  ;;  %v4180_v27 = vld [vmem:[#allocation16 + $0x50] sm:$0xff]  }
 0xb8e   :  { %3704 = vmatprep.subr.bf16.mxu1 %v4180_v27 }
 0xb8f   :  { %1383 = vadd.xlane.f32.xlu0 %v1378_v43  ;;  %v1379_v44 = vmul.f32 %v5122_v12, %v5122_v12 }
 0xb90   :  { %3705 = vmatpush3.bf16.msra.mxu1 %v4181_v28 }
 0xb91   :  { %1385 = vadd.xlane.f32.xlu1 %v1379_v44  ;;  %3706 = vmatprep.subr.bf16.mxu1 %v4182_v29 }
 0xb93   :  { %1367 = vadd.xlane.f32.xlu0 %v1360_v30 }
 0xb94   :  { %3707 = vmatpush3.bf16.msra.mxu1 %v4183_v32 }
 0xb95   :  { %3708 = vmatprep.subr.bf16.mxu1 %v4184_v33 }
 0xb98   :  { %3709 = vmatpush3.bf16.msra.mxu1 %v4185_v5 }
 0xb99   :  { %3710 = vmatprep.subr.bf16.mxu1 %v4186_v34 }
 0xb9c   :  { %3711 = vmatpush3.bf16.msra.mxu1 %v4187_v35 }
 0xc18   :  { %v1382_v61 = vpop.xlane.xlu0 %1381 }
 0xc19   :  { %v1389_v63 = vmul.f32 0.0078125, %v1382_v61  ;;  %v1448_v61 = vrot.slane %v1439_v39, %v4991_v18 }
 0xc1b   :  { %v1393_v1 = vadd.f32 1e-12, %v1389_v63 }
 0xc1c   :  { %v1384_v2 = vpop.xlane.xlu0 %1383 }
 0xc1d   :  { %4320 = vrsqrt.f32 %v1393_v1  ;;  %v1390_v3 = vmul.f32 0.0078125, %v1384_v2 }
 0xc1e   :  { %v1386_v49 = vpop.xlane.xlu1 %1385 }
 0xc1f   :  { %v1394_v7 = vadd.f32 1e-12, %v1390_v3  ;;  %v1391_v40 = vmul.f32 0.0078125, %v1386_v49 }
 0xc20   :  { %v1368_v9 = vpop.xlane.xlu0 %1367 }
 0xc21   :  { %4322 = vrsqrt.f32 %v1394_v7  ;;  %v1372_v10 = vmul.f32 0.0078125, %v1368_v9  ;;  %v1395_v43 = vadd.f32 1e-12, %v1391_v40 }
 0xc23   :  { %v1376_v11 = vsub.f32 %v1360_v30, %v1372_v10  ;;  %4324 = vrsqrt.f32 %v1395_v43 }
 0xc25   :  { %v1380_v13 = vmul.f32 %v1376_v11, %v1376_v11 }
 0xc27   :  { %v4321_v14 = vpop.eup %4320  ;;  %1387 = vadd.xlane.f32.xlu0 %v1380_v13 }
 0xc28   :  { %v1401_v15 = vmul.f32 %v4321_v14, %v1373_v60  ;;  %v4188_v60 = vld [vmem:[#allocation16 + $0x70] sm:$0xff]  }
 0xc29   :  { %3712 = vmatprep.subr.bf16.mxu1 %v4188_v60 }
 0xc2a   :  { %v1409_v53 = vmul.f32 %v1408_v16, %v1401_v15  ;;  %3713 = vmatpush3.bf16.msra.mxu1 %v4189_v36 }
 0xc2b   :  { %v4323_v17 = vpop.eup %4322 }
 0xc2c   :  { %v1402_v51 = vmul.f32 %v4323_v17, %v1374_v37  ;;  %v5131_v62 = vadd.f32 %v1416_v20, %v1409_v53  ;;  %v4190_v37 = vld [vmem:[#allocation16 + $0x78] sm:$0xff]  }
 0xc2d   :  { %3714 = vmatprep.subr.bf16.mxu1 %v4190_v37  ;;  %v4325_v46 = vpop.eup %4324 }
 0xc2e   :  { %v1410_v21 = vmul.f32 %v1408_v16, %v1402_v51  ;;  %3715 = vmatpush3.bf16.msra.mxu1 %v4191_v38  ;;  %v1403_v48 = vmul.f32 %v4325_v46, %v5122_v12 }
 0xc30   :  { %v5133_v6 = vadd.f32 %v1416_v20, %v1410_v21  ;;  %v1411_v55 = vmul.f32 %v1408_v16, %v1403_v48 }
 0xc32   :  { %v1421_v22 = vpack.c.bf16 %v5133_v6, %v5131_v62  ;;  %v5139_v57 = vadd.f32 %v1416_v20, %v1411_v55 }
 0xc34   :  { %1564 = vmatmul.mubr.bf16.vlgmr.msra.gmra.mrb[20].mxu0 %v1421_v22 }
 0xc35   :  { %1573 = vmatprep.mubr.bf16.mxu0 %v4691_v0 }
 0xcb4   :  { %v1388_v44 = vpop.xlane.xlu0 %1387 }
 0xcb5   :  { %v1392_v30 = vmul.f32 0.0078125, %v1388_v44 }
 0xcb7   :  { %v1396_v31 = vadd.f32 1e-12, %v1392_v30 }
 0xcb9   :  { %4326 = vrsqrt.f32 %v1396_v31 }
 0xcc3   :  { %v4327_v50 = vpop.eup %4326 }
 0xcc4   :  { %v1404_v52 = vmul.f32 %v4327_v50, %v1376_v11 }
 0xcc6   :  { %v1412_v56 = vmul.f32 %v1408_v16, %v1404_v52 }
 0xcc8   :  { %v5141_v58 = vadd.f32 %v1416_v20, %v1412_v56 }
 0xcca   :  { %v1422_v59 = vpack.c.bf16 %v5141_v58, %v5139_v57 }
 0xccc   :  { %1574 = vmatmul.mubr.bf16.gmra.mrb[24].mxu0 %v1422_v59 }
 0xccd   :  { %2110 = vmatprep.mubr.bf16.mxu0 %v4691_v0 }
 0xd07   :  { %v1565_v12 = vpop.f32.mrb[20].mxu0 }
 0xd08   :  { %v1566_v63 = vadd.f32 %v1565_v12, %v1444_v47  ;;  %v1567_v1 = vpop.f32.mrb[21].mxu0 }
 0xd09   :  { %v1568_v2 = vadd.f32 %v1567_v1, %v1448_v61  ;;  %v1569_v3 = vpop.f32.mrb[22].mxu0 }
 0xd0a   :  { %v1592_v7 = vmul.f32 0.70710677, %v1566_v63  ;;  %v1570_v9 = vadd.f32 %v1569_v3, %v1444_v47  ;;  %v1571_v10 = vpop.f32.mrb[23].mxu0  ;;  %v1584_v22 = vmul.f32 0.5, %v1566_v63 }
 0xd0b   :  { %v1593_v11 = vmul.f32 0.70710677, %v1568_v2  ;;  %v1572_v13 = vadd.f32 %v1571_v10, %v1448_v61  ;;  %v1585_v25 = vmul.f32 0.5, %v1568_v2 }
 0xd0c   :  { %4328 = verf.f32 %v1592_v7  ;;  %v1594_v14 = vmul.f32 0.70710677, %v1570_v9  ;;  %v1586_v23 = vmul.f32 0.5, %v1570_v9 }
 0xd0d   :  { %4330 = verf.f32 %v1593_v11  ;;  %v1595_v15 = vmul.f32 0.70710677, %v1572_v13  ;;  %v1587_v26 = vmul.f32 0.5, %v1572_v13  ;;  %v1662_v13 = vsub.s32 3, %v4928_v42 }
 0xd0e   :  { %4332 = verf.f32 %v1594_v14 }
 0xd0f   :  { %4334 = verf.f32 %v1595_v15  ;;  %v1663_v15 = vrot.slane %v5115_v19, %v1662_v13 }
 0xd16   :  { %v4329_v16 = vpop.eup %4328 }
 0xd17   :  { %v4331_v17 = vpop.eup %4330  ;;  %v1608_v51 = vadd.f32 1.0, %v4329_v16 }
 0xd18   :  { %v4333_v53 = vpop.eup %4332  ;;  %v1609_v20 = vadd.f32 1.0, %v4331_v17 }
 0xd19   :  { %v4335_v21 = vpop.eup %4334  ;;  %v1610_v24 = vadd.f32 1.0, %v4333_v53  ;;  %v1616_v28 = vmul.f32 %v1608_v51, %v1584_v22 }
 0xd1a   :  { %v1611_v27 = vadd.f32 1.0, %v4335_v21  ;;  %v1617_v32 = vmul.f32 %v1609_v20, %v1585_v25  ;;  %v4192_v25 = vld [vmem:[#allocation10 + $0xc0] ss:$12 sps:$4 sm:$0xff]  }
 0xd1b   :  { %v1618_v29 = vmul.f32 %v1610_v24, %v1586_v23 }
 0xd1c   :  { %v1619_v33 = vmul.f32 %v1611_v27, %v1587_v26  ;;  %v4194_v26 = vld [vmem:[#allocation10 + $0xc4] ss:$12 sps:$4 sm:$0xff]   ;;  %v4197_v27 = vld [vmem:[#allocation10 + $0xdc] ss:$12 sps:$4 sm:$0xff]  }
 0xd1d   :  { %v1624_v5 = vpack.c.bf16 %v1618_v29, %v1616_v28  ;;  %2078 = vmatprep.subr.bf16.mxu0 %v4194_v26  ;;  %v4195_v28 = vld [vmem:[#allocation10 + $0xd8] ss:$12 sps:$4 sm:$0xff]  }
 0xd1e   :  { %v1625_v34 = vpack.c.bf16 %v1619_v33, %v1617_v32  ;;  %2079 = vmatpush1.bf16.msra.mxu0 %v4192_v25 }
 0xd1f   :  { %2080 = vmatprep.subr.bf16.mxu0 %v4197_v27 }
 0xd20   :  { %1792 = vmatprep.mubr.bf16.mxu1 %v1625_v34 }
 0xd21   :  { %1793 = vmatmul.mubr.bf16.vlgmr.msra.gmra.mrb[32].mxu1 %v1624_v5 }
 0xd22   :  { %2081 = vmatpush1.bf16.msra.mxu0 %v4195_v28 }
 0xd9f   :  { %v1575_v35 = vpop.f32.mrb[24].mxu0 }
 0xda0   :  { %v1576_v60 = vadd.f32 %v1575_v35, %v1444_v47  ;;  %v1577_v36 = vpop.f32.mrb[25].mxu0 }
 0xda1   :  { %v1578_v37 = vadd.f32 %v1577_v36, %v1448_v61  ;;  %v1579_v38 = vpop.f32.mrb[26].mxu0 }
 0xda2   :  { %v1596_v49 = vmul.f32 0.70710677, %v1576_v60  ;;  %v1580_v40 = vadd.f32 %v1579_v38, %v1444_v47  ;;  %v1581_v43 = vpop.f32.mrb[27].mxu0  ;;  %v1588_v39 = vmul.f32 0.5, %v1576_v60 }
 0xda3   :  { %v1597_v44 = vmul.f32 0.70710677, %v1578_v37  ;;  %v1582_v30 = vadd.f32 %v1581_v43, %v1448_v61  ;;  %v1589_v1 = vmul.f32 0.5, %v1578_v37 }
 0xda4   :  { %4336 = verf.f32 %v1596_v49  ;;  %v1598_v31 = vmul.f32 0.70710677, %v1580_v40  ;;  %v1590_v12 = vmul.f32 0.5, %v1580_v40 }
 0xda5   :  { %4338 = verf.f32 %v1597_v44  ;;  %v1599_v46 = vmul.f32 0.70710677, %v1582_v30  ;;  %v1591_v47 = vmul.f32 0.5, %v1582_v30 }
 0xda6   :  { %4340 = verf.f32 %v1598_v31 }
 0xda7   :  { %4342 = verf.f32 %v1599_v46  ;;  %v4200_v46 = vld [vmem:[#allocation10 + $0xf4] ss:$12 sps:$4 sm:$0xff]  }
 0xda8   :  { %2082 = vmatprep.subr.bf16.mxu0 %v4200_v46 }
 0xdae   :  { %v4337_v48 = vpop.eup %4336 }
 0xdaf   :  { %v4339_v50 = vpop.eup %4338  ;;  %v1612_v52 = vadd.f32 1.0, %v4337_v48  ;;  %v4198_v48 = vld [vmem:[#allocation10 + $0xf0] ss:$12 sps:$4 sm:$0xff]  }
 0xdb0   :  { %v4341_v55 = vpop.eup %4340  ;;  %v1613_v56 = vadd.f32 1.0, %v4339_v50  ;;  %2083 = vmatpush1.bf16.msra.mxu0 %v4198_v48  ;;  %v4203_v50 = vld [vmem:[#allocation10 + $0x10c] ss:$12 sps:$4 sm:$0xff]  }
 0xdb1   :  { %v4343_v59 = vpop.eup %4342  ;;  %v1614_v63 = vadd.f32 1.0, %v4341_v55  ;;  %v1620_v3 = vmul.f32 %v1612_v52, %v1588_v39  ;;  %v4201_v52 = vld [vmem:[#allocation10 + $0x108] ss:$12 sps:$4 sm:$0xff]   ;;  %2084 = vmatprep.subr.bf16.mxu0 %v4203_v50  ;;  %v4206_v55 = vld [vmem:[#allocation10 + $0x124] ss:$12 sps:$4 sm:$0xff]  }
 0xdb2   :  { %v1615_v2 = vadd.f32 1.0, %v4343_v59  ;;  %v1621_v7 = vmul.f32 %v1613_v56, %v1589_v1  ;;  %v4204_v56 = vld [vmem:[#allocation10 + $0x120] ss:$12 sps:$4 sm:$0xff]   ;;  %v4209_v59 = vld [vmem:[#allocation10 + $0x13c] ss:$12 sps:$4 sm:$0xff]  }
 0xdb3   :  { %v1622_v61 = vmul.f32 %v1614_v63, %v1590_v12  ;;  %v4207_v39 = vld [vmem:[#allocation10 + $0x138] ss:$12 sps:$4 sm:$0xff]   ;;  %v4210_v12 = vld [vmem:[#allocation10 + $0x150] ss:$12 sps:$4 sm:$0xff]   ;;  %v4216_v1 = vld [vmem:[#allocation10 + $0xc8] ss:$12 sps:$4 sm:$0xff]  }
 0xdb4   :  { %v1623_v9 = vmul.f32 %v1615_v2, %v1591_v47  ;;  %2085 = vmatpush1.bf16.msra.mxu0 %v4201_v52  ;;  %v4215_v63 = vld [vmem:[#allocation10 + $0x16c] ss:$12 sps:$4 sm:$0xff]   ;;  %3927 = vmatprep.subr.bf16.mxu1 %v4216_v1 }
 0xdb5   :  { %v1626_v10 = vpack.c.bf16 %v1622_v61, %v1620_v3  ;;  %2086 = vmatprep.subr.bf16.mxu0 %v4206_v55  ;;  %v4217_v47 = vld [vmem:[#allocation10 + $0xe0] ss:$12 sps:$4 sm:$0xff]   ;;  %3928 = vmatpush3.bf16.msra.mxu1 %v4216_v1 }
 0xdb6   :  { %v1627_v11 = vpack.c.bf16 %v1623_v9, %v1621_v7  ;;  %3929 = vmatprep.subr.bf16.mxu1 %v4217_v47 }
 0xdb8   :  { %1800 = vmatprep.mubr.bf16.mxu1 %v1627_v11  ;;  %2087 = vmatpush1.bf16.msra.mxu0 %v4204_v56 }
 0xdb9   :  { %1801 = vmatmul.mubr.bf16.gmra.mrb[36].mxu1 %v1626_v10  ;;  %2088 = vmatprep.subr.bf16.mxu0 %v4209_v59 }
 0xdba   :  { %3930 = vmatpush3.bf16.msra.mxu1 %v4217_v47 }
 0xdbc   :  { %2089 = vmatpush1.bf16.msra.mxu0 %v4207_v39  ;;  %v3562_v39 = vld [vmem:[%s5419_s8 + $0x3] sm:$0x7] }
 0xdf4   :  { %v3716_v14 = vpop.f32.mrb[32].mxu1 }
 0xdf5   :  { %v3717_v16 = vpop.f32.mrb[33].mxu1 }
 0xdf6   :  { %v3718_v17 = vadd.f32 %v3717_v16, %v3716_v14  ;;  %v3719_v51 = vpop.f32.mrb[34].mxu1 }
 0xdf7   :  { %v3720_v53 = vpop.f32.mrb[35].mxu1 }
 0xdf8   :  { %v1795_v20 = vadd.f32 %v3718_v17, %v1663_v15  ;;  %v3721_v21 = vadd.f32 %v3720_v53, %v3719_v51 }
 0xdfa   :  { %v1798_v22 = vadd.f32 %v3721_v21, %v1663_v15  ;;  %v1809_v23 = vadd.f32 %v1795_v20, %v5131_v62  ;;  %v1859_v20 = vsub.s32 4, %v4928_v42 }
 0xdfc   :  { %1813 = vadd.xlane.f32.xlu1 %v1809_v23  ;;  %v1810_v24 = vadd.f32 %v1798_v22, %v5133_v6  ;;  %v1867_v22 = vsub.s32 5, %v4928_v42 }
 0xdfe   :  { %1815 = vadd.xlane.f32.xlu0 %v1810_v24  ;;  %v1868_v26 = vrot.slane %v5115_v19, %v1867_v22 }
 0xe89   :  { %v1814_v29 = vpop.xlane.xlu1 %1813 }
 0xe8a   :  { %v1821_v32 = vmul.f32 0.0078125, %v1814_v29 }
 0xe8b   :  { %v1816_v33 = vpop.xlane.xlu0 %1815 }
 0xe8c   :  { %v5154_v5 = vsub.f32 %v1809_v23, %v1821_v32  ;;  %v1822_v34 = vmul.f32 0.0078125, %v1816_v33  ;;  %v3722_v35 = vpop.f32.mrb[36].mxu1  ;;  %v1860_v23 = vrot.slane %v5115_v19, %v1859_v20  ;;  %v4219_v19 = vld [vmem:[#allocation10 + $0x110] ss:$12 sps:$4 sm:$0xff]  }
 0xe8d   :  { %v3723_v62 = vpop.f32.mrb[37].mxu1 }
 0xe8e   :  { %v5156_v60 = vsub.f32 %v1810_v24, %v1822_v34  ;;  %v3724_v6 = vadd.f32 %v3723_v62, %v3722_v35  ;;  %v3725_v36 = vpop.f32.mrb[38].mxu1  ;;  %v1829_v37 = vmul.f32 %v5154_v5, %v5154_v5  ;;  %v4218_v35 = vld [vmem:[#allocation10 + $0xf8] ss:$12 sps:$4 sm:$0xff]   ;;  %v4220_v62 = vld [vmem:[#allocation10 + $0x128] ss:$12 sps:$4 sm:$0xff]  }
 0xe8f   :  { %v3726_v38 = vpop.f32.mrb[39].mxu1  ;;  %3931 = vmatprep.subr.bf16.mxu1 %v4218_v35 }
 0xe90   :  { %v1803_v49 = vadd.f32 %v3724_v6, %v1663_v15  ;;  %v3727_v40 = vadd.f32 %v3726_v38, %v3725_v36  ;;  %1833 = vadd.xlane.f32.xlu1 %v1829_v37  ;;  %v1830_v43 = vmul.f32 %v5156_v60, %v5156_v60  ;;  %3932 = vmatpush3.bf16.msra.mxu1 %v4218_v35  ;;  %v4222_v6 = vld [vmem:[#allocation10 + $0x158] ss:$12 sps:$4 sm:$0xff]   ;;  %v4223_v36 = vld [vmem:[#allocation10 + $0x170] ss:$12 sps:$4 sm:$0xff]  }
 0xe91   :  { %3933 = vmatprep.subr.bf16.mxu1 %v4219_v19 }
 0xe92   :  { %v1806_v44 = vadd.f32 %v3727_v40, %v1663_v15  ;;  %1835 = vadd.xlane.f32.xlu0 %v1830_v43  ;;  %v1811_v30 = vadd.f32 %v1803_v49, %v5139_v57  ;;  %v4212_v57 = vld [vmem:[#allocation10 + $0x154] ss:$12 sps:$4 sm:$0xff]  }
 0xe93   :  { %2090 = vmatprep.subr.bf16.mxu0 %v4212_v57  ;;  %v1938_v57 = vrot.slane %v3562_v39, %v4931_v45 }
 0xe94   :  { %1817 = vadd.xlane.f32.xlu1 %v1811_v30  ;;  %v1812_v31 = vadd.f32 %v1806_v44, %v5141_v58  ;;  %2091 = vmatpush1.bf16.msra.mxu0 %v4210_v12  ;;  %v4213_v58 = vld [vmem:[#allocation10 + $0x168] ss:$12 sps:$4 sm:$0xff]  }
 0xe95   :  { %2092 = vmatprep.subr.bf16.mxu0 %v4215_v63  ;;  %3934 = vmatpush3.bf16.msra.mxu1 %v4219_v19 }
 0xe96   :  { %1819 = vadd.xlane.f32.xlu0 %v1812_v31  ;;  %3935 = vmatprep.subr.bf16.mxu1 %v4220_v62 }
 0xe98   :  { %2093 = vmatpush1.bf16.msra.mxu0 %v4213_v58  ;;  %v1942_v58 = vrot.slane %v3562_v39, %v4991_v18 }
 0xe99   :  { %3947 = vmatprep.subr.bf16.mxu0 %v4693_v54  ;;  %3936 = vmatpush3.bf16.msra.mxu1 %v4220_v62 }
 0xf1d   :  { %v1834_v2 = vpop.xlane.xlu1 %1833 }
 0xf1e   :  { %v1841_v3 = vmul.f32 0.0078125, %v1834_v2 }
 0xf1f   :  { %v1836_v61 = vpop.xlane.xlu0 %1835 }
 0xf20   :  { %v1845_v7 = vadd.f32 1e-12, %v1841_v3  ;;  %v1842_v9 = vmul.f32 0.0078125, %v1836_v61 }
 0xf21   :  { %v1818_v10 = vpop.xlane.xlu1 %1817 }
 0xf22   :  { %4344 = vrsqrt.f32 %v1845_v7  ;;  %v1846_v11 = vadd.f32 1e-12, %v1842_v9  ;;  %v1823_v14 = vmul.f32 0.0078125, %v1818_v10 }
 0xf23   :  { %v1820_v15 = vpop.xlane.xlu0 %1819 }
 0xf24   :  { %4346 = vrsqrt.f32 %v1846_v11  ;;  %v1827_v16 = vsub.f32 %v1811_v30, %v1823_v14  ;;  %v1824_v17 = vmul.f32 0.0078125, %v1820_v15  ;;  %v1946_v14 = vrot.slane %v3562_v39, %v5021_v41 }
 0xf26   :  { %v1828_v51 = vsub.f32 %v1812_v31, %v1824_v17  ;;  %v1831_v53 = vmul.f32 %v1827_v16, %v1827_v16 }
 0xf28   :  { %1837 = vadd.xlane.f32.xlu1 %v1831_v53  ;;  %v1832_v21 = vmul.f32 %v1828_v51, %v1828_v51 }
 0xf2a   :  { %1839 = vadd.xlane.f32.xlu0 %v1832_v21 }
 0xf2c   :  { %v4345_v24 = vpop.eup %4344 }
 0xf2d   :  { %v1853_v25 = vmul.f32 %v4345_v24, %v5154_v5 }
 0xf2e   :  { %v4347_v27 = vpop.eup %4346 }
 0xf2f   :  { %v1861_v28 = vmul.f32 %v1860_v23, %v1853_v25  ;;  %v1854_v29 = vmul.f32 %v4347_v27, %v5156_v60  ;;  %v4221_v60 = vld [vmem:[#allocation10 + $0x140] ss:$12 sps:$4 sm:$0xff]  }
 0xf30   :  { %3937 = vmatprep.subr.bf16.mxu1 %v4221_v60 }
 0xf31   :  { %v1862_v32 = vmul.f32 %v1860_v23, %v1854_v29  ;;  %v5175_v33 = vadd.f32 %v1868_v26, %v1861_v28  ;;  %3938 = vmatpush3.bf16.msra.mxu1 %v4221_v60 }
 0xf32   :  { %3939 = vmatprep.subr.bf16.mxu1 %v4222_v6 }
 0xf33   :  { %v5177_v34 = vadd.f32 %v1868_v26, %v1862_v32  ;;  %1874 = vst [vmem:[#allocation17 + $0x20] sm:$0xff] %v5175_v33 }
 0xf35   :  { %1875 = vst [vmem:[#allocation17 + $0x28] sm:$0xff] %v5177_v34  ;;  %v1930_v5 = vpack.c.bf16 %v5177_v34, %v5175_v33  ;;  %3940 = vmatpush3.bf16.msra.mxu1 %v4222_v6 }
 0xf36   :  { %3941 = vmatprep.subr.bf16.mxu1 %v4223_v36 }
 0xf37   :  { %2111 = vmatmul.mubr.bf16.vlgmr.msra.gmra.mrb[28].mxu0 %v1930_v5  ;;  %3943 = vmatprep.mubr.bf16.mxu1 %v1930_v5 }
 0xf38   :  { %2120 = vmatprep.mubr.bf16.mxu0 %v4691_v0 }
 0xf39   :  { %3942 = vmatpush3.bf16.msra.mxu1 %v4223_v36 }
 0xf3a   :  { %3965 = vmatprep.subr.bf16.mxu1 %v4693_v54 }
 0xfb5   :  { %v1838_v37 = vpop.xlane.xlu1 %1837 }
 0xfb6   :  { %v1843_v38 = vmul.f32 0.0078125, %v1838_v37 }
 0xfb7   :  { %v1840_v49 = vpop.xlane.xlu0 %1839 }
 0xfb8   :  { %v1847_v40 = vadd.f32 1e-12, %v1843_v38  ;;  %v1844_v43 = vmul.f32 0.0078125, %v1840_v49 }
 0xfba   :  { %4348 = vrsqrt.f32 %v1847_v40  ;;  %v1848_v44 = vadd.f32 1e-12, %v1844_v43 }
 0xfbc   :  { %4350 = vrsqrt.f32 %v1848_v44 }
 0xfc4   :  { %v4349_v30 = vpop.eup %4348 }
 0xfc5   :  { %v1855_v31 = vmul.f32 %v4349_v30, %v1827_v16 }
 0xfc6   :  { %v4351_v46 = vpop.eup %4350 }
 0xfc7   :  { %v1856_v48 = vmul.f32 %v4351_v46, %v1828_v51  ;;  %v1863_v50 = vmul.f32 %v1860_v23, %v1855_v31 }
 0xfc9   :  { %v1864_v52 = vmul.f32 %v1860_v23, %v1856_v48  ;;  %v5185_v55 = vadd.f32 %v1868_v26, %v1863_v50 }
 0xfcb   :  { %v5187_v56 = vadd.f32 %v1868_v26, %v1864_v52  ;;  %1876 = vst [vmem:[#allocation17 + $0x30] sm:$0xff] %v5185_v55 }
 0xfcd   :  { %1877 = vst [vmem:[#allocation17 + $0x38] sm:$0xff] %v5187_v56  ;;  %v1931_v59 = vpack.c.bf16 %v5187_v56, %v5185_v55 }
 0xfcf   :  { %2121 = vmatmul.mubr.bf16.gmra.mrb[32].mxu0 %v1931_v59  ;;  %3944 = vmatmul.mubr.bf16.vlgmr.msra.gmra.mrb[40].mxu1 %v1931_v59 }
 0xfd0   :  { %3949 = vmatprep.mubr.msk.bf16.mxu0 %vm4694_vm5, %v4693_v54  ;;  %3967 = vmatprep.mubr.msk.bf16.mxu1 %vm4694_vm5, %v4693_v54 }
0x100a   :  { %v2112_v12 = vpop.f32.mrb[28].mxu0 }
0x100b   :  { %v2114_v63 = vpop.f32.mrb[29].mxu0  ;;  %v2113_v47 = vadd.f32 %v2112_v12, %v1938_v57 }
0x100c   :  { %v2116_v1 = vpop.f32.mrb[30].mxu0  ;;  %v2115_v61 = vadd.f32 %v2114_v63, %v1942_v58 }
0x100d   :  { %v2117_v2 = vadd.f32 %v2116_v1, %v1938_v57  ;;  %v2118_v3 = vpop.f32.mrb[31].mxu0 }
0x100e   :  { %v2119_v7 = vadd.f32 %v2118_v3, %v1942_v58 }
0x100f   :  { %v2180_v9 = vpack.c.bf16 %v2117_v2, %v2113_v47 }
0x1010   :  { %v2181_v10 = vpack.c.bf16 %v2119_v7, %v2115_v61 }
0x1012   :  { %v2187_v11 = vsel %vm729_vm4, %v2181_v10, 0 }
0x1013   :  { %3948 = vmatpush3.bf16.xpose.msra.mxu0 %v2187_v11 }
0x1014   :  { %3953 = vmatprep.subr.bf16.mxu0 %v4693_v54 }
0x101a   :  { %3950 = vmatmul.mubr.msk.bf16.vlgmr.msra.gmra.mrb[36].mxu0 %vm729_vm4, %v2180_v9 }
0x101b   :  { %3955 = vmatprep.mubr.msk.bf16.mxu0 %vm4694_vm5, %v4693_v54 }
0x10a2   :  { %v2122_v15 = vpop.f32.mrb[32].mxu0  ;;  %v3945_v16 = vpop.f32.mrb[40].mxu1 }
0x10a3   :  { %v2174_v17 = vadd.f32 %v3945_v16, %v1946_v14  ;;  %v2124_v51 = vpop.f32.mrb[33].mxu0  ;;  %v2165_v53 = vpop.f32.mrb[41].mxu1  ;;  %v2123_v24 = vadd.f32 %v2122_v15, %v1938_v57 }
0x10a4   :  { %v2126_v21 = vpop.f32.mrb[34].mxu0  ;;  %v3946_v23 = vpop.f32.mrb[42].mxu1  ;;  %v2125_v29 = vadd.f32 %v2124_v51, %v1942_v58  ;;  %v2166_v32 = vadd.f32 %v2165_v53, %v1946_v14 }
0x10a5   :  { %v2127_v25 = vadd.f32 %v2126_v21, %v1938_v57  ;;  %v2177_v26 = vadd.f32 %v3946_v23, %v1946_v14  ;;  %v2128_v27 = vpop.f32.mrb[35].mxu0  ;;  %v2168_v28 = vpop.f32.mrb[43].mxu1 }
0x10a6   :  { %v2129_v5 = vadd.f32 %v2128_v27, %v1942_v58  ;;  %v2169_v35 = vadd.f32 %v2168_v28, %v1946_v14 }
0x10a7   :  { %v2439_v19 = vpack.c.bf16 %v2127_v25, %v2123_v24  ;;  %v5208_v62 = vpack.c.bf16 %v2177_v26, %v2174_v17 }
0x10a8   :  { %v5210_v60 = vpack.c.bf16 %v2169_v35, %v2166_v32  ;;  %v2440_v6 = vpack.c.bf16 %v2129_v5, %v2125_v29 }
0x10aa   :  { %3954 = vmatpush3.bf16.msra.mxu0 %v5210_v60 }
0x10ab   :  { %3959 = vmatprep.subr.bf16.mxu0 %v4693_v54 }
0x10ed   :  { %v2223_v36 = vpop.f32.mrb[36].mxu0 }
0x10ee   :  { %v2230_v37 = vmul.f32 0.125, %v2223_v36  ;;  %v3951_v38 = vpop.f32.mrb[37].mxu0 }
0x10ef   :  { %v2226_v49 = vpop.f32.mrb[38].mxu0 }
0x10f0   :  { %v2231_v40 = vmul.f32 0.125, %v2226_v49  ;;  %v3952_v43 = vpop.f32.mrb[39].mxu0  ;;  %v2232_v44 = vadd.f32 %v2230_v37, %v5032_v8 }
0x10f2   :  { %v2234_v30 = vsel %vm785_vm6, %v2232_v44, -inf  ;;  %v2233_v31 = vadd.f32 %v2231_v40, %v5032_v8 }
0x10f3   :  { %2235 = vmax.xlane.f32.xlu1 %v2234_v30 }
0x10f4   :  { %v2237_v46 = vsel %vm785_vm6, %v2233_v31, -inf }
0x10f5   :  { %2238 = vmax.xlane.f32.xlu0 %v2237_v46 }
0x1180   :  { %v2236_v48 = vpop.xlane.xlu1 %2235 }
0x1181   :  { %v2240_v50 = vsub.f32 %v2232_v44, %v2236_v48 }
0x1182   :  { %v2239_v52 = vpop.xlane.xlu0 %2238 }
0x1183   :  { %v2242_v59 = vmul.f32 1.442695, %v2240_v50  ;;  %v2241_v39 = vsub.f32 %v2233_v31, %v2239_v52 }
0x1185   :  { %4352 = vpow2.f32 %v2242_v59  ;;  %v2244_v57 = vmul.f32 1.442695, %v2241_v39 }
0x1187   :  { %4354 = vpow2.f32 %v2244_v57 }
0x118f   :  { %v4353_v12 = vpop.eup %4352 }
0x1190   :  { %v2246_v58 = vsel %vm785_vm6, %v4353_v12, 0.0 }
0x1191   :  { %v4355_v63 = vpop.eup %4354  ;;  %2247 = vadd.xlane.f32.xlu1 %v2246_v58 }
0x1192   :  { %v2249_v1 = vsel %vm785_vm6, %v4355_v63, 0.0 }
0x1193   :  { %2250 = vadd.xlane.f32.xlu0 %v2249_v1 }
0x11a2   :  { %2305 = vrot.lane.b32.xlu1 %v2181_v10, %s5437_s10  ;;  %v2446_v10 = vsel %vm729_vm4, %v2440_v6, 0 }
0x11a6   :  { %2564 = vrot.lane.b32.xlu1 %v2440_v6, %s5437_s10 }
0x11a9   :  { %2302 = vrot.lane.b32.xlu0 %v2180_v9, %s5437_s10 }
0x11aa   :  { %2561 = vrot.lane.b32.xlu1 %v2439_v19, %s5437_s10 }
0x121e   :  { %v2248_v47 = vpop.xlane.xlu1 %2247 }
0x121f   :  { %4356 = vrcp.f32 %v2248_v47 }
0x1220   :  { %v2251_v2 = vpop.xlane.xlu0 %2250 }
0x1221   :  { %4358 = vrcp.f32 %v2251_v2 }
0x1222   :  { %v2306_v14 = vpop.permute.xlu1 %2305 }
0x1223   :  { %v2311_v16 = vsel %vm729_vm4, %v2306_v14, 0 }
0x1224   :  { %v2303_v9 = vpop.permute.xlu0 %2302 }
0x1226   :  { %v2565_v17 = vpop.permute.xlu1 %2564 }
0x1227   :  { %v2570_v51 = vsel %vm729_vm4, %v2565_v17, 0 }
0x1229   :  { %v4357_v3 = vpop.eup %4356 }
0x122a   :  { %v2254_v7 = vmul.f32 %v4357_v3, %v4353_v12  ;;  %v2562_v53 = vpop.permute.xlu1 %2561 }
0x122b   :  { %v4359_v61 = vpop.eup %4358 }
0x122c   :  { %v2255_v11 = vmul.f32 %v4359_v61, %v4355_v63 }
0x122e   :  { %v2256_v15 = vpack.c.bf16 %v2255_v11, %v2254_v7 }
0x1230   :  { %3956 = vmatmul.mubr.msk.bf16.vlgmr.msra.gmra.mrb[40].mxu0 %vm785_vm6, %v2256_v15 }
0x1231   :  { %3960 = vmatpush3.bf16.xpose.msra.mxu0 %v2311_v16  ;;  %3961 = vmatprep.mubr.msk.bf16.mxu0 %vm4694_vm5, %v4693_v54 }
0x1232   :  { %3971 = vmatprep.subr.bf16.mxu0 %v4693_v54 }
0x1238   :  { %3962 = vmatmul.mubr.msk.bf16.vlgmr.msra.gmra.mrb[44].mxu0 %vm729_vm4, %v2303_v9 }
0x1239   :  { %3972 = vmatpush3.bf16.xpose.msra.mxu0 %v2446_v10  ;;  %3973 = vmatprep.mubr.msk.bf16.mxu0 %vm4694_vm5, %v4693_v54 }
0x123a   :  { %3983 = vmatprep.subr.bf16.mxu0 %v4693_v54 }
0x1240   :  { %3974 = vmatmul.mubr.msk.bf16.vlgmr.msra.gmra.mrb[48].mxu0 %vm729_vm4, %v2439_v19 }
0x1241   :  { %3984 = vmatpush3.bf16.xpose.msra.mxu0 %v2570_v51  ;;  %3985 = vmatprep.mubr.msk.bf16.mxu0 %vm4694_vm5, %v4693_v54 }
0x1248   :  { %3986 = vmatmul.mubr.msk.bf16.vlgmr.msra.gmra.mrb[52].mxu0 %vm729_vm4, %v2562_v53 }
0x1303   :  { %v5239_v21 = vpop.f32.mrb[40].mxu0 }
0x1304   :  { %v3957_v23 = vpop.f32.mrb[41].mxu0 }
0x1305   :  { %v5241_v24 = vpop.f32.mrb[42].mxu0 }
0x1306   :  { %v3958_v25 = vpop.f32.mrb[43].mxu0 }
0x130b   :  { %v2347_v26 = vpop.f32.mrb[44].mxu0 }
0x130c   :  { %v2354_v27 = vmul.f32 0.125, %v2347_v26  ;;  %v3963_v28 = vpop.f32.mrb[45].mxu0 }
0x130d   :  { %v2350_v29 = vpop.f32.mrb[46].mxu0 }
0x130e   :  { %v2355_v32 = vmul.f32 0.125, %v2350_v29  ;;  %v3964_v5 = vpop.f32.mrb[47].mxu0  ;;  %v2356_v35 = vadd.f32 %v2354_v27, %v5032_v8 }
0x1310   :  { %v2358_v19 = vsel %vm785_vm6, %v2356_v35, -inf  ;;  %v2357_v6 = vadd.f32 %v2355_v32, %v5032_v8 }
0x1311   :  { %2359 = vmax.xlane.f32.xlu0 %v2358_v19 }
0x1312   :  { %v2361_v36 = vsel %vm785_vm6, %v2357_v6, -inf }
0x1313   :  { %2362 = vmax.xlane.f32.xlu1 %v2361_v36  ;;  %v2482_v37 = vpop.f32.mrb[48].mxu0 }
0x1314   :  { %v2489_v38 = vmul.f32 0.125, %v2482_v37  ;;  %v3975_v49 = vpop.f32.mrb[49].mxu0 }
0x1315   :  { %v2485_v40 = vpop.f32.mrb[50].mxu0 }
0x1316   :  { %v2490_v43 = vmul.f32 0.125, %v2485_v40  ;;  %v3976_v44 = vpop.f32.mrb[51].mxu0  ;;  %v2491_v30 = vadd.f32 %v2489_v38, %v5073_v4 }
0x1318   :  { %v2493_v31 = vsel %vm785_vm6, %v2491_v30, -inf  ;;  %v2492_v46 = vadd.f32 %v2490_v43, %v5073_v4 }
0x1319   :  { %2494 = vmax.xlane.f32.xlu0 %v2493_v31 }
0x131a   :  { %v2496_v52 = vsel %vm785_vm6, %v2492_v46, -inf }
0x131b   :  { %v2606_v48 = vpop.f32.mrb[52].mxu0 }
0x131c   :  { %v2613_v50 = vmul.f32 0.125, %v2606_v48  ;;  %v3987_v8 = vpop.f32.mrb[53].mxu0 }
0x131d   :  { %2497 = vmax.xlane.f32.xlu0 %v2496_v52  ;;  %v2609_v59 = vpop.f32.mrb[54].mxu0 }
0x131e   :  { %v2614_v39 = vmul.f32 0.125, %v2609_v59  ;;  %v3988_v57 = vpop.f32.mrb[55].mxu0  ;;  %v2615_v12 = vadd.f32 %v2613_v50, %v5073_v4 }
0x1320   :  { %v2617_v58 = vsel %vm785_vm6, %v2615_v12, -inf  ;;  %v2616_v63 = vadd.f32 %v2614_v39, %v5073_v4 }
0x1321   :  { %2618 = vmax.xlane.f32.xlu1 %v2617_v58 }
0x1322   :  { %v2620_v1 = vsel %vm785_vm6, %v2616_v63, -inf }
0x1323   :  { %2621 = vmax.xlane.f32.xlu0 %v2620_v1 }
0x139e   :  { %v2360_v47 = vpop.xlane.xlu0 %2359 }
0x139f   :  { %v2364_v2 = vsub.f32 %v2356_v35, %v2360_v47 }
0x13a0   :  { %v2363_v3 = vpop.xlane.xlu1 %2362 }
0x13a1   :  { %v2366_v61 = vmul.f32 1.442695, %v2364_v2  ;;  %v2365_v7 = vsub.f32 %v2357_v6, %v2363_v3 }
0x13a3   :  { %4360 = vpow2.f32 %v2366_v61  ;;  %v2368_v11 = vmul.f32 1.442695, %v2365_v7  ;;  %v4224_v7 = vld [vmem:[#allocation11 + $0x40] sm:$0xff]  }
0x13a4   :  { %3995 = vmatprep.subr.bf16.mxu0 %v4224_v7 }
0x13a5   :  { %4362 = vpow2.f32 %v2368_v11  ;;  %v4225_v11 = vld [vmem:[#allocation11 + $0x48] sm:$0xff]   ;;  %3996 = vmatpush3.bf16.msra.mxu0 %v4224_v7  ;;  %v4235_v7 = vld [vmem:[#allocation13 + $0x90] ss:$8 sps:$4 sm:$0xff]  }
0x13a6   :  { %v2495_v14 = vpop.xlane.xlu0 %2494  ;;  %3997 = vmatprep.subr.bf16.mxu0 %v4225_v11 }
0x13a7   :  { %v2499_v15 = vsub.f32 %v2491_v30, %v2495_v14  ;;  %v4226_v14 = vld [vmem:[#allocation11 + $0x50] sm:$0xff]  }
0x13a9   :  { %v2501_v16 = vmul.f32 1.442695, %v2499_v15  ;;  %3998 = vmatpush3.bf16.msra.mxu0 %v4225_v11  ;;  %v4227_v15 = vld [vmem:[#allocation11 + $0x58] sm:$0xff]  }
0x13aa   :  { %v2498_v9 = vpop.xlane.xlu0 %2497  ;;  %3999 = vmatprep.subr.bf16.mxu0 %v4226_v14 }
0x13ab   :  { %4364 = vpow2.f32 %v2501_v16  ;;  %v2500_v10 = vsub.f32 %v2492_v46, %v2498_v9  ;;  %v4228_v16 = vld [vmem:[#allocation11 + $0x60] sm:$0xff]   ;;  %v4229_v9 = vld [vmem:[#allocation11 + $0x68] sm:$0xff]  }
0x13ad   :  { %v4361_v17 = vpop.eup %4360  ;;  %v2503_v4 = vmul.f32 1.442695, %v2500_v10  ;;  %4000 = vmatpush3.bf16.msra.mxu0 %v4226_v14 }
0x13ae   :  { %v2619_v51 = vpop.xlane.xlu1 %2618  ;;  %v2370_v53 = vsel %vm785_vm6, %v4361_v17, 0.0  ;;  %4001 = vmatprep.subr.bf16.mxu0 %v4227_v15 }
0x13af   :  { %v4363_v23 = vpop.eup %4362  ;;  %4366 = vpow2.f32 %v2503_v4  ;;  %v2623_v25 = vsub.f32 %v2615_v12, %v2619_v51  ;;  %2371 = vadd.xlane.f32.xlu1 %v2370_v53 }
0x13b0   :  { %v2622_v26 = vpop.xlane.xlu0 %2621  ;;  %v2373_v27 = vsel %vm785_vm6, %v4363_v23, 0.0 }
0x13b1   :  { %v2625_v28 = vmul.f32 1.442695, %v2623_v25  ;;  %v2624_v29 = vsub.f32 %v2616_v63, %v2622_v26  ;;  %2374 = vadd.xlane.f32.xlu0 %v2373_v27  ;;  %4002 = vmatpush3.bf16.msra.mxu0 %v4227_v15  ;;  %v4231_v26 = vld [vmem:[#allocation11 + $0x78] sm:$0xff]  }
0x13b2   :  { %4003 = vmatprep.subr.bf16.mxu0 %v4228_v16 }
0x13b3   :  { %4368 = vpow2.f32 %v2625_v28  ;;  %v2627_v32 = vmul.f32 1.442695, %v2624_v29 }
0x13b5   :  { %v4365_v5 = vpop.eup %4364  ;;  %4370 = vpow2.f32 %v2627_v32  ;;  %4004 = vmatpush3.bf16.msra.mxu0 %v4228_v16 }
0x13b6   :  { %v2505_v35 = vsel %vm785_vm6, %v4365_v5, 0.0  ;;  %4005 = vmatprep.subr.bf16.mxu0 %v4229_v9 }
0x13b7   :  { %2506 = vadd.xlane.f32.xlu1 %v2505_v35 }
0x13b9   :  { %v4367_v19 = vpop.eup %4366  ;;  %4006 = vmatpush3.bf16.msra.mxu0 %v4229_v9 }
0x13ba   :  { %v2508_v6 = vsel %vm785_vm6, %v4367_v19, 0.0 }
0x13bb   :  { %2509 = vadd.xlane.f32.xlu0 %v2508_v6 }
0x13bd   :  { %v4369_v36 = vpop.eup %4368 }
0x13be   :  { %v2629_v37 = vsel %vm785_vm6, %v4369_v36, 0.0 }
0x13bf   :  { %v4371_v38 = vpop.eup %4370  ;;  %2630 = vadd.xlane.f32.xlu1 %v2629_v37 }
0x13c0   :  { %v2632_v49 = vsel %vm785_vm6, %v4371_v38, 0.0 }
0x13c1   :  { %2633 = vadd.xlane.f32.xlu0 %v2632_v49 }
0x13d0   :  { %2382 = vrot.lane.b32.xlu1 %v5210_v60, %s5437_s10 }
0x13d7   :  { %2641 = vrot.lane.b32.xlu0 %v5208_v62, %s5437_s10 }
0x143c   :  { %v2372_v43 = vpop.xlane.xlu1 %2371 }
0x143e   :  { %v2375_v40 = vpop.xlane.xlu0 %2374 }
0x143f   :  { %4372 = vrcp.f32 %v2375_v40 }
0x1440   :  { %4374 = vrcp.f32 %v2372_v43 }
0x1444   :  { %v2507_v44 = vpop.xlane.xlu1 %2506 }
0x1448   :  { %v2510_v30 = vpop.xlane.xlu0 %2509 }
0x1449   :  { %4376 = vrcp.f32 %v2510_v30  ;;  %v4373_v31 = vpop.eup %4372 }
0x144a   :  { %4378 = vrcp.f32 %v2507_v44  ;;  %v4375_v48 = vpop.eup %4374  ;;  %v2379_v50 = vmul.f32 %v4373_v31, %v4363_v23 }
0x144b   :  { %v2378_v52 = vmul.f32 %v4375_v48, %v4361_v17  ;;  %v4230_v17 = vld [vmem:[#allocation11 + $0x70] sm:$0xff]  }
0x144c   :  { %v2631_v46 = vpop.xlane.xlu1 %2630  ;;  %4007 = vmatprep.subr.bf16.mxu0 %v4230_v17 }
0x144d   :  { %v2380_v60 = vpack.c.bf16 %v2379_v50, %v2378_v52  ;;  %4008 = vmatpush3.bf16.msra.mxu0 %v4230_v17 }
0x144e   :  { %v2634_v8 = vpop.xlane.xlu0 %2633  ;;  %4009 = vmatprep.subr.bf16.mxu0 %v4231_v26 }
0x144f   :  { %4380 = vrcp.f32 %v2634_v8  ;;  %v5287_v8 = vld [vmem:[%s5424_s13 + $0x8] sm:$0xff] }
0x1450   :  { %v2383_v59 = vpop.permute.xlu1 %2382  ;;  %4382 = vrcp.f32 %v2631_v46 }
0x1451   :  { %3966 = vmatpush3.bf16.msra.mxu1 %v2383_v59  ;;  %4010 = vmatpush3.bf16.msra.mxu0 %v4231_v26  ;;  %v4240_v26 = vld [vmem:[#allocation13 + $0xa4] ss:$8 sps:$4 sm:$0xff]  }
0x1452   :  { %3977 = vmatprep.subr.bf16.mxu1 %v4693_v54  ;;  %v2642_v47 = vpop.permute.xlu0 %2641 }
0x1453   :  { %v4377_v39 = vpop.eup %4376 }
0x1454   :  { %3968 = vmatmul.mubr.msk.bf16.vlgmr.msra.gmra.mrb[44].mxu1 %vm785_vm6, %v2380_v60  ;;  %v4379_v57 = vpop.eup %4378  ;;  %v2514_v12 = vmul.f32 %v4377_v39, %v4367_v19 }
0x1455   :  { %3978 = vmatpush3.bf16.msra.mxu1 %v5208_v62  ;;  %3979 = vmatprep.mubr.msk.bf16.mxu1 %vm4694_vm5, %v4693_v54  ;;  %v2513_v58 = vmul.f32 %v4379_v57, %v4365_v5 }
0x1456   :  { %3989 = vmatprep.subr.bf16.mxu1 %v4693_v54 }
0x1457   :  { %v2515_v63 = vpack.c.bf16 %v2514_v12, %v2513_v58 }
0x1459   :  { %v4381_v1 = vpop.eup %4380 }
0x145a   :  { %v4383_v2 = vpop.eup %4382  ;;  %v2638_v3 = vmul.f32 %v4381_v1, %v4371_v38 }
0x145b   :  { %v2637_v61 = vmul.f32 %v4383_v2, %v4369_v36 }
0x145c   :  { %3980 = vmatmul.mubr.msk.bf16.vlgmr.msra.gmra.mrb[48].mxu1 %vm785_vm6, %v2515_v63 }
0x145d   :  { %3990 = vmatpush3.bf16.msra.mxu1 %v2642_v47  ;;  %3991 = vmatprep.mubr.msk.bf16.mxu1 %vm4694_vm5, %v4693_v54  ;;  %v2639_v62 = vpack.c.bf16 %v2638_v3, %v2637_v61  ;;  %v4232_v3 = vld [vmem:[#allocation13 + $0x80] ss:$8 sps:$4 sm:$0xff]   ;;  %v4234_v61 = vld [vmem:[#allocation13 + $0x84] ss:$8 sps:$4 sm:$0xff]  }
0x145e   :  { %2977 = vmatprep.subr.bf16.mxu1 %v4234_v61 }
0x1464   :  { %3992 = vmatmul.mubr.msk.bf16.vlgmr.msra.gmra.mrb[52].mxu1 %vm785_vm6, %v2639_v62  ;;  %v4237_v62 = vld [vmem:[#allocation13 + $0x94] ss:$8 sps:$4 sm:$0xff]  }
0x1465   :  { %3009 = vmatprep.mubr.bf16.mxu1 %v4691_v0  ;;  %2978 = vmatpush1.bf16.msra.mxu1 %v4232_v3  ;;  %v2860_v3 = vrot.slane %v5287_v8, %v5021_v41 }
0x1466   :  { %2979 = vmatprep.subr.bf16.mxu1 %v4237_v62 }
0x1469   :  { %2980 = vmatpush1.bf16.msra.mxu1 %v4235_v7 }
0x146a   :  { %2981 = vmatprep.subr.bf16.mxu1 %v4240_v26  ;;  %v4268_v26 = vld [vmem:[#allocation16 + $0xf0] sm:$0xff]  }
0x1527   :  { %v2422_v10 = vpop.f32.mrb[44].mxu1 }
0x1528   :  { %v3969_v4 = vpop.f32.mrb[45].mxu1 }
0x1529   :  { %v2425_v51 = vpop.f32.mrb[46].mxu1 }
0x152a   :  { %v4102_v53 = vpack.i.bf16 %v2425_v51, %v2422_v10  ;;  %v3970_v23 = vpop.f32.mrb[47].mxu1 }
0x152c   :  { %4103 = vrot.lane.b32.xlu1 %v4102_v53, %s5437_s10 }
0x152f   :  { %v2553_v25 = vpop.f32.mrb[48].mxu1 }
0x1530   :  { %v3981_v27 = vpop.f32.mrb[49].mxu1 }
0x1531   :  { %v2556_v28 = vpop.f32.mrb[50].mxu1  ;;  %v4238_v27 = vld [vmem:[#allocation13 + $0xa0] ss:$8 sps:$4 sm:$0xff]  }
0x1532   :  { %v3982_v29 = vpop.f32.mrb[51].mxu1  ;;  %2982 = vmatpush1.bf16.msra.mxu1 %v4238_v27  ;;  %v4269_v27 = vld [vmem:[#allocation16 + $0xb0] sm:$0xff]  }
0x1533   :  { %v4241_v29 = vld [vmem:[#allocation13 + $0xb0] ss:$8 sps:$4 sm:$0xff]  }
0x1537   :  { %v2681_v32 = vpop.f32.mrb[52].mxu1 }
0x1538   :  { %v3993_v5 = vpop.f32.mrb[53].mxu1 }
0x1539   :  { %v2684_v35 = vpop.f32.mrb[54].mxu1  ;;  %v4244_v5 = vld [vmem:[#allocation13 + $0xc0] ss:$8 sps:$4 sm:$0xff]  }
0x153a   :  { %v4107_v19 = vpack.i.bf16 %v2684_v35, %v2681_v32  ;;  %v3994_v6 = vpop.f32.mrb[55].mxu1  ;;  %v4246_v32 = vld [vmem:[#allocation13 + $0xc4] ss:$8 sps:$4 sm:$0xff]   ;;  %v4249_v35 = vld [vmem:[#allocation13 + $0xd4] ss:$8 sps:$4 sm:$0xff]  }
0x153b   :  { %v4252_v6 = vld [vmem:[#allocation13 + $0xe4] ss:$8 sps:$4 sm:$0xff]  }
0x153c   :  { %4108 = vrot.lane.b32.xlu1 %v4107_v19, %s5437_s10  ;;  %v4247_v19 = vld [vmem:[#allocation13 + $0xd0] ss:$8 sps:$4 sm:$0xff]  }
0x159e   :  { %v4104_v36 = vpop.permute.xlu1 %4103 }
0x159f   :  { %v4106_v37 = vunpack.i.h.bf16 %v4104_v36  ;;  %v4105_v38 = vunpack.i.l.bf16 %v4104_v36  ;;  %v4250_v36 = vld [vmem:[#allocation13 + $0xe0] ss:$8 sps:$4 sm:$0xff]  }
0x15a1   :  { %v2437_v49 = vsel %vm729_vm4, %v5239_v21, %v4105_v38  ;;  %v2438_v40 = vsel %vm729_vm4, %v5241_v24, %v4106_v37  ;;  %v2703_v21 = vrot.slane %v5287_v8, %v4931_v45  ;;  %v4255_v37 = vld [vmem:[#allocation13 + $0xf4] ss:$8 sps:$4 sm:$0xff]   ;;  %v4253_v38 = vld [vmem:[#allocation13 + $0xf0] ss:$8 sps:$4 sm:$0xff]  }
0x15a2   :  { %v2698_v43 = vpack.c.bf16 %v2438_v40, %v2437_v49  ;;  %v4256_v49 = vld [vmem:[#allocation16 + $0xc0] sm:$0xff]  }
0x15a3   :  { %v4257_v40 = vld [vmem:[#allocation16 + $0x80] sm:$0xff]   ;;  %3764 = vmatprep.subr.bf16.mxu0 %v4256_v49 }
0x15a4   :  { %4011 = vmatprep.mubr.bf16.mxu0 %v2698_v43  ;;  %v4258_v43 = vld [vmem:[#allocation16 + $0xc8] sm:$0xff]  }
0x15ae   :  { %v4109_v44 = vpop.permute.xlu1 %4108 }
0x15af   :  { %v4111_v30 = vunpack.i.h.bf16 %v4109_v44  ;;  %v4110_v31 = vunpack.i.l.bf16 %v4109_v44  ;;  %v4259_v44 = vld [vmem:[#allocation16 + $0x88] sm:$0xff]  }
0x15b1   :  { %v2697_v46 = vsel %vm729_vm4, %v2556_v28, %v4111_v30  ;;  %v2696_v48 = vsel %vm729_vm4, %v2553_v25, %v4110_v31  ;;  %v4243_v28 = vld [vmem:[#allocation13 + $0xb4] ss:$8 sps:$4 sm:$0xff]  }
0x15b2   :  { %v2699_v50 = vpack.c.bf16 %v2697_v46, %v2696_v48  ;;  %2983 = vmatprep.subr.bf16.mxu1 %v4243_v28  ;;  %v4270_v28 = vld [vmem:[#allocation16 + $0xf8] sm:$0xff]  }
0x15b3   :  { %2984 = vmatpush1.bf16.msra.mxu1 %v4241_v29  ;;  %v4271_v29 = vld [vmem:[#allocation16 + $0xb8] sm:$0xff]  }
0x15b4   :  { %4012 = vmatmul.mubr.bf16.vlgmr.msra.gmra.mrb[56].mxu0 %v2699_v50  ;;  %2985 = vmatprep.subr.bf16.mxu1 %v4246_v32  ;;  %v2885_v32 = vld [vmem:[#allocation14 + $0x2] sm:$0x3] }
0x15b5   :  { %3765 = vmatpush3.bf16.msra.mxu0 %v4257_v40 }
0x15b6   :  { %3766 = vmatprep.subr.bf16.mxu0 %v4258_v43 }
0x15b7   :  { %2986 = vmatpush1.bf16.msra.mxu1 %v4244_v5  ;;  %v2890_v5 = vrot.slane %v2885_v32, %v4931_v45 }
0x15b8   :  { %2987 = vmatprep.subr.bf16.mxu1 %v4249_v35  ;;  %v2894_v35 = vrot.slane %v2885_v32, %v4991_v18 }
0x15b9   :  { %3767 = vmatpush3.bf16.msra.mxu0 %v4259_v44 }
0x15bb   :  { %2988 = vmatpush1.bf16.msra.mxu1 %v4247_v19 }
0x15bc   :  { %2989 = vmatprep.subr.bf16.mxu1 %v4252_v6 }
0x15bf   :  { %2990 = vmatpush1.bf16.msra.mxu1 %v4250_v36 }
0x15c0   :  { %2991 = vmatprep.subr.bf16.mxu1 %v4255_v37 }
0x15c3   :  { %2992 = vmatpush1.bf16.msra.mxu1 %v4253_v38 }
0x15c4   :  { %4015 = vmatprep.subr.bf16.mxu1 %v4693_v54 }
0x1687   :  { %v4013_v24 = vpop.f32.mrb[56].mxu0 }
0x1688   :  { %v2786_v52 = vpop.f32.mrb[57].mxu0  ;;  %v2795_v57 = vadd.f32 %v4013_v24, %v2703_v21 }
0x1689   :  { %v2787_v59 = vadd.f32 %v2786_v52, %v2703_v21  ;;  %v4014_v60 = vpop.f32.mrb[58].mxu0 }
0x168a   :  { %v2789_v39 = vpop.f32.mrb[59].mxu0  ;;  %v2798_v1 = vadd.f32 %v4014_v60, %v2703_v21  ;;  %v2803_v47 = vadd.f32 %v2795_v57, %v5185_v55 }
0x168b   :  { %v2790_v12 = vadd.f32 %v2789_v39, %v2703_v21  ;;  %v2801_v58 = vadd.f32 %v2787_v59, %v5175_v33 }
0x168c   :  { %v2804_v2 = vadd.f32 %v2798_v1, %v5187_v56 }
0x168d   :  { %2805 = vadd.xlane.f32.xlu0 %v2801_v58  ;;  %v2802_v63 = vadd.f32 %v2790_v12, %v5177_v34  ;;  %v2852_v12 = vrot.slane %v5287_v8, %v4991_v18 }
0x168f   :  { %2807 = vadd.xlane.f32.xlu1 %v2802_v63 }
0x1691   :  { %2809 = vadd.xlane.f32.xlu0 %v2803_v47 }
0x1695   :  { %2811 = vadd.xlane.f32.xlu0 %v2804_v2 }
0x171a   :  { %v2806_v33 = vpop.xlane.xlu0 %2805 }
0x171b   :  { %v2813_v11 = vmul.f32 0.0078125, %v2806_v33 }
0x171c   :  { %v2808_v14 = vpop.xlane.xlu1 %2807 }
0x171d   :  { %v5295_v34 = vsub.f32 %v2801_v58, %v2813_v11  ;;  %v2814_v15 = vmul.f32 0.0078125, %v2808_v14 }
0x171e   :  { %v2810_v16 = vpop.xlane.xlu0 %2809 }
0x171f   :  { %v5297_v55 = vsub.f32 %v2802_v63, %v2814_v15  ;;  %v2815_v9 = vmul.f32 0.0078125, %v2810_v16  ;;  %v2821_v56 = vmul.f32 %v5295_v34, %v5295_v34 }
0x1721   :  { %v5301_v10 = vsub.f32 %v2803_v47, %v2815_v9  ;;  %2825 = vadd.xlane.f32.xlu1 %v2821_v56  ;;  %v2822_v17 = vmul.f32 %v5297_v55, %v5297_v55 }
0x1722   :  { %v2812_v4 = vpop.xlane.xlu0 %2811 }
0x1723   :  { %v2816_v51 = vmul.f32 0.0078125, %v2812_v4  ;;  %2827 = vadd.xlane.f32.xlu0 %v2822_v17  ;;  %v2823_v53 = vmul.f32 %v5301_v10, %v5301_v10  ;;  %v4261_v17 = vld [vmem:[#allocation16 + $0x90] sm:$0xff]   ;;  %v4262_v4 = vld [vmem:[#allocation16 + $0xd8] sm:$0xff]  }
0x1725   :  { %v5307_v23 = vsub.f32 %v2804_v2, %v2816_v51  ;;  %2829 = vadd.xlane.f32.xlu1 %v2823_v53  ;;  %v4263_v51 = vld [vmem:[#allocation16 + $0x98] sm:$0xff]   ;;  %v4265_v53 = vld [vmem:[#allocation16 + $0xa0] sm:$0xff]  }
0x1727   :  { %v2824_v25 = vmul.f32 %v5307_v23, %v5307_v23 }
0x1729   :  { %2831 = vadd.xlane.f32.xlu0 %v2824_v25  ;;  %v4267_v25 = vld [vmem:[#allocation16 + $0xa8] sm:$0xff]  }
0x17ae   :  { %v2826_v30 = vpop.xlane.xlu1 %2825 }
0x17af   :  { %v2833_v31 = vmul.f32 0.0078125, %v2826_v30 }
0x17b0   :  { %v2828_v46 = vpop.xlane.xlu0 %2827 }
0x17b1   :  { %v2837_v48 = vadd.f32 1e-12, %v2833_v31  ;;  %v2834_v50 = vmul.f32 0.0078125, %v2828_v46 }
0x17b2   :  { %v2830_v21 = vpop.xlane.xlu1 %2829 }
0x17b3   :  { %4384 = vrsqrt.f32 %v2837_v48  ;;  %v2838_v24 = vadd.f32 1e-12, %v2834_v50  ;;  %v2835_v52 = vmul.f32 0.0078125, %v2830_v21 }
0x17b5   :  { %4386 = vrsqrt.f32 %v2838_v24  ;;  %v2839_v59 = vadd.f32 1e-12, %v2835_v52 }
0x17b6   :  { %v2832_v60 = vpop.xlane.xlu0 %2831 }
0x17b7   :  { %4388 = vrsqrt.f32 %v2839_v59  ;;  %v2836_v39 = vmul.f32 0.0078125, %v2832_v60 }
0x17b9   :  { %v2840_v57 = vadd.f32 1e-12, %v2836_v39 }
0x17bb   :  { %4390 = vrsqrt.f32 %v2840_v57 }
0x17bd   :  { %v4385_v58 = vpop.eup %4384 }
0x17be   :  { %v2845_v63 = vmul.f32 %v4385_v58, %v5295_v34 }
0x17bf   :  { %v4387_v1 = vpop.eup %4386 }
0x17c0   :  { %v2846_v47 = vmul.f32 %v4387_v1, %v5297_v55  ;;  %v2853_v2 = vmul.f32 %v2852_v12, %v2845_v63 }
0x17c1   :  { %v4389_v61 = vpop.eup %4388 }
0x17c2   :  { %v2854_v62 = vmul.f32 %v2852_v12, %v2846_v47  ;;  %v5318_v7 = vadd.f32 %v2860_v3, %v2853_v2  ;;  %v2847_v11 = vmul.f32 %v4389_v61, %v5301_v10  ;;  %v4260_v10 = vld [vmem:[#allocation16 + $0xd0] sm:$0xff]  }
0x17c3   :  { %3768 = vmatprep.subr.bf16.mxu0 %v4260_v10 }
0x17c4   :  { %v5320_v33 = vadd.f32 %v2860_v3, %v2854_v62  ;;  %v2855_v16 = vmul.f32 %v2852_v12, %v2847_v11  ;;  %3769 = vmatpush3.bf16.msra.mxu0 %v4261_v17 }
0x17c5   :  { %v4391_v14 = vpop.eup %4390  ;;  %3770 = vmatprep.subr.bf16.mxu0 %v4262_v4 }
0x17c6   :  { %v2865_v15 = vpack.c.bf16 %v5320_v33, %v5318_v7  ;;  %v2848_v34 = vmul.f32 %v4391_v14, %v5307_v23  ;;  %v5329_v9 = vadd.f32 %v2860_v3, %v2855_v16  ;;  %v4266_v23 = vld [vmem:[#allocation16 + $0xe8] sm:$0xff]  }
0x17c8   :  { %3010 = vmatmul.mubr.bf16.vlgmr.msra.gmra.mrb[56].mxu1 %v2865_v15  ;;  %v2856_v55 = vmul.f32 %v2852_v12, %v2848_v34  ;;  %3771 = vmatpush3.bf16.msra.mxu0 %v4263_v51 }
0x17c9   :  { %3019 = vmatprep.mubr.bf16.mxu1 %v4691_v0  ;;  %v4264_v0 = vld [vmem:[#allocation16 + $0xe0] sm:$0xff]  }
0x17ca   :  { %v5327_v41 = vadd.f32 %v2860_v3, %v2856_v55  ;;  %3772 = vmatprep.subr.bf16.mxu0 %v4264_v0 }
0x17cc   :  { %v2866_v56 = vpack.c.bf16 %v5327_v41, %v5329_v9  ;;  %3773 = vmatpush3.bf16.msra.mxu0 %v4265_v53 }
0x17cd   :  { %3774 = vmatprep.subr.bf16.mxu0 %v4266_v23 }
0x17d0   :  { %3020 = vmatmul.mubr.bf16.gmra.mrb[60].mxu1 %v2866_v56  ;;  %3775 = vmatpush3.bf16.msra.mxu0 %v4267_v25 }
0x17d1   :  { %4031 = vmatprep.mubr.msk.bf16.mxu1 %vm4694_vm5, %v4693_v54  ;;  %3776 = vmatprep.subr.bf16.mxu0 %v4268_v26 }
0x17d4   :  { %3777 = vmatpush3.bf16.msra.mxu0 %v4269_v27 }
0x17d5   :  { %3778 = vmatprep.subr.bf16.mxu0 %v4270_v28 }
0x17d8   :  { %3779 = vmatpush3.bf16.msra.mxu0 %v4271_v29 }
0x189b   :  { %v3011_v19 = vpop.f32.mrb[56].mxu1 }
0x189c   :  { %v3012_v6 = vadd.f32 %v3011_v19, %v2890_v5  ;;  %v3013_v36 = vpop.f32.mrb[57].mxu1 }
0x189d   :  { %v3014_v37 = vadd.f32 %v3013_v36, %v2894_v35  ;;  %v3015_v38 = vpop.f32.mrb[58].mxu1 }
0x189e   :  { %v3038_v49 = vmul.f32 0.70710677, %v3012_v6  ;;  %v3016_v40 = vadd.f32 %v3015_v38, %v2890_v5  ;;  %v3017_v43 = vpop.f32.mrb[59].mxu1  ;;  %v3030_v61 = vmul.f32 0.5, %v3012_v6 }
0x189f   :  { %v3039_v44 = vmul.f32 0.70710677, %v3014_v37  ;;  %v3018_v30 = vadd.f32 %v3017_v43, %v2894_v35  ;;  %v3031_v14 = vmul.f32 0.5, %v3014_v37  ;;  %v3110_v43 = vrot.slane %v5287_v8, %v1662_v13 }
0x18a0   :  { %4392 = verf.f32 %v3038_v49  ;;  %v3040_v31 = vmul.f32 0.70710677, %v3016_v40  ;;  %v3032_v62 = vmul.f32 0.5, %v3016_v40 }
0x18a1   :  { %4394 = verf.f32 %v3039_v44  ;;  %v3041_v46 = vmul.f32 0.70710677, %v3018_v30  ;;  %v3033_v15 = vmul.f32 0.5, %v3018_v30 }
0x18a2   :  { %4396 = verf.f32 %v3040_v31 }
0x18a3   :  { %4398 = verf.f32 %v3041_v46  ;;  %v3021_v48 = vpop.f32.mrb[60].mxu1 }
0x18a4   :  { %v3022_v45 = vadd.f32 %v3021_v48, %v2890_v5  ;;  %v3023_v50 = vpop.f32.mrb[61].mxu1 }
0x18a5   :  { %v3024_v18 = vadd.f32 %v3023_v50, %v2894_v35  ;;  %v3025_v21 = vpop.f32.mrb[62].mxu1 }
0x18a6   :  { %v3042_v24 = vmul.f32 0.70710677, %v3022_v45  ;;  %v3026_v52 = vadd.f32 %v3025_v21, %v2890_v5  ;;  %v3027_v59 = vpop.f32.mrb[63].mxu1  ;;  %v3034_v27 = vmul.f32 0.5, %v3022_v45 }
0x18a7   :  { %v3043_v60 = vmul.f32 0.70710677, %v3024_v18  ;;  %v3028_v39 = vadd.f32 %v3027_v59, %v2894_v35  ;;  %v3035_v32 = vmul.f32 0.5, %v3024_v18 }
0x18a8   :  { %4400 = verf.f32 %v3042_v24  ;;  %v3044_v57 = vmul.f32 0.70710677, %v3026_v52  ;;  %v3036_v28 = vmul.f32 0.5, %v3026_v52 }
0x18a9   :  { %4402 = verf.f32 %v3043_v60  ;;  %v3045_v12 = vmul.f32 0.70710677, %v3028_v39  ;;  %v3037_v5 = vmul.f32 0.5, %v3028_v39 }
0x18aa   :  { %v4393_v58 = vpop.eup %4392  ;;  %4404 = verf.f32 %v3044_v57 }
0x18ab   :  { %v4395_v63 = vpop.eup %4394  ;;  %v3054_v1 = vadd.f32 1.0, %v4393_v58  ;;  %4406 = verf.f32 %v3045_v12 }
0x18ac   :  { %v4397_v47 = vpop.eup %4396  ;;  %v3055_v2 = vadd.f32 1.0, %v4395_v63 }
0x18ad   :  { %v4399_v3 = vpop.eup %4398  ;;  %v3056_v11 = vadd.f32 1.0, %v4397_v47  ;;  %v3062_v16 = vmul.f32 %v3054_v1, %v3030_v61 }
0x18ae   :  { %v3057_v34 = vadd.f32 1.0, %v4399_v3  ;;  %v3063_v56 = vmul.f32 %v3055_v2, %v3031_v14  ;;  %v4273_v14 = vld [vmem:[%s5425_s14 + $0x8] sm:$0xff]  }
0x18af   :  { %v3064_v55 = vmul.f32 %v3056_v11, %v3032_v62 }
0x18b0   :  { %v3065_v10 = vmul.f32 %v3057_v34, %v3033_v15  ;;  %v4276_v15 = vld [vmem:[%s5425_s14 + $0x20] sm:$0xff]   ;;  %v4277_v34 = vld [vmem:[%s5425_s14 + $0x28] sm:$0xff]  }
0x18b1   :  { %v3070_v17 = vpack.c.bf16 %v3064_v55, %v3062_v16  ;;  %v4278_v16 = vld [vmem:[%s5425_s14 + $0x30] sm:$0xff]   ;;  %v4279_v55 = vld [vmem:[%s5425_s14 + $0x38] sm:$0xff]  }
0x18b2   :  { %v4401_v4 = vpop.eup %4400  ;;  %v3071_v51 = vpack.c.bf16 %v3065_v10, %v3063_v56 }
0x18b3   :  { %v4403_v0 = vpop.eup %4402  ;;  %v3058_v53 = vadd.f32 1.0, %v4401_v4 }
0x18b4   :  { %v4405_v23 = vpop.eup %4404  ;;  %v3059_v25 = vadd.f32 1.0, %v4403_v0  ;;  %3239 = vmatprep.mubr.bf16.mxu0 %v3071_v51 }
0x18b5   :  { %v4407_v26 = vpop.eup %4406  ;;  %v3060_v29 = vadd.f32 1.0, %v4405_v23  ;;  %3240 = vmatmul.mubr.bf16.vlgmr.msra.gmra.mrb[60].mxu0 %v3070_v17  ;;  %v3066_v19 = vmul.f32 %v3058_v53, %v3034_v27 }
0x18b6   :  { %v3061_v35 = vadd.f32 1.0, %v4407_v26  ;;  %v3067_v36 = vmul.f32 %v3059_v25, %v3035_v32 }
0x18b7   :  { %v3068_v6 = vmul.f32 %v3060_v29, %v3036_v28  ;;  %v3307_v28 = vrot.slane %v5287_v8, %v1859_v20 }
0x18b8   :  { %v3069_v37 = vmul.f32 %v3061_v35, %v3037_v5  ;;  %v3315_v5 = vrot.slane %v5287_v8, %v1867_v22 }
0x18b9   :  { %v3072_v38 = vpack.c.bf16 %v3068_v6, %v3066_v19 }
0x18ba   :  { %v3073_v49 = vpack.c.bf16 %v3069_v37, %v3067_v36 }
0x18bc   :  { %3247 = vmatprep.mubr.bf16.mxu0 %v3073_v49 }
0x18bd   :  { %3248 = vmatmul.mubr.bf16.gmra.mrb[64].mxu0 %v3072_v38 }
0x1988   :  { %v3780_v40 = vpop.f32.mrb[60].mxu0 }
0x1989   :  { %v3781_v44 = vpop.f32.mrb[61].mxu0 }
0x198a   :  { %v3782_v30 = vadd.f32 %v3781_v44, %v3780_v40  ;;  %v3783_v31 = vpop.f32.mrb[62].mxu0 }
0x198b   :  { %v3784_v46 = vpop.f32.mrb[63].mxu0 }
0x198c   :  { %v3242_v48 = vadd.f32 %v3782_v30, %v3110_v43  ;;  %v3785_v45 = vadd.f32 %v3784_v46, %v3783_v31 }
0x198e   :  { %v3245_v50 = vadd.f32 %v3785_v45, %v3110_v43  ;;  %v3256_v18 = vadd.f32 %v3242_v48, %v5318_v7 }
0x1990   :  { %3260 = vadd.xlane.f32.xlu0 %v3256_v18  ;;  %v3786_v21 = vpop.f32.mrb[64].mxu0  ;;  %v3257_v11 = vadd.f32 %v3245_v50, %v5320_v33  ;;  %v4275_v33 = vld [vmem:[%s5425_s14 + $0x18] sm:$0xff]  }
0x1991   :  { %v3787_v24 = vpop.f32.mrb[65].mxu0 }
0x1992   :  { %v3788_v52 = vadd.f32 %v3787_v24, %v3786_v21  ;;  %v3789_v59 = vpop.f32.mrb[66].mxu0 }
0x1993   :  { %v3790_v60 = vpop.f32.mrb[67].mxu0 }
0x1994   :  { %v3250_v39 = vadd.f32 %v3788_v52, %v3110_v43  ;;  %v3791_v57 = vadd.f32 %v3790_v60, %v3789_v59 }
0x1996   :  { %v3253_v12 = vadd.f32 %v3791_v57, %v3110_v43  ;;  %v3258_v13 = vadd.f32 %v3250_v39, %v5329_v9  ;;  %v4272_v9 = vld [vmem:[%s5425_s14] sm:$0xff]  }
0x1997   :  { %4016 = vmatpush3.bf16.msra.mxu1 %v4272_v9 }
0x1998   :  { %3264 = vadd.xlane.f32.xlu1 %v3258_v13  ;;  %v3259_v7 = vadd.f32 %v3253_v12, %v5327_v41  ;;  %4017 = vmatprep.subr.bf16.mxu1 %v4693_v54  ;;  %v4274_v41 = vld [vmem:[%s5425_s14 + $0x10] sm:$0xff]   ;;  %s4695_s14 = smov [#allocation17]  }
0x1999   :  { %s3449_s4 = sshll.u32 %s4695_s14, 4  ;;  %s3450_s4 = int_to_ptr.vmem [resolvable:$true] %s3449_s4 }
0x199a   :  { %s4616_s23 = scalar_lea.vmem %s3450_s4, 1536  ;;  %p4621_p3 = scmp.lt.s32.totalorder %s3450_s4, %s3450_s4 }
0x199b   :  { %4018 = vmatpush3.bf16.msra.mxu1 %v4273_v14  ;;  %p4617_p2 = scmp.ne.s32.totalorder %s3450_s4, %s4616_s23  ;;  %p4622_p4 = scmp.lt.s32.totalorder %s4616_s23, %s4616_s23 }
0x199c   :  { %4019 = vmatprep.subr.bf16.mxu1 %v4693_v54 }
0x199d   :  { %p4623_p5 = por %p4622_p4, %p4621_p3 }
0x199f   :  { %4020 = vmatpush3.bf16.msra.mxu1 %v4274_v41  ;;  %p4624_p6 = pnand %p4623_p5, %p4617_p2 }
0x19a0   :  { %4021 = vmatprep.subr.bf16.mxu1 %v4693_v54 }
0x19a3   :  { %4022 = vmatpush3.bf16.msra.mxu1 %v4275_v33 }
0x19a4   :  { %4023 = vmatprep.subr.bf16.mxu1 %v4693_v54 }
0x19a7   :  { %4024 = vmatpush3.bf16.msra.mxu1 %v4276_v15 }
0x19a8   :  { %4025 = vmatprep.subr.bf16.mxu1 %v4693_v54 }
0x19ab   :  { %4026 = vmatpush3.bf16.msra.mxu1 %v4277_v34 }
0x19ac   :  { %4027 = vmatprep.subr.bf16.mxu1 %v4693_v54 }
0x19af   :  { %4028 = vmatpush3.bf16.msra.mxu1 %v4278_v16 }
0x19b0   :  { %4029 = vmatprep.subr.bf16.mxu1 %v4693_v54 }
0x19b3   :  { %4030 = vmatpush3.bf16.msra.mxu1 %v4279_v55 }
0x1a1d   :  { %v3261_v58 = vpop.xlane.xlu0 %3260 }
0x1a1e   :  { %v3268_v63 = vmul.f32 0.0078125, %v3261_v58 }
0x1a20   :  { %v3272_v1 = vsub.f32 %v3256_v18, %v3268_v63 }
0x1a22   :  { %v3276_v47 = vmul.f32 %v3272_v1, %v3272_v1 }
0x1a24   :  { %3280 = vadd.xlane.f32.xlu0 %v3276_v47 }
0x1a25   :  { %v3265_v2 = vpop.xlane.xlu1 %3264 }
0x1a26   :  { %v3270_v3 = vmul.f32 0.0078125, %v3265_v2 }
0x1a28   :  { %v3274_v61 = vsub.f32 %v3258_v13, %v3270_v3  ;;  %3266 = vadd.xlane.f32.xlu0 %v3259_v7 }
0x1a2a   :  { %v3278_v62 = vmul.f32 %v3274_v61, %v3274_v61 }
0x1a2c   :  { %3284 = vadd.xlane.f32.xlu1 %v3278_v62 }
0x1a30   :  { %3262 = vadd.xlane.f32.xlu1 %v3257_v11 }
0x1ab1   :  { %v3281_v56 = vpop.xlane.xlu0 %3280 }
0x1ab2   :  { %v3288_v10 = vmul.f32 0.0078125, %v3281_v56 }
0x1ab4   :  { %v3292_v17 = vadd.f32 1e-12, %v3288_v10 }
0x1ab5   :  { %v3267_v4 = vpop.xlane.xlu0 %3266 }
0x1ab6   :  { %4408 = vrsqrt.f32 %v3292_v17  ;;  %v3271_v51 = vmul.f32 0.0078125, %v3267_v4 }
0x1ab8   :  { %v3275_v0 = vsub.f32 %v3259_v7, %v3271_v51 }
0x1ab9   :  { %v3285_v53 = vpop.xlane.xlu1 %3284 }
0x1aba   :  { %v3290_v23 = vmul.f32 0.0078125, %v3285_v53  ;;  %v3279_v25 = vmul.f32 %v3275_v0, %v3275_v0 }
0x1abc   :  { %v3294_v26 = vadd.f32 1e-12, %v3290_v23  ;;  %3286 = vadd.xlane.f32.xlu0 %v3279_v25 }
0x1abd   :  { %v3263_v27 = vpop.xlane.xlu1 %3262 }
0x1abe   :  { %4410 = vrsqrt.f32 %v3294_v26  ;;  %v3269_v54 = vmul.f32 0.0078125, %v3263_v27 }
0x1ac0   :  { %v4409_v29 = vpop.eup %4408  ;;  %v3273_v32 = vsub.f32 %v3257_v11, %v3269_v54 }
0x1ac1   :  { %v3300_v35 = vmul.f32 %v4409_v29, %v3272_v1 }
0x1ac2   :  { %v3277_v19 = vmul.f32 %v3273_v32, %v3273_v32 }
0x1ac3   :  { %v3308_v6 = vmul.f32 %v3307_v28, %v3300_v35 }
0x1ac4   :  { %3282 = vadd.xlane.f32.xlu1 %v3277_v19 }
0x1ac5   :  { %v3316_v36 = vadd.f32 %v3315_v5, %v3308_v6 }
0x1ac7   :  { %3321 = vst [vmem:[#allocation17 + $0x40] sm:$0xff] %v3316_v36 }
0x1ac8   :  { %v4411_v37 = vpop.eup %4410 }
0x1ac9   :  { %v3302_v38 = vmul.f32 %v4411_v37, %v3274_v61 }
0x1acb   :  { %v3310_v49 = vmul.f32 %v3307_v28, %v3302_v38 }
0x1acd   :  { %v3318_v40 = vadd.f32 %v3315_v5, %v3310_v49 }
0x1acf   :  { %3323 = vst [vmem:[#allocation17 + $0x50] sm:$0xff] %v3318_v40  ;;  %v3326_v43 = vrot.slane %v3318_v40, 7 }
0x1ad1   :  { %v3329_v20 = vsel %vm3328_vm7, %v3316_v36, %v3326_v43 }
0x1ad2   :  { %v3330_v44 = vpack.c.bf16 %v3329_v20, %v3329_v20 }
0x1ad4   :  { %4032 = vmatmul.mubr.bf16.vlgmr.msra.gmra.mrb[64].mxu1 %v3330_v44 }
0x1b49   :  { %v3287_v30 = vpop.xlane.xlu0 %3286 }
0x1b4a   :  { %v3291_v42 = vmul.f32 0.0078125, %v3287_v30 }
0x1b4c   :  { %v3295_v31 = vadd.f32 1e-12, %v3291_v42 }
0x1b4e   :  { %4412 = vrsqrt.f32 %v3295_v31 }
0x1b51   :  { %v3283_v22 = vpop.xlane.xlu1 %3282 }
0x1b52   :  { %v3289_v8 = vmul.f32 0.0078125, %v3283_v22 }
0x1b54   :  { %v3293_v46 = vadd.f32 1e-12, %v3289_v8 }
0x1b56   :  { %4414 = vrsqrt.f32 %v3293_v46 }
0x1b58   :  { %v4413_v48 = vpop.eup %4412 }
0x1b59   :  { %v3303_v45 = vmul.f32 %v4413_v48, %v3275_v0 }
0x1b5b   :  { %v3311_v50 = vmul.f32 %v3307_v28, %v3303_v45 }
0x1b5d   :  { %v3319_v18 = vadd.f32 %v3315_v5, %v3311_v50 }
0x1b5f   :  { %3324 = vst [vmem:[#allocation17 + $0x58] sm:$0xff] %v3319_v18 }
0x1b60   :  { %v4415_v21 = vpop.eup %4414 }
0x1b61   :  { %v3301_v24 = vmul.f32 %v4415_v21, %v3273_v32 }
0x1b63   :  { %v3309_v52 = vmul.f32 %v3307_v28, %v3301_v24 }
0x1b65   :  { %v3317_v59 = vadd.f32 %v3315_v5, %v3309_v52 }
0x1b67   :  { %3322 = vst [vmem:[#allocation17 + $0x48] sm:$0xff] %v3317_v59 }
0x1b68   :  { %4627 = shalt.err (!%p4624_p6)
}
0x1b69   :  { %s4628_s29 = scalar_lea.hbm %s5427_s16, 1536 }
0x1b6a   :  { %p4629_p7 = scmp.ne.s32.totalorder %s5427_s16, %s4628_s29  ;;  %p4632_p8 = scmp.lt.u32.totalorder %s4628_s29, %s5427_s16 }
0x1b6c   :  { %p4634_p9 = pnand %p4632_p8, %p4629_p7 }
0x1b6e   :  { %4637 = shalt.err (!%p4634_p9)
}
0x1b6f   :  { %3455 = dma.vmem_to_hbm [thread:$0]  %s3450_s4, 1536, %s5427_s16, [#allocation4], %s4675_s1, %s4675_s1, %s4676_s20  }
0x1b70   :  { %v3635_v60 = vld [vmem:[%s5426_s15] ss:$0 sm:$0xff]  ;;  %s4696_s25 = smov [#allocation18]  }
0x1b71   :  { %s3462_s9 = sshll.u32 %s4696_s25, 4  ;;  %s3463_s9 = int_to_ptr.vmem [resolvable:$true] %s3462_s9 }
0x1b72   :  { %s4638_s7 = scalar_lea.vmem %s3463_s9, 32  ;;  %p4643_p11 = scmp.lt.s32.totalorder %s3463_s9, %s3463_s9 }
0x1b73   :  { %p4639_p10 = scmp.ne.s32.totalorder %s3463_s9, %s4638_s7  ;;  %p4644_p12 = scmp.lt.s32.totalorder %s4638_s7, %s4638_s7 }
0x1b75   :  { %p4645_p13 = por %p4644_p12, %p4643_p11 }
0x1b77   :  { %p4646_p0 = pnand %p4645_p13, %p4639_p10 }
0x1ba7   :  { %v3436_v39 = vpop.f32.mrb[64].mxu1 }
0x1ba8   :  { %v3437_v57 = vadd.f32 %v3635_v60, %v3436_v39  ;;  %v4033_v12 = vpop.f32.mrb[65].mxu1 }
0x1ba9   :  { %v3439_v13 = vpop.f32.mrb[66].mxu1 }
0x1baa   :  { %4416 = vtanh.f32 %v3437_v57  ;;  %v4034_v58 = vpop.f32.mrb[67].mxu1 }
0x1bb4   :  { %v4417_v63 = vpop.eup %4416 }
0x1bb5   :  { %3443 = vst [vmem:[#allocation18] sm:$0x3] %v4417_v63 }
0x1bb6   :  { %4649 = shalt.err (!%p4646_p0)
}
0x1bb7   :  { %s5440_s1 = sld [smem:[#allocation29_spill]] }
0x1bbd   :  { %s4650_s20 = scalar_lea.hbm %s5440_s1, 32 }
0x1bbe   :  { %p4651_p1 = scmp.ne.s32.totalorder %s5440_s1, %s4650_s20  ;;  %p4654_p2 = scmp.lt.u32.totalorder %s4650_s20, %s5440_s1 }
0x1bc0   :  { %p4656_p3 = pnand %p4654_p2, %p4651_p1 }
0x1bc2   :  { %4659 = shalt.err (!%p4656_p3)
}
0x1bc3   :  { %3465 = dma.vmem_to_hbm [thread:$0]  %s3463_s9, 32, %s5440_s1, [#allocation19]  }
0x1bc4   :  { %4670 = dma.done.wait [#allocation4], 1536  }
0x1bc5   :  { %4671 = vsyncadd [#allocation4], 4294965760 }
0x1bc6   :  { %4672 = dma.done.wait [#allocation19], 32  }
0x1bc7   :  { %4673 = vsyncadd [#allocation19], 4294967264 }
0x1bc8   :  { %3472 = vsyncpa [#allocation3], 1 }
0x1bc9   :  { %3473 = vsyncpa [#allocation6], 1 }
0x1bca   :  { %3474 = vsyncpa [#allocation9], 1 }
0x1bcb   :  { %3475 = vsyncpa [#allocation12], 1 }
0x1bcc   :  { %3476 = vsyncpa [#allocation15], 1 }
0x1bcd   :  { %3477 = vsyncpa [#allocation4], 1 }
0x1bce   :  { %3478 = vsyncpa [#allocation19], 1 }

</bundles_post_ra>
